<compile_context>
chip_gen: v7x
topology: tpu7x:2x2x1
jax: 0.10.0
libtpu: 0.0.40
codegen_flags: <defaults>
</compile_context>

<pallas_src>
import functools

import jax
import jax.numpy as jnp
from jax.experimental import pallas as pl
from jax.experimental.pallas import tpu as pltpu

_LN_EPS = 1e-5                      # PyTorch nn.LayerNorm default
_SQRT_HALF = 0.7071067811865476


def _erf_f32(x):
    """Abramowitz & Stegun 7.1.26 erf (|error| <= 1.5e-7).

    Keeps the module's exact-erf GeLU semantics at f32 working precision while
    lowering to plain VPU ops + one EUP exp.
    """
    ax = jnp.abs(x)
    t = 1.0 / (1.0 + 0.3275911 * ax)
    poly = t * (0.254829592 + t * (-0.284496736 + t * (1.421413741
               + t * (-1.453152027 + t * 1.061405429))))
    e = poly * jnp.exp(-ax * ax)
    return jnp.where(x < 0.0, e - 1.0, 1.0 - e)


def _gelu(x, approximate=False):
    if approximate:
        # tanh GeLU (EUP); slight numerics deviation from the module's erf GeLU.
        return jax.nn.gelu(x, approximate=True)
    return 0.5 * x * (1.0 + _erf_f32(x * _SQRT_HALF))


def _seg_layernorm(x, seg, gamma, beta):
    """Per-C-segment LayerNorm in the lane-packed (rows, N*C) layout.

    `seg` is the (N*C, N*C) block averaging matrix (1/C inside each batch
    segment, 0 elsewhere): segment mean/var become two small MXU matmuls
    instead of cross-lane XLU reductions or sub-128-lane reshapes.
    """
    mu = jnp.dot(x, seg, preferred_element_type=jnp.float32)
    xc = x - mu
    var = jnp.dot(xc * xc, seg, preferred_element_type=jnp.float32)
    return xc * jax.lax.rsqrt(var + _LN_EPS) * gamma + beta


def mixer_kernel(src_ref, mem_ref,
                 w1t_ref, b1t_ref, w2t_ref, b2t_ref,
                 w1c_ref, b1c_ref, w2c_ref, b2c_ref,
                 g1_ref, be1_ref, g2_ref, be2_ref, seg_ref,
                 o_ref, x_scratch,
                 *, l_src, max_length, mm_dtype, gelu_approximate):
    """Whole batch in one grid step; activations lane-packed as (L_tot, N*C)."""
    l_tot = o_ref.shape[0]

    # ---- assemble x = [src ; zero-pad ; memory] in VMEM (module's pad+cat) --
    if l_src < max_length:
        x_scratch[...] = jnp.zeros_like(x_scratch)
    x_scratch[0:l_src, :] = src_ref[...].astype(jnp.float32)
    x_scratch[max_length:l_tot, :] = mem_ref[...].astype(jnp.float32)
    x = x_scratch[...]                                            # (L_tot, N*C)

    seg = seg_ref[...]

    # ---- norm1 + token mixer (MLP over the token axis) ----------------------
    # One MXU pass serves the whole batch: W1t(Ht, L_tot) @ z(L_tot, N*C).
    z = _seg_layernorm(x, seg, g1_ref[...], be1_ref[...])
    h = jnp.dot(w1t_ref[...], z.astype(mm_dtype),
                preferred_element_type=jnp.float32) + b1t_ref[...]   # (Ht, N*C)
    h = _gelu(h, gelu_approximate)
    tok = jnp.dot(w2t_ref[...], h.astype(mm_dtype),
                  preferred_element_type=jnp.float32) + b2t_ref[...]  # (L_tot, N*C)
    x1 = x + tok                               # dropout1: identity (eval mode)

    # ---- norm2 + channel mixer (block-diagonal (N*C, N*C) weights) ----------
    z2 = _seg_layernorm(x1, seg, g2_ref[...], be2_ref[...])
    h2 = _gelu(jnp.dot(z2.astype(mm_dtype), w1c_ref[...],
                       preferred_element_type=jnp.float32) + b1c_ref[...],
               gelu_approximate)
    ch = jnp.dot(h2.astype(mm_dtype), w2c_ref[...],
                 preferred_element_type=jnp.float32) + b2c_ref[...]
    # dropout2: identity (eval mode); 128-lane dense store.
    o_ref[...] = (x1 + ch).astype(o_ref.dtype)


def prepare_mixer_params(params, *, batch, matmul_dtype=jnp.bfloat16):
    """One-time (per model / batch size) weight preparation for the kernel.

    Pads the token-mixer hidden dim to the sublane granularity of the matmul
    operand dtype, builds the block-diagonal channel-mixer weights and the
    per-C-segment averaging matrix for the lane-packed (L_tot, N*C) layout,
    and tiles biases / LayerNorm params across the batch lanes.
    """
    (w1t, b1t, w2t, b2t, w1c_t, b1c, w2c_t, b2c, g1, be1, g2, be2) = params
    N = batch
    Ht, L_tot = w1t.shape
    C = w1c_t.shape[0]
    mm_dtype = jnp.dtype(matmul_dtype)

    # dtype-aware sublane granularity (f32: 8, bf16: 16, int8/fp8: 32).
    sub = {4: 8, 2: 16, 1: 32}[mm_dtype.itemsize]
    Ht_pad = ((Ht + sub - 1) // sub) * sub
    if Ht_pad != Ht:
        pad = Ht_pad - Ht          # exact zeros -> identical math
        w1t = jnp.pad(w1t, ((0, pad), (0, 0)))
        b1t = jnp.pad(b1t, ((0, pad), (0, 0)))
        w2t = jnp.pad(w2t, ((0, 0), (0, pad)))

    eye = jnp.eye(N, dtype=jnp.float32)
    w1c_blk = jnp.kron(eye, w1c_t.astype(jnp.float32))            # (N*C, N*C)
    w2c_blk = jnp.kron(eye, w2c_t.astype(jnp.float32))            # (N*C, N*C)
    seg = jnp.kron(eye, jnp.full((C, C), 1.0 / C, jnp.float32))   # averaging

    tile = lambda v: jnp.tile(v.reshape(1, -1), (1, N))           # (1,C)->(1,N*C)

    return dict(
        w1t=w1t.astype(mm_dtype), b1t=b1t.astype(jnp.float32),
        w2t=w2t.astype(mm_dtype), b2t=b2t.astype(jnp.float32),
        w1c_blk=w1c_blk.astype(mm_dtype), b1c=tile(b1c),
        w2c_blk=w2c_blk.astype(mm_dtype), b2c=tile(b2c),
        g1=tile(g1), be1=tile(be1), g2=tile(g2), be2=tile(be2),
        seg=seg, mm_dtype=mm_dtype, l_tot=L_tot, c=C, n=N,
    )


def mlp_mixer_encoder_layer(src, memory, prepared, *, max_length, memory_bus,
                            gelu_approximate=False):
    """src: (L, N, C), memory: (memory_bus, N, C) -> (max_length+memory_bus, N, C)."""
    L, N, C = src.shape
    assert memory.shape == (memory_bus, N, C)
    assert N == prepared['n'] and C == prepared['c']
    if L > max_length:
        raise ValueError('too large the input image!')
    L_tot = max_length + memory_bus
    assert prepared['l_tot'] == L_tot
    NC = N * C

    # Free reshapes (row-major flatten of the trailing (N, C) dims): the kernel
    # consumes/produces the lane-packed 2-D layout directly, so there are no
    # activation-sized transposes/concats outside the pallas_call.
    src2d = src.reshape(L, NC)
    mem2d = memory.reshape(memory_bus, NC)

    p = prepared
    kernel = functools.partial(
        mixer_kernel, l_src=L, max_length=max_length,
        mm_dtype=p['mm_dtype'], gelu_approximate=gelu_approximate)

    def full_spec(a):
        nd = a.ndim
        return pl.BlockSpec(a.shape, lambda g, _nd=nd: (0,) * _nd)

    ins = (src2d, mem2d,
           p['w1t'], p['b1t'], p['w2t'], p['b2t'],
           p['w1c_blk'], p['b1c'], p['w2c_blk'], p['b2c'],
           p['g1'], p['be1'], p['g2'], p['be2'], p['seg'])

    out2d = pl.pallas_call(
        kernel,
        out_shape=jax.ShapeDtypeStruct((L_tot, NC), src.dtype),
        grid_spec=pltpu.PrefetchScalarGridSpec(
            num_scalar_prefetch=0,
            # G = 1: whole batch in one step.  v5e/v6e are single-TensorCore so
            # more steps would just be a serial loop; on v7x a 2-TC split halves
            # lane packing for this latency-bound shape (review: likely a wash).
            grid=(1,),
            in_specs=[full_spec(a) for a in ins],
            out_specs=pl.BlockSpec((L_tot, NC), lambda g: (0, 0)),
            scratch_shapes=[pltpu.VMEM((L_tot, NC), jnp.float32)],
        ),
        compiler_params=pltpu.CompilerParams(
            dimension_semantics=("arbitrary",),
            vmem_limit_bytes=32 * 1024 * 1024),
    )(*ins)

    return out2d.reshape(L_tot, N, C)      # free reshape back to (L_tot, N, C)


# ----------------------------- pure-JAX reference ----------------------------
def _layernorm_ref(x, gamma, beta):
    mu = jnp.mean(x, axis=-1, keepdims=True)
    var = jnp.mean(jnp.square(x - mu), axis=-1, keepdims=True)
    return (x - mu) * jax.lax.rsqrt(var + _LN_EPS) * gamma + beta


def reference(src, memory, params, *, max_length, memory_bus, matmul_dtype=None):
    """Pure-JAX mirror of the PyTorch forward (eval mode).

    matmul_dtype=jnp.bfloat16 rounds the matmul operands to bf16 (f32
    accumulation), mirroring the kernel's bf16-MXU configuration.
    """
    (w1t, b1t, w2t, b2t, w1c_t, b1c, w2c_t, b2c, g1, be1, g2, be2) = params
    L, N, C = src.shape
    if matmul_dtype is None:
        md, pet = (lambda a: a), None
    else:
        md, pet = (lambda a: a.astype(matmul_dtype)), jnp.float32

    x = jnp.transpose(src, (1, 0, 2))
    mem = jnp.transpose(memory, (1, 0, 2))
    if L < max_length:
        x = jnp.concatenate(
            [x, jnp.zeros((N, max_length - L, C), src.dtype)], axis=1)
    x = jnp.concatenate([x, mem], axis=1)                       # (N, L_tot, C)

    z = _layernorm_ref(x, g1, be1)                              # norm1
    zt = jnp.transpose(z, (0, 2, 1))                            # (N, C, L_tot)
    h = jax.nn.gelu(jnp.einsum('ncl,hl->nch', md(zt), md(w1t),
                               preferred_element_type=pet) + b1t[:, 0],
                    approximate=False)
    tok = jnp.einsum('nch,lh->ncl', md(h), md(w2t),
                     preferred_element_type=pet) + b2t[:, 0]
    x1 = x + jnp.transpose(tok, (0, 2, 1))

    z2 = _layernorm_ref(x1, g2, be2)                            # norm2
    h2 = jax.nn.gelu(jnp.einsum('nlc,ck->nlk', md(z2), md(w1c_t),
                                preferred_element_type=pet) + b1c,
                     approximate=False)
    ch = jnp.einsum('nlk,kc->nlc', md(h2), md(w2c_t),
                    preferred_element_type=pet) + b2c
    return jnp.transpose(x1 + ch, (1, 0, 2))


def init_params(key, d_model, max_length, memory_bus):
    C = d_model
    L_tot = max_length + memory_bus
    Ht = 15 * 27 + 8      # tokenMixer hidden (fixed by the module) = 413
    Ch = C                # channelMixer hidden (= d_model)
    ks = jax.random.split(key, 8)

    def kaiming(k, out_f, in_f):   # fan_out, relu -> std = sqrt(2/out_f)
        return jax.random.normal(k, (out_f, in_f), jnp.float32) * jnp.sqrt(2.0 / out_f)

    def bias(k, out_f, in_f):      # PyTorch Linear default: U(-1/sqrt(in), 1/sqrt(in))
        b = 1.0 / jnp.sqrt(in_f)
        return jax.random.uniform(k, (out_f,), jnp.float32, -b, b)

    w1t = kaiming(ks[0], Ht, L_tot)
    b1t = bias(ks[1], Ht, L_tot).reshape(Ht, 1)
    w2t = kaiming(ks[2], L_tot, Ht)
    b2t = bias(ks[3], L_tot, Ht).reshape(L_tot, 1)

    w1c_t = kaiming(ks[4], Ch, C).T                             # pre-T: (C, Ch)
    b1c = bias(ks[5], Ch, C).reshape(1, Ch)
    w2c_t = kaiming(ks[6], C, Ch).T                             # pre-T: (Ch, C)
    b2c = bias(ks[7], C, Ch).reshape(1, C)

    g1 = jnp.ones((1, C), jnp.float32)
    be1 = jnp.zeros((1, C), jnp.float32)
    g2 = jnp.ones((1, C), jnp.float32)
    be2 = jnp.zeros((1, C), jnp.float32)
    return (w1t, b1t, w2t, b2t, w1c_t, b1c, w2c_t, b2c, g1, be1, g2, be2)


if __name__ == "__main__":
    d_model = 32
    max_length = 16
    memory_bus = 8
    N = 4                       # N * d_model = 128 lanes -> fully lane-dense
    L = 12                      # < max_length to exercise the zero-padding path

    key = jax.random.PRNGKey(0)
    k_src, k_mem, k_par = jax.random.split(key, 3)
    src = jax.random.normal(k_src, (L, N, d_model), jnp.float32)
    memory = jax.random.normal(k_mem, (memory_bus, N, d_model), jnp.float32)
    params = init_params(k_par, d_model, max_length, memory_bus)
    L_tot = max_length + memory_bus

    ref_f32 = reference(src, memory, params,
                        max_length=max_length, memory_bus=memory_bus)
    ref_bf16 = reference(src, memory, params,
                         max_length=max_length, memory_bus=memory_bus,
                         matmul_dtype=jnp.bfloat16)

    # Tolerances carry headroom because the MXU's precision mode for the f32
    # LayerNorm-stat matmuls is generation/compiler dependent; observed
    # agreement is far tighter.  Structural bugs would produce O(1) errors.

    # 1) Default perf configuration: bf16 MXU operands, f32 accumulation.
    prep_bf16 = prepare_mixer_params(params, batch=N, matmul_dtype=jnp.bfloat16)
    out_bf16 = mlp_mixer_encoder_layer(src, memory, prep_bf16,
                                       max_length=max_length,
                                       memory_bus=memory_bus)
    out_bf16 = jax.block_until_ready(out_bf16)
    assert out_bf16.shape == (L_tot, N, d_model)
    assert bool(jnp.all(jnp.isfinite(out_bf16)))
    assert jnp.allclose(out_bf16, ref_bf16, atol=5e-2, rtol=5e-2), \
        "bf16 kernel/reference mismatch"
    rel_bb = float(jnp.linalg.norm(out_bf16 - ref_bf16) / jnp.linalg.norm(ref_bf16))
    assert rel_bb < 2e-2, f"bf16 kernel vs bf16 reference rel err too large: {rel_bb}"
    rel_bf = float(jnp.linalg.norm(out_bf16 - ref_f32) / jnp.linalg.norm(ref_f32))
    assert rel_bf < 5e-2, f"bf16 accuracy budget vs f32 reference exceeded: {rel_bf}"

    # 2) Exact-operand configuration (f32 MXU operands).
    prep_f32 = prepare_mixer_params(params, batch=N, matmul_dtype=jnp.float32)
    out_f32 = mlp_mixer_encoder_layer(src, memory, prep_f32,
                                      max_length=max_length,
                                      memory_bus=memory_bus)
    out_f32 = jax.block_until_ready(out_f32)
    assert jnp.allclose(out_f32, ref_f32, atol=5e-2, rtol=5e-2), \
        "f32 kernel/reference mismatch"
    rel_ff = float(jnp.linalg.norm(out_f32 - ref_f32) / jnp.linalg.norm(ref_f32))
    assert rel_ff < 2e-2, f"f32 path relative error too large: {rel_ff}"

    print("KERNEL_OK")
</pallas_src>

<mosaic_0001>
module attributes {stable_mosaic.version = 11 : i64} {
  func.func @mixer_kernel(%arg0: i32, %arg1: memref<12x128xf32, #tpu.memory_space<vmem>>, %arg2: memref<8x128xf32, #tpu.memory_space<vmem>>, %arg3: memref<416x24xbf16, #tpu.memory_space<vmem>>, %arg4: memref<416x1xf32, #tpu.memory_space<vmem>>, %arg5: memref<24x416xbf16, #tpu.memory_space<vmem>>, %arg6: memref<24x1xf32, #tpu.memory_space<vmem>>, %arg7: memref<128x128xbf16, #tpu.memory_space<vmem>>, %arg8: memref<1x128xf32, #tpu.memory_space<vmem>>, %arg9: memref<128x128xbf16, #tpu.memory_space<vmem>>, %arg10: memref<1x128xf32, #tpu.memory_space<vmem>>, %arg11: memref<1x128xf32, #tpu.memory_space<vmem>>, %arg12: memref<1x128xf32, #tpu.memory_space<vmem>>, %arg13: memref<1x128xf32, #tpu.memory_space<vmem>>, %arg14: memref<1x128xf32, #tpu.memory_space<vmem>>, %arg15: memref<128x128xf32, #tpu.memory_space<vmem>>, %arg16: memref<24x128xf32, #tpu.memory_space<vmem>>, %arg17: memref<24x128xf32, #tpu.memory_space<vmem>>) attributes {dimension_semantics = [#tpu.dimension_semantics<arbitrary>], iteration_bounds = array<i64: 1>, scalar_prefetch = 0 : i64, scratch_operands = 1 : i64, tpu.core_type = #tpu.core_type<tc>, window_params = [{pipeline_mode = #tpu.pipeline_mode<synchronous>, transform_indices = @transform_0, window_bounds = array<i64: 12, 128>}, {pipeline_mode = #tpu.pipeline_mode<synchronous>, transform_indices = @transform_1, window_bounds = array<i64: 8, 128>}, {pipeline_mode = #tpu.pipeline_mode<synchronous>, transform_indices = @transform_2, window_bounds = array<i64: 416, 24>}, {pipeline_mode = #tpu.pipeline_mode<synchronous>, transform_indices = @transform_3, window_bounds = array<i64: 416, 1>}, {pipeline_mode = #tpu.pipeline_mode<synchronous>, transform_indices = @transform_4, window_bounds = array<i64: 24, 416>}, {pipeline_mode = #tpu.pipeline_mode<synchronous>, transform_indices = @transform_5, window_bounds = array<i64: 24, 1>}, {pipeline_mode = #tpu.pipeline_mode<synchronous>, transform_indices = @transform_6, window_bounds = array<i64: 128, 128>}, {pipeline_mode = #tpu.pipeline_mode<synchronous>, transform_indices = @transform_7, window_bounds = array<i64: 1, 128>}, {pipeline_mode = #tpu.pipeline_mode<synchronous>, transform_indices = @transform_8, window_bounds = array<i64: 128, 128>}, {pipeline_mode = #tpu.pipeline_mode<synchronous>, transform_indices = @transform_9, window_bounds = array<i64: 1, 128>}, {pipeline_mode = #tpu.pipeline_mode<synchronous>, transform_indices = @transform_10, window_bounds = array<i64: 1, 128>}, {pipeline_mode = #tpu.pipeline_mode<synchronous>, transform_indices = @transform_11, window_bounds = array<i64: 1, 128>}, {pipeline_mode = #tpu.pipeline_mode<synchronous>, transform_indices = @transform_12, window_bounds = array<i64: 1, 128>}, {pipeline_mode = #tpu.pipeline_mode<synchronous>, transform_indices = @transform_13, window_bounds = array<i64: 1, 128>}, {pipeline_mode = #tpu.pipeline_mode<synchronous>, transform_indices = @transform_14, window_bounds = array<i64: 128, 128>}, {pipeline_mode = #tpu.pipeline_mode<synchronous>, transform_indices = @transform_15, window_bounds = array<i64: 24, 128>}]} {
    %cst = arith.constant 0.000000e+00 : f32
    %0 = vector.broadcast %cst : f32 to vector<24x128xf32>
    %c0 = arith.constant 0 : index
    %c0_0 = arith.constant 0 : index
    %1 = vector.load %arg17[%c0, %c0_0] : memref<24x128xf32, #tpu.memory_space<vmem>>, vector<24x128xf32>
    tpu.vector_store %arg17[%c0, %c0_0], %0 {strides = array<i32>} : memref<24x128xf32, #tpu.memory_space<vmem>>, vector<24x128xf32>,
    %c0_1 = arith.constant 0 : index
    %c0_2 = arith.constant 0 : index
    %2 = vector.load %arg1[%c0_1, %c0_2] : memref<12x128xf32, #tpu.memory_space<vmem>>, vector<12x128xf32>
    %c0_3 = arith.constant 0 : index
    %c0_4 = arith.constant 0 : index
    %3 = vector.load %arg17[%c0_3, %c0_4] : memref<24x128xf32, #tpu.memory_space<vmem>>, vector<12x128xf32>
    tpu.vector_store %arg17[%c0_3, %c0_4], %2 {strides = array<i32>} : memref<24x128xf32, #tpu.memory_space<vmem>>, vector<12x128xf32>,
    %c0_5 = arith.constant 0 : index
    %c0_6 = arith.constant 0 : index
    %4 = vector.load %arg2[%c0_5, %c0_6] : memref<8x128xf32, #tpu.memory_space<vmem>>, vector<8x128xf32>
    %c16 = arith.constant 16 : index
    %c0_7 = arith.constant 0 : index
    %5 = vector.load %arg17[%c16, %c0_7] : memref<24x128xf32, #tpu.memory_space<vmem>>, vector<8x128xf32>
    tpu.vector_store %arg17[%c16, %c0_7], %4 {strides = array<i32>} : memref<24x128xf32, #tpu.memory_space<vmem>>, vector<8x128xf32>,
    %c0_8 = arith.constant 0 : index
    %c0_9 = arith.constant 0 : index
    %6 = vector.load %arg17[%c0_8, %c0_9] : memref<24x128xf32, #tpu.memory_space<vmem>>, vector<24x128xf32>
    %c0_10 = arith.constant 0 : index
    %c0_11 = arith.constant 0 : index
    %7 = vector.load %arg15[%c0_10, %c0_11] : memref<128x128xf32, #tpu.memory_space<vmem>>, vector<128x128xf32>
    %c0_12 = arith.constant 0 : index
    %c0_13 = arith.constant 0 : index
    %8 = vector.load %arg11[%c0_12, %c0_13] : memref<1x128xf32, #tpu.memory_space<vmem>>, vector<1x128xf32>
    %c0_14 = arith.constant 0 : index
    %c0_15 = arith.constant 0 : index
    %9 = vector.load %arg12[%c0_14, %c0_15] : memref<1x128xf32, #tpu.memory_space<vmem>>, vector<1x128xf32>
    %cst_16 = arith.constant dense<0.000000e+00> : vector<24x128xf32>
    %10 = tpu.matmul %6, %7, %cst_16 {dimension_numbers = #tpu.dot_dimension_numbers<[1], [0], [0], [1], [0, 0, 1, 1], [], []>} : vector<24x128xf32>, vector<128x128xf32>, vector<24x128xf32> -> vector<24x128xf32>
    %11 = arith.subf %6, %10 : vector<24x128xf32>
    %12 = arith.mulf %11, %11 : vector<24x128xf32>
    %cst_17 = arith.constant dense<0.000000e+00> : vector<24x128xf32>
    %13 = tpu.matmul %12, %7, %cst_17 {dimension_numbers = #tpu.dot_dimension_numbers<[1], [0], [0], [1], [0, 0, 1, 1], [], []>} : vector<24x128xf32>, vector<128x128xf32>, vector<24x128xf32> -> vector<24x128xf32>
    %cst_18 = arith.constant 9.99999974E-6 : f32
    %14 = vector.broadcast %cst_18 : f32 to vector<24x128xf32>
    %15 = arith.addf %13, %14 : vector<24x128xf32>
    %16 = math.rsqrt %15 : vector<24x128xf32>
    %17 = arith.mulf %11, %16 : vector<24x128xf32>
    %18 = vector.broadcast %8 : vector<1x128xf32> to vector<24x128xf32>
    %19 = arith.mulf %17, %18 : vector<24x128xf32>
    %20 = vector.broadcast %9 : vector<1x128xf32> to vector<24x128xf32>
    %21 = arith.addf %19, %20 : vector<24x128xf32>
    %c0_19 = arith.constant 0 : index
    %c0_20 = arith.constant 0 : index
    %22 = vector.load %arg3[%c0_19, %c0_20] : memref<416x24xbf16, #tpu.memory_space<vmem>>, vector<416x24xbf16>
    %23 = arith.truncf %21 : vector<24x128xf32> to vector<24x128xbf16>
    %cst_21 = arith.constant dense<0.000000e+00> : vector<416x128xf32>
    %24 = tpu.matmul %22, %23, %cst_21 {dimension_numbers = #tpu.dot_dimension_numbers<[1], [0], [0], [1], [0, 0, 1, 1], [], []>} : vector<416x24xbf16>, vector<24x128xbf16>, vector<416x128xf32> -> vector<416x128xf32>
    %c0_22 = arith.constant 0 : index
    %c0_23 = arith.constant 0 : index
    %25 = vector.load %arg4[%c0_22, %c0_23] : memref<416x1xf32, #tpu.memory_space<vmem>>, vector<416x1xf32>
    %26 = vector.broadcast %25 : vector<416x1xf32> to vector<416x128xf32>
    %27 = arith.addf %24, %26 : vector<416x128xf32>
    %cst_24 = arith.constant 5.000000e-01 : f32
    %28 = vector.broadcast %cst_24 : f32 to vector<416x128xf32>
    %29 = arith.mulf %28, %27 : vector<416x128xf32>
    %cst_25 = arith.constant 0.707106769 : f32
    %30 = vector.broadcast %cst_25 : f32 to vector<416x128xf32>
    %31 = arith.mulf %27, %30 : vector<416x128xf32>
    %32 = math.absf %31 : vector<416x128xf32>
    %cst_26 = arith.constant 0.327591091 : f32
    %33 = vector.broadcast %cst_26 : f32 to vector<416x128xf32>
    %34 = arith.mulf %33, %32 : vector<416x128xf32>
    %cst_27 = arith.constant 1.000000e+00 : f32
    %35 = vector.broadcast %cst_27 : f32 to vector<416x128xf32>
    %36 = arith.addf %35, %34 : vector<416x128xf32>
    %cst_28 = arith.constant 1.000000e+00 : f32
    %37 = vector.broadcast %cst_28 : f32 to vector<416x128xf32>
    %38 = arith.divf %37, %36 : vector<416x128xf32>
    %cst_29 = arith.constant 1.06140542 : f32
    %39 = vector.broadcast %cst_29 : f32 to vector<416x128xf32>
    %40 = arith.mulf %38, %39 : vector<416x128xf32>
    %cst_30 = arith.constant -1.45315206 : f32
    %41 = vector.broadcast %cst_30 : f32 to vector<416x128xf32>
    %42 = arith.addf %41, %40 : vector<416x128xf32>
    %43 = arith.mulf %38, %42 : vector<416x128xf32>
    %cst_31 = arith.constant 1.42141378 : f32
    %44 = vector.broadcast %cst_31 : f32 to vector<416x128xf32>
    %45 = arith.addf %44, %43 : vector<416x128xf32>
    %46 = arith.mulf %38, %45 : vector<416x128xf32>
    %cst_32 = arith.constant -0.284496725 : f32
    %47 = vector.broadcast %cst_32 : f32 to vector<416x128xf32>
    %48 = arith.addf %47, %46 : vector<416x128xf32>
    %49 = arith.mulf %38, %48 : vector<416x128xf32>
    %cst_33 = arith.constant 0.254829586 : f32
    %50 = vector.broadcast %cst_33 : f32 to vector<416x128xf32>
    %51 = arith.addf %50, %49 : vector<416x128xf32>
    %52 = arith.mulf %38, %51 : vector<416x128xf32>
    %cst_34 = arith.constant 0.000000e+00 : f32
    %53 = vector.broadcast %cst_34 : f32 to vector<416x128xf32>
    %54 = arith.subf %53, %32 : vector<416x128xf32>
    %55 = arith.mulf %54, %32 : vector<416x128xf32>
    %56 = math.exp %55 : vector<416x128xf32>
    %57 = arith.mulf %52, %56 : vector<416x128xf32>
    %cst_35 = arith.constant 0.000000e+00 : f32
    %58 = vector.broadcast %cst_35 : f32 to vector<416x128xf32>
    %59 = arith.cmpf olt, %31, %58 : vector<416x128xf32>
    %cst_36 = arith.constant 1.000000e+00 : f32
    %60 = vector.broadcast %cst_36 : f32 to vector<416x128xf32>
    %61 = arith.subf %57, %60 : vector<416x128xf32>
    %cst_37 = arith.constant 1.000000e+00 : f32
    %62 = vector.broadcast %cst_37 : f32 to vector<416x128xf32>
    %63 = arith.subf %62, %57 : vector<416x128xf32>
    %64 = arith.select %59, %61, %63 : vector<416x128xi1>, vector<416x128xf32>
    %cst_38 = arith.constant 1.000000e+00 : f32
    %65 = vector.broadcast %cst_38 : f32 to vector<416x128xf32>
    %66 = arith.addf %65, %64 : vector<416x128xf32>
    %67 = arith.mulf %29, %66 : vector<416x128xf32>
    %c0_39 = arith.constant 0 : index
    %c0_40 = arith.constant 0 : index
    %68 = vector.load %arg5[%c0_39, %c0_40] : memref<24x416xbf16, #tpu.memory_space<vmem>>, vector<24x416xbf16>
    %69 = arith.truncf %67 : vector<416x128xf32> to vector<416x128xbf16>
    %cst_41 = arith.constant dense<0.000000e+00> : vector<24x128xf32>
    %70 = tpu.matmul %68, %69, %cst_41 {dimension_numbers = #tpu.dot_dimension_numbers<[1], [0], [0], [1], [0, 0, 1, 1], [], []>} : vector<24x416xbf16>, vector<416x128xbf16>, vector<24x128xf32> -> vector<24x128xf32>
    %c0_42 = arith.constant 0 : index
    %c0_43 = arith.constant 0 : index
    %71 = vector.load %arg6[%c0_42, %c0_43] : memref<24x1xf32, #tpu.memory_space<vmem>>, vector<24x1xf32>
    %72 = vector.broadcast %71 : vector<24x1xf32> to vector<24x128xf32>
    %73 = arith.addf %70, %72 : vector<24x128xf32>
    %74 = arith.addf %6, %73 : vector<24x128xf32>
    %c0_44 = arith.constant 0 : index
    %c0_45 = arith.constant 0 : index
    %75 = vector.load %arg13[%c0_44, %c0_45] : memref<1x128xf32, #tpu.memory_space<vmem>>, vector<1x128xf32>
    %c0_46 = arith.constant 0 : index
    %c0_47 = arith.constant 0 : index
    %76 = vector.load %arg14[%c0_46, %c0_47] : memref<1x128xf32, #tpu.memory_space<vmem>>, vector<1x128xf32>
    %cst_48 = arith.constant dense<0.000000e+00> : vector<24x128xf32>
    %77 = tpu.matmul %74, %7, %cst_48 {dimension_numbers = #tpu.dot_dimension_numbers<[1], [0], [0], [1], [0, 0, 1, 1], [], []>} : vector<24x128xf32>, vector<128x128xf32>, vector<24x128xf32> -> vector<24x128xf32>
    %78 = arith.subf %74, %77 : vector<24x128xf32>
    %79 = arith.mulf %78, %78 : vector<24x128xf32>
    %cst_49 = arith.constant dense<0.000000e+00> : vector<24x128xf32>
    %80 = tpu.matmul %79, %7, %cst_49 {dimension_numbers = #tpu.dot_dimension_numbers<[1], [0], [0], [1], [0, 0, 1, 1], [], []>} : vector<24x128xf32>, vector<128x128xf32>, vector<24x128xf32> -> vector<24x128xf32>
    %cst_50 = arith.constant 9.99999974E-6 : f32
    %81 = vector.broadcast %cst_50 : f32 to vector<24x128xf32>
    %82 = arith.addf %80, %81 : vector<24x128xf32>
    %83 = math.rsqrt %82 : vector<24x128xf32>
    %84 = arith.mulf %78, %83 : vector<24x128xf32>
    %85 = vector.broadcast %75 : vector<1x128xf32> to vector<24x128xf32>
    %86 = arith.mulf %84, %85 : vector<24x128xf32>
    %87 = vector.broadcast %76 : vector<1x128xf32> to vector<24x128xf32>
    %88 = arith.addf %86, %87 : vector<24x128xf32>
    %89 = arith.truncf %88 : vector<24x128xf32> to vector<24x128xbf16>
    %c0_51 = arith.constant 0 : index
    %c0_52 = arith.constant 0 : index
    %90 = vector.load %arg7[%c0_51, %c0_52] : memref<128x128xbf16, #tpu.memory_space<vmem>>, vector<128x128xbf16>
    %cst_53 = arith.constant dense<0.000000e+00> : vector<24x128xf32>
    %91 = tpu.matmul %89, %90, %cst_53 {dimension_numbers = #tpu.dot_dimension_numbers<[1], [0], [0], [1], [0, 0, 1, 1], [], []>} : vector<24x128xbf16>, vector<128x128xbf16>, vector<24x128xf32> -> vector<24x128xf32>
    %c0_54 = arith.constant 0 : index
    %c0_55 = arith.constant 0 : index
    %92 = vector.load %arg8[%c0_54, %c0_55] : memref<1x128xf32, #tpu.memory_space<vmem>>, vector<1x128xf32>
    %93 = vector.broadcast %92 : vector<1x128xf32> to vector<24x128xf32>
    %94 = arith.addf %91, %93 : vector<24x128xf32>
    %cst_56 = arith.constant 5.000000e-01 : f32
    %95 = vector.broadcast %cst_56 : f32 to vector<24x128xf32>
    %96 = arith.mulf %95, %94 : vector<24x128xf32>
    %cst_57 = arith.constant 0.707106769 : f32
    %97 = vector.broadcast %cst_57 : f32 to vector<24x128xf32>
    %98 = arith.mulf %94, %97 : vector<24x128xf32>
    %99 = math.absf %98 : vector<24x128xf32>
    %cst_58 = arith.constant 0.327591091 : f32
    %100 = vector.broadcast %cst_58 : f32 to vector<24x128xf32>
    %101 = arith.mulf %100, %99 : vector<24x128xf32>
    %cst_59 = arith.constant 1.000000e+00 : f32
    %102 = vector.broadcast %cst_59 : f32 to vector<24x128xf32>
    %103 = arith.addf %102, %101 : vector<24x128xf32>
    %cst_60 = arith.constant 1.000000e+00 : f32
    %104 = vector.broadcast %cst_60 : f32 to vector<24x128xf32>
    %105 = arith.divf %104, %103 : vector<24x128xf32>
    %cst_61 = arith.constant 1.06140542 : f32
    %106 = vector.broadcast %cst_61 : f32 to vector<24x128xf32>
    %107 = arith.mulf %105, %106 : vector<24x128xf32>
    %cst_62 = arith.constant -1.45315206 : f32
    %108 = vector.broadcast %cst_62 : f32 to vector<24x128xf32>
    %109 = arith.addf %108, %107 : vector<24x128xf32>
    %110 = arith.mulf %105, %109 : vector<24x128xf32>
    %cst_63 = arith.constant 1.42141378 : f32
    %111 = vector.broadcast %cst_63 : f32 to vector<24x128xf32>
    %112 = arith.addf %111, %110 : vector<24x128xf32>
    %113 = arith.mulf %105, %112 : vector<24x128xf32>
    %cst_64 = arith.constant -0.284496725 : f32
    %114 = vector.broadcast %cst_64 : f32 to vector<24x128xf32>
    %115 = arith.addf %114, %113 : vector<24x128xf32>
    %116 = arith.mulf %105, %115 : vector<24x128xf32>
    %cst_65 = arith.constant 0.254829586 : f32
    %117 = vector.broadcast %cst_65 : f32 to vector<24x128xf32>
    %118 = arith.addf %117, %116 : vector<24x128xf32>
    %119 = arith.mulf %105, %118 : vector<24x128xf32>
    %cst_66 = arith.constant 0.000000e+00 : f32
    %120 = vector.broadcast %cst_66 : f32 to vector<24x128xf32>
    %121 = arith.subf %120, %99 : vector<24x128xf32>
    %122 = arith.mulf %121, %99 : vector<24x128xf32>
    %123 = math.exp %122 : vector<24x128xf32>
    %124 = arith.mulf %119, %123 : vector<24x128xf32>
    %cst_67 = arith.constant 0.000000e+00 : f32
    %125 = vector.broadcast %cst_67 : f32 to vector<24x128xf32>
    %126 = arith.cmpf olt, %98, %125 : vector<24x128xf32>
    %cst_68 = arith.constant 1.000000e+00 : f32
    %127 = vector.broadcast %cst_68 : f32 to vector<24x128xf32>
    %128 = arith.subf %124, %127 : vector<24x128xf32>
    %cst_69 = arith.constant 1.000000e+00 : f32
    %129 = vector.broadcast %cst_69 : f32 to vector<24x128xf32>
    %130 = arith.subf %129, %124 : vector<24x128xf32>
    %131 = arith.select %126, %128, %130 : vector<24x128xi1>, vector<24x128xf32>
    %cst_70 = arith.constant 1.000000e+00 : f32
    %132 = vector.broadcast %cst_70 : f32 to vector<24x128xf32>
    %133 = arith.addf %132, %131 : vector<24x128xf32>
    %134 = arith.mulf %96, %133 : vector<24x128xf32>
    %135 = arith.truncf %134 : vector<24x128xf32> to vector<24x128xbf16>
    %c0_71 = arith.constant 0 : index
    %c0_72 = arith.constant 0 : index
    %136 = vector.load %arg9[%c0_71, %c0_72] : memref<128x128xbf16, #tpu.memory_space<vmem>>, vector<128x128xbf16>
    %cst_73 = arith.constant dense<0.000000e+00> : vector<24x128xf32>
    %137 = tpu.matmul %135, %136, %cst_73 {dimension_numbers = #tpu.dot_dimension_numbers<[1], [0], [0], [1], [0, 0, 1, 1], [], []>} : vector<24x128xbf16>, vector<128x128xbf16>, vector<24x128xf32> -> vector<24x128xf32>
    %c0_74 = arith.constant 0 : index
    %c0_75 = arith.constant 0 : index
    %138 = vector.load %arg10[%c0_74, %c0_75] : memref<1x128xf32, #tpu.memory_space<vmem>>, vector<1x128xf32>
    %139 = vector.broadcast %138 : vector<1x128xf32> to vector<24x128xf32>
    %140 = arith.addf %137, %139 : vector<24x128xf32>
    %141 = arith.addf %74, %140 : vector<24x128xf32>
    %c0_76 = arith.constant 0 : index
    %c0_77 = arith.constant 0 : index
    %142 = vector.load %arg16[%c0_76, %c0_77] : memref<24x128xf32, #tpu.memory_space<vmem>>, vector<24x128xf32>
    tpu.vector_store %arg16[%c0_76, %c0_77], %141 {strides = array<i32>} : memref<24x128xf32, #tpu.memory_space<vmem>>, vector<24x128xf32>,
    return
  }
  func.func @transform_0(%arg0: i32) -> (i32, i32) {
    %c0_i32 = arith.constant 0 : i32
    %c0_i32_0 = arith.constant 0 : i32
    %c0_i32_1 = arith.constant 0 : i32
    return %c0_i32, %c0_i32_0 : i32, i32
  }
  func.func @transform_1(%arg0: i32) -> (i32, i32) {
    %c0_i32 = arith.constant 0 : i32
    %c0_i32_0 = arith.constant 0 : i32
    %c0_i32_1 = arith.constant 0 : i32
    return %c0_i32, %c0_i32_0 : i32, i32
  }
  func.func @transform_2(%arg0: i32) -> (i32, i32) {
    %c0_i32 = arith.constant 0 : i32
    %c0_i32_0 = arith.constant 0 : i32
    %c0_i32_1 = arith.constant 0 : i32
    return %c0_i32, %c0_i32_0 : i32, i32
  }
  func.func @transform_3(%arg0: i32) -> (i32, i32) {
    %c0_i32 = arith.constant 0 : i32
    %c0_i32_0 = arith.constant 0 : i32
    %c0_i32_1 = arith.constant 0 : i32
    return %c0_i32, %c0_i32_0 : i32, i32
  }
  func.func @transform_4(%arg0: i32) -> (i32, i32) {
    %c0_i32 = arith.constant 0 : i32
    %c0_i32_0 = arith.constant 0 : i32
    %c0_i32_1 = arith.constant 0 : i32
    return %c0_i32, %c0_i32_0 : i32, i32
  }
  func.func @transform_5(%arg0: i32) -> (i32, i32) {
    %c0_i32 = arith.constant 0 : i32
    %c0_i32_0 = arith.constant 0 : i32
    %c0_i32_1 = arith.constant 0 : i32
    return %c0_i32, %c0_i32_0 : i32, i32
  }
  func.func @transform_6(%arg0: i32) -> (i32, i32) {
    %c0_i32 = arith.constant 0 : i32
    %c0_i32_0 = arith.constant 0 : i32
    %c0_i32_1 = arith.constant 0 : i32
    return %c0_i32, %c0_i32_0 : i32, i32
  }
  func.func @transform_7(%arg0: i32) -> (i32, i32) {
    %c0_i32 = arith.constant 0 : i32
    %c0_i32_0 = arith.constant 0 : i32
    %c0_i32_1 = arith.constant 0 : i32
    return %c0_i32, %c0_i32_0 : i32, i32
  }
  func.func @transform_8(%arg0: i32) -> (i32, i32) {
    %c0_i32 = arith.constant 0 : i32
    %c0_i32_0 = arith.constant 0 : i32
    %c0_i32_1 = arith.constant 0 : i32
    return %c0_i32, %c0_i32_0 : i32, i32
  }
  func.func @transform_9(%arg0: i32) -> (i32, i32) {
    %c0_i32 = arith.constant 0 : i32
    %c0_i32_0 = arith.constant 0 : i32
    %c0_i32_1 = arith.constant 0 : i32
    return %c0_i32, %c0_i32_0 : i32, i32
  }
  func.func @transform_10(%arg0: i32) -> (i32, i32) {
    %c0_i32 = arith.constant 0 : i32
    %c0_i32_0 = arith.constant 0 : i32
    %c0_i32_1 = arith.constant 0 : i32
    return %c0_i32, %c0_i32_0 : i32, i32
  }
  func.func @transform_11(%arg0: i32) -> (i32, i32) {
    %c0_i32 = arith.constant 0 : i32
    %c0_i32_0 = arith.constant 0 : i32
    %c0_i32_1 = arith.constant 0 : i32
    return %c0_i32, %c0_i32_0 : i32, i32
  }
  func.func @transform_12(%arg0: i32) -> (i32, i32) {
    %c0_i32 = arith.constant 0 : i32
    %c0_i32_0 = arith.constant 0 : i32
    %c0_i32_1 = arith.constant 0 : i32
    return %c0_i32, %c0_i32_0 : i32, i32
  }
  func.func @transform_13(%arg0: i32) -> (i32, i32) {
    %c0_i32 = arith.constant 0 : i32
    %c0_i32_0 = arith.constant 0 : i32
    %c0_i32_1 = arith.constant 0 : i32
    return %c0_i32, %c0_i32_0 : i32, i32
  }
  func.func @transform_14(%arg0: i32) -> (i32, i32) {
    %c0_i32 = arith.constant 0 : i32
    %c0_i32_0 = arith.constant 0 : i32
    %c0_i32_1 = arith.constant 0 : i32
    return %c0_i32, %c0_i32_0 : i32, i32
  }
  func.func @transform_15(%arg0: i32) -> (i32, i32) {
    %c0_i32 = arith.constant 0 : i32
    %c0_i32_0 = arith.constant 0 : i32
    %c0_i32_1 = arith.constant 0 : i32
    return %c0_i32, %c0_i32_0 : i32, i32
  }
}

</mosaic_0001>

<bundles_post_ra>
// kernel: tpu_custom_call.1
= control target key start
LH: loop header
LB: loop body
LE: loop exit
PB: predicated region body
PF: predicated region fallthrough
CT: control target
= control target key end

     0   :  { %v6408_v3 = vmov 0.0|0.0   ;;  %vm4190_vm0 = vmmov 0   ;;  %v6406_v6 = vmov 0.0   ;;  %s6390_s0 = inlined_call_operand.vmem [shape: f32[12,128], index: 0, kind: input, shape index: {}]   ;;  %s6391_s1 = inlined_call_operand.vmem [shape: f32[8,128], index: 1, kind: input, shape index: {}]   ;;  %s6392_s2 = inlined_call_operand.vmem [shape: bf16[416,24], index: 2, kind: input, shape index: {}]   ;;  %s6393_s3 = inlined_call_operand.vmem [shape: f32[416,1], index: 3, kind: input, shape index: {}]   ;;  %s6394_s4 = inlined_call_operand.vmem [shape: bf16[24,416], index: 4, kind: input, shape index: {}]   ;;  %s6395_s5 = inlined_call_operand.vmem [shape: f32[24,1], index: 5, kind: input, shape index: {}]   ;;  %s6396_s6 = inlined_call_operand.vmem [shape: bf16[128,128], index: 6, kind: input, shape index: {}]   ;;  %s6397_s7 = inlined_call_operand.vmem [shape: f32[1,128], index: 7, kind: input, shape index: {}]   ;;  %s6398_s8 = inlined_call_operand.vmem [shape: bf16[128,128], index: 8, kind: input, shape index: {}]   ;;  %s6399_s9 = inlined_call_operand.vmem [shape: f32[1,128], index: 9, kind: input, shape index: {}]   ;;  %s6400_s10 = inlined_call_operand.vmem [shape: f32[1,128], index: 10, kind: input, shape index: {}]   ;;  %s6401_s11 = inlined_call_operand.vmem [shape: f32[1,128], index: 11, kind: input, shape index: {}]   ;;  %s6402_s12 = inlined_call_operand.vmem [shape: f32[1,128], index: 12, kind: input, shape index: {}]   ;;  %s6403_s13 = inlined_call_operand.vmem [shape: f32[1,128], index: 13, kind: input, shape index: {}]   ;;  %s6404_s14 = inlined_call_operand.vmem [shape: f32[128,128], index: 14, kind: input, shape index: {}]   ;;  %s6405_s15 = inlined_call_operand.hbm [shape: f32[24,128], index: 15, kind: output, shape index: {}]  }
   0x1   :  { %v64_v0 = vld [vmem:[%s6404_s14] sm:$0xff]  ;;  %v65_v1 = vld [vmem:[%s6404_s14 + $0x8] sm:$0xff]  ;;  %v66_v2 = vld [vmem:[%s6404_s14 + $0x10] sm:$0xff]  ;;  %3772 = vmatprep.subr.bf16.mxu0 %v6408_v3  ;;  %3544 = vmatprep.mubr.msk.f32.mxu0 %vm4190_vm0, %v6406_v6  ;;  %53 = vst [vmem:[#allocation2 + $0x8] sm:$0xff] %v6406_v6 }
   0x2   :  { %v4286_v4 = vpack.c.bf16 %v65_v1, %v64_v0  ;;  %v67_v5 = vld [vmem:[%s6404_s14 + $0x18] sm:$0xff]  ;;  %3796 = vmatprep.subr.bf16.mxu1 %v6408_v3  ;;  %3585 = vmatprep.mubr.msk.f32.mxu1 %vm4190_vm0, %v6406_v6  ;;  %v68_v8 = vld [vmem:[%s6404_s14 + $0x20] sm:$0xff]  ;;  %v69_v9 = vld [vmem:[%s6404_s14 + $0x28] sm:$0xff] }
   0x3   :  { %v4298_v7 = vpack.c.bf16 %v67_v5, %v66_v2  ;;  %v55_v10 = vld [vmem:[%s6390_s0] sm:$0xff]  ;;  %v56_v11 = vld [vmem:[%s6390_s0 + $0x8] sm:$0xf]  ;;  %v70_v12 = vld [vmem:[%s6404_s14 + $0x30] sm:$0xff]  ;;  %v4325_v15 = vpack.c.bf16 %v69_v9, %v68_v8 }
   0x4   :  { %6440 = vst [vmem:[#allocation6_spill] sm:$0xff] %v4286_v4  ;;  %3774 = vmatpush3.bf16.msra.mxu0 %v4286_v4  ;;  %3798 = vmatpush3.bf16.msra.mxu1 %v4286_v4  ;;  %v71_v13 = vld [vmem:[%s6404_s14 + $0x38] sm:$0xff]  ;;  %57 = vst [vmem:[#allocation2] sm:$0xff] %v55_v10  ;;  %v59_v14 = vld [vmem:[%s6391_s1] sm:$0xff] }
   0x5   :  { %6441 = vst [vmem:[#allocation7_spill] sm:$0xff] %v4298_v7  ;;  %3775 = vmatprep.subr.bf16.mxu0 %v6408_v3  ;;  %3799 = vmatprep.subr.bf16.mxu1 %v6408_v3  ;;  %58 = vst [vmem:[#allocation2 + $0x8] sm:$0xf] %v56_v11  ;;  %v72_v16 = vld [vmem:[%s6404_s14 + $0x40] sm:$0xff]  ;;  %v73_v17 = vld [vmem:[%s6404_s14 + $0x48] sm:$0xff]  ;;  %v4337_v18 = vpack.c.bf16 %v71_v13, %v70_v12 }
   0x6   :  { %6442 = vst [vmem:[#allocation8_spill] sm:$0xff] %v4325_v15  ;;  %60 = vst [vmem:[#allocation2 + $0x10] sm:$0xff] %v59_v14  ;;  %v74_v19 = vld [vmem:[%s6404_s14 + $0x50] sm:$0xff]  ;;  %v75_v20 = vld [vmem:[%s6404_s14 + $0x58] sm:$0xff]  ;;  %v4349_v21 = vpack.c.bf16 %v73_v17, %v72_v16 }
   0x7   :  { %6443 = vst [vmem:[#allocation9_spill] sm:$0xff] %v4337_v18  ;;  %v76_v22 = vld [vmem:[%s6404_s14 + $0x60] sm:$0xff]  ;;  %v77_v23 = vld [vmem:[%s6404_s14 + $0x68] sm:$0xff]  ;;  %v4361_v24 = vpack.c.bf16 %v75_v20, %v74_v19  ;;  %v78_v25 = vld [vmem:[%s6404_s14 + $0x70] sm:$0xff] }
   0x8   :  { %3777 = vmatpush3.bf16.msra.mxu0 %v4298_v7  ;;  %3801 = vmatpush3.bf16.msra.mxu1 %v4298_v7  ;;  %6444 = vst [vmem:[#allocation10_spill] sm:$0xff] %v4349_v21  ;;  %v79_v26 = vld [vmem:[%s6404_s14 + $0x78] sm:$0xff]  ;;  %v4373_v27 = vpack.c.bf16 %v77_v23, %v76_v22 }
   0x9   :  { %3778 = vmatprep.subr.bf16.mxu0 %v6408_v3  ;;  %3802 = vmatprep.subr.bf16.mxu1 %v6408_v3  ;;  %6445 = vst [vmem:[#allocation11_spill] sm:$0xff] %v4361_v24  ;;  %v4379_v28 = vpack.c.bf16 %v79_v26, %v78_v25 }
   0xa   :  { %6446 = vst [vmem:[#allocation12_spill] sm:$0xff] %v4373_v27 }
   0xb   :  { %6447 = vst [vmem:[#allocation13_spill] sm:$0xff] %v4379_v28 }
   0xc   :  { %3780 = vmatpush3.bf16.msra.mxu0 %v4325_v15  ;;  %3804 = vmatpush3.bf16.msra.mxu1 %v4325_v15  ;;  %v62_v29 = vld [vmem:[#allocation2 + $0x8] sm:$0xff] }
   0xd   :  { %3781 = vmatprep.subr.bf16.mxu0 %v6408_v3  ;;  %3805 = vmatprep.subr.bf16.mxu1 %v6408_v3 }
  0x10   :  { %3783 = vmatpush3.bf16.msra.mxu0 %v4337_v18  ;;  %3807 = vmatpush3.bf16.msra.mxu1 %v4337_v18 }
  0x11   :  { %3784 = vmatprep.subr.bf16.mxu0 %v6408_v3  ;;  %3808 = vmatprep.subr.bf16.mxu1 %v6408_v3 }
  0x14   :  { %3786 = vmatpush3.bf16.msra.mxu0 %v4349_v21  ;;  %3810 = vmatpush3.bf16.msra.mxu1 %v4349_v21 }
  0x15   :  { %3787 = vmatprep.subr.bf16.mxu0 %v6408_v3  ;;  %3811 = vmatprep.subr.bf16.mxu1 %v6408_v3 }
  0x18   :  { %3789 = vmatpush3.bf16.msra.mxu0 %v4361_v24  ;;  %3813 = vmatpush3.bf16.msra.mxu1 %v4361_v24 }
  0x19   :  { %3790 = vmatprep.subr.bf16.mxu0 %v6408_v3  ;;  %3814 = vmatprep.subr.bf16.mxu1 %v6408_v3 }
  0x1c   :  { %3792 = vmatpush3.bf16.msra.mxu0 %v4373_v27  ;;  %3816 = vmatpush3.bf16.msra.mxu1 %v4373_v27 }
  0x1d   :  { %3793 = vmatprep.subr.bf16.mxu0 %v6408_v3  ;;  %3817 = vmatprep.subr.bf16.mxu1 %v6408_v3 }
  0x20   :  { %3795 = vmatpush3.bf16.msra.mxu0 %v4379_v28  ;;  %3819 = vmatpush3.bf16.msra.mxu1 %v4379_v28 }
  0x23   :  { %3545 = vmatmul.mubr.f32.vlgmr.msra.gmra.mrb[0].mxu0 %v55_v10 }
  0x24   :  { %3547 = vmatprep.mubr.msk.f32.mxu0 %vm4190_vm0, %v6406_v6 }
  0x25   :  { %20 = vsyncpa [#allocation4], 0  ;;  %v342_v42 = vld [vmem:[%s6393_s3 + $0x80] sm:$0xff]  ;;  %v6410_v44 = vmov 0   ;;  %v343_v45 = vld [vmem:[%s6393_s3 + $0x88] sm:$0xff]  ;;  %vm768_vm1 = vcmask 195584  }
  0x26   :  { %v326_v43 = vld [vmem:[%s6393_s3] sm:$0xff]  ;;  %3876 = vset.pattern.permute.xlu0 %v6410_v44  ;;  %3877 = vset.pattern.permute.xlu1 %v6410_v44  ;;  %v344_v46 = vld [vmem:[%s6393_s3 + $0x90] sm:$0xff]  ;;  %v327_v47 = vld [vmem:[%s6393_s3 + $0x8] sm:$0xff]  ;;  %vm847_vm2 = vcmask 1043456   ;;  %s4193_s30 = smov [#allocation3]  }
  0x27   :  { %3548 = vmatmul.mubr.f32.gmra.mrb[2].mxu0 %v62_v29  ;;  %460 = vperm.xlu0 %3876, %v342_v42   ;;  %v328_v48 = vld [vmem:[%s6393_s3 + $0x10] sm:$0xff]  ;;  %v345_v49 = vld [vmem:[%s6393_s3 + $0x98] sm:$0xff]  ;;  %v346_v50 = vld [vmem:[%s6393_s3 + $0xa0] sm:$0xff] }
  0x28   :  { %3550 = vmatprep.mubr.msk.f32.mxu0 %vm4190_vm0, %v6406_v6  ;;  %380 = vperm.xlu1 %3877, %v326_v43   ;;  %v329_v51 = vld [vmem:[%s6393_s3 + $0x18] sm:$0xff]  ;;  %v3878_v52 = vld [vmem:[%s6392_s2] sm:$0xff]   ;;  %v347_v54 = vld [vmem:[%s6393_s3 + $0xa8] sm:$0xff] }
  0x29   :  { %v330_v53 = vld [vmem:[%s6393_s3 + $0x20] sm:$0xff]  ;;  %v348_v55 = vld [vmem:[%s6393_s3 + $0xb0] sm:$0xff]  ;;  %v331_v56 = vld [vmem:[%s6393_s3 + $0x28] sm:$0xff] }
  0x2a   :  { %v332_v57 = vld [vmem:[%s6393_s3 + $0x30] sm:$0xff]  ;;  %v349_v58 = vld [vmem:[%s6393_s3 + $0xb8] sm:$0xff]  ;;  %v350_v59 = vld [vmem:[%s6393_s3 + $0xc0] sm:$0xff] }
  0x2b   :  { %3551 = vmatmul.mubr.f32.gmra.mrb[4].mxu0 %v59_v14  ;;  %465 = vperm.xlu0 %3876, %v343_v45   ;;  %v333_v60 = vld [vmem:[%s6393_s3 + $0x38] sm:$0xff]  ;;  %v334_v61 = vld [vmem:[%s6393_s3 + $0x40] sm:$0xff]  ;;  %v351_v62 = vld [vmem:[%s6393_s3 + $0xc8] sm:$0xff] }
  0x2c   :  { %385 = vperm.xlu1 %3877, %v327_v47   ;;  %3598 = vmatprep.mubr.msk.bf16.mxu0 %vm768_vm1, %v3878_v52  ;;  %v352_v63 = vld [vmem:[%s6393_s3 + $0xd0] sm:$0xff]  ;;  %v335_v0 = vld [vmem:[%s6393_s3 + $0x48] sm:$0xff]  ;;  %v353_v2 = vld [vmem:[%s6393_s3 + $0xd8] sm:$0xff] }
  0x2d   :  { %v336_v1 = vld [vmem:[%s6393_s3 + $0x50] sm:$0xff]  ;;  %v354_v5 = vld [vmem:[%s6393_s3 + $0xe0] sm:$0xff]  ;;  %v337_v8 = vld [vmem:[%s6393_s3 + $0x58] sm:$0xff] }
  0x2e   :  { %v338_v9 = vld [vmem:[%s6393_s3 + $0x60] sm:$0xff]  ;;  %v356_v11 = vld [vmem:[%s6393_s3 + $0xf0] sm:$0xff]  ;;  %v339_v12 = vld [vmem:[%s6393_s3 + $0x68] sm:$0xff] }
  0x2f   :  { %470 = vperm.xlu0 %3876, %v344_v46   ;;  %v340_v13 = vld [vmem:[%s6393_s3 + $0x70] sm:$0xff]  ;;  %v358_v16 = vld [vmem:[%s6393_s3 + $0x100] sm:$0xff]  ;;  %v341_v17 = vld [vmem:[%s6393_s3 + $0x78] sm:$0xff] }
  0x30   :  { %475 = vperm.xlu1 %3877, %v345_v49   ;;  %v360_v19 = vld [vmem:[%s6393_s3 + $0x110] sm:$0xff]  ;;  %v359_v20 = vld [vmem:[%s6393_s3 + $0x108] sm:$0xff]  ;;  %v362_v22 = vld [vmem:[%s6393_s3 + $0x120] sm:$0xff] }
  0x31   :  { %v361_v23 = vld [vmem:[%s6393_s3 + $0x118] sm:$0xff]  ;;  %v364_v25 = vld [vmem:[%s6393_s3 + $0x130] sm:$0xff]  ;;  %v363_v26 = vld [vmem:[%s6393_s3 + $0x128] sm:$0xff] }
  0x32   :  { %v376_v42 = vld [vmem:[%s6393_s3 + $0x190] sm:$0xff]  ;;  %v375_v43 = vld [vmem:[%s6393_s3 + $0x188] sm:$0xff]  ;;  %v2528_v45 = vld [vmem:[%s6395_s5] sm:$0xff] }
  0x33   :  { %390 = vperm.xlu0 %3876, %v328_v48   ;;  %v377_v46 = vld [vmem:[%s6393_s3 + $0x198] sm:$0xff]  ;;  %v2530_v47 = vld [vmem:[%s6395_s5 + $0x10] sm:$0xff]  ;;  %v2529_v48 = vld [vmem:[%s6395_s5 + $0x8] sm:$0xff] }
  0x34   :  { %395 = vperm.xlu1 %3877, %v329_v51  }
  0x37   :  { %480 = vperm.xlu0 %3876, %v346_v50  }
  0x38   :  { %485 = vperm.xlu1 %3877, %v347_v54  }
  0x3b   :  { %400 = vperm.xlu0 %3876, %v330_v53  }
  0x3c   :  { %405 = vperm.xlu1 %3877, %v331_v56  }
  0x3f   :  { %490 = vperm.xlu0 %3876, %v348_v55  }
  0x40   :  { %495 = vperm.xlu1 %3877, %v349_v58  }
  0x43   :  { %410 = vperm.xlu0 %3876, %v332_v57  }
  0x44   :  { %415 = vperm.xlu1 %3877, %v333_v60   ;;  %v3221_v60 = vld [vmem:[%s6400_s10] ss:$0 sm:$0xff] }
  0x47   :  { %500 = vperm.xlu0 %3876, %v350_v59  }
  0x48   :  { %505 = vperm.xlu1 %3877, %v351_v62  }
  0x4b   :  { %420 = vperm.xlu0 %3876, %v334_v61  }
  0x4c   :  { %425 = vperm.xlu1 %3877, %v335_v0   ;;  %v3222_v0 = vld [vmem:[%s6401_s11] ss:$0 sm:$0xff] }
  0x4f   :  { %510 = vperm.xlu0 %3876, %v352_v63  }
  0x50   :  { %515 = vperm.xlu1 %3877, %v353_v2  }
  0x53   :  { %430 = vperm.xlu0 %3876, %v336_v1  }
  0x54   :  { %435 = vperm.xlu1 %3877, %v337_v8  }
  0x57   :  { %520 = vperm.xlu0 %3876, %v354_v5  }
  0x5b   :  { %440 = vperm.xlu0 %3876, %v338_v9  }
  0x5f   :  { %530 = vperm.xlu0 %3876, %v356_v11  }
  0x63   :  { %450 = vperm.xlu0 %3876, %v340_v13   ;;  %v3879_v13 = vld [vmem:[%s6392_s2 + $0x8] sm:$0xff]  }
  0x67   :  { %540 = vperm.xlu0 %3876, %v358_v16   ;;  %v3882_v16 = vld [vmem:[%s6392_s2 + $0x20] sm:$0xff]  }
  0x6b   :  { %550 = vperm.xlu0 %3876, %v360_v19   ;;  %v3884_v19 = vld [vmem:[%s6392_s2 + $0x30] sm:$0xff]  }
  0x6f   :  { %560 = vperm.xlu0 %3876, %v362_v22   ;;  %v3886_v22 = vld [vmem:[%s6392_s2 + $0x40] sm:$0xff]  }
  0x73   :  { %570 = vperm.xlu0 %3876, %v364_v25   ;;  %v3888_v25 = vld [vmem:[%s6392_s2 + $0x50] sm:$0xff]  }
  0xf6   :  { %v148_v30 = vpop.f32.mrb[0].mxu0 }
  0xf7   :  { %v4390_v31 = vsub.f32 %v55_v10, %v148_v30  ;;  %v3546_v32 = vpop.f32.mrb[1].mxu0  ;;  %v355_v10 = vld [vmem:[%s6393_s3 + $0xe8] sm:$0xff]  ;;  %v365_v30 = vld [vmem:[%s6393_s3 + $0x138] sm:$0xff] }
  0xf8   :  { %525 = vperm.xlu1 %3877, %v355_v10   ;;  %v368_v32 = vld [vmem:[%s6393_s3 + $0x150] sm:$0xff] }
  0xf9   :  { %v165_v33 = vmul.f32 %v4390_v31, %v4390_v31 }
  0xfa   :  { %v153_v34 = vpop.f32.mrb[2].mxu0 }
  0xfb   :  { %v4394_v35 = vsub.f32 %v62_v29, %v153_v34  ;;  %v3549_v36 = vpop.f32.mrb[3].mxu0  ;;  %3586 = vmatmul.mubr.f32.vlgmr.msra.gmra.mrb[0].mxu1 %v165_v33  ;;  %v366_v29 = vld [vmem:[%s6393_s3 + $0x140] sm:$0xff]  ;;  %v367_v33 = vld [vmem:[%s6393_s3 + $0x148] sm:$0xff] }
  0xfc   :  { %3588 = vmatprep.mubr.msk.f32.mxu1 %vm4190_vm0, %v6406_v6  ;;  %445 = vperm.xlu1 %3877, %v339_v12   ;;  %v370_v34 = vld [vmem:[%s6393_s3 + $0x160] sm:$0xff]  ;;  %v369_v36 = vld [vmem:[%s6393_s3 + $0x158] sm:$0xff] }
  0xfd   :  { %v166_v37 = vmul.f32 %v4394_v35, %v4394_v35  ;;  %580 = vperm.xlu0 %3876, %v366_v29   ;;  %v3890_v29 = vld [vmem:[%s6392_s2 + $0x60] sm:$0xff]  }
  0xfe   :  { %v158_v38 = vpop.f32.mrb[4].mxu0 }
  0xff   :  { %v4400_v39 = vsub.f32 %v59_v14, %v158_v38  ;;  %3589 = vmatmul.mubr.f32.gmra.mrb[2].mxu1 %v166_v37  ;;  %v3552_v40 = vpop.f32.mrb[5].mxu0  ;;  %v357_v14 = vld [vmem:[%s6393_s3 + $0xf8] sm:$0xff]  ;;  %v372_v37 = vld [vmem:[%s6393_s3 + $0x170] sm:$0xff]  ;;  %v371_v38 = vld [vmem:[%s6393_s3 + $0x168] sm:$0xff] }
 0x100   :  { %3591 = vmatprep.mubr.msk.f32.mxu1 %vm4190_vm0, %v6406_v6  ;;  %535 = vperm.xlu1 %3877, %v357_v14   ;;  %v374_v40 = vld [vmem:[%s6393_s3 + $0x180] sm:$0xff]  ;;  %v3880_v14 = vld [vmem:[%s6392_s2 + $0x10] sm:$0xff]  }
 0x101   :  { %v167_v41 = vmul.f32 %v4400_v39, %v4400_v39  ;;  %590 = vperm.xlu0 %3876, %v368_v32   ;;  %v3892_v32 = vld [vmem:[%s6392_s2 + $0x70] sm:$0xff]  }
 0x103   :  { %3592 = vmatmul.mubr.f32.gmra.mrb[4].mxu1 %v167_v41  ;;  %v373_v41 = vld [vmem:[%s6393_s3 + $0x178] sm:$0xff] }
 0x104   :  { %455 = vperm.xlu1 %3877, %v341_v17   ;;  %v3883_v17 = vld [vmem:[%s6392_s2 + $0x28] sm:$0xff]  }
 0x105   :  { %600 = vperm.xlu0 %3876, %v370_v34   ;;  %v3894_v34 = vld [vmem:[%s6392_s2 + $0x80] sm:$0xff]  }
 0x108   :  { %545 = vperm.xlu1 %3877, %v359_v20   ;;  %v3885_v20 = vld [vmem:[%s6392_s2 + $0x38] sm:$0xff]  }
 0x109   :  { %610 = vperm.xlu0 %3876, %v372_v37   ;;  %v3896_v37 = vld [vmem:[%s6392_s2 + $0x90] sm:$0xff]  }
 0x10c   :  { %555 = vperm.xlu1 %3877, %v361_v23   ;;  %v3887_v23 = vld [vmem:[%s6392_s2 + $0x48] sm:$0xff]  }
 0x10d   :  { %620 = vperm.xlu0 %3876, %v374_v40   ;;  %v3898_v40 = vld [vmem:[%s6392_s2 + $0xa0] sm:$0xff]  }
 0x110   :  { %565 = vperm.xlu1 %3877, %v363_v26   ;;  %v3889_v26 = vld [vmem:[%s6392_s2 + $0x58] sm:$0xff]  }
 0x111   :  { %630 = vperm.xlu0 %3876, %v376_v42   ;;  %v3900_v42 = vld [vmem:[%s6392_s2 + $0xb0] sm:$0xff]  }
 0x114   :  { %575 = vperm.xlu1 %3877, %v365_v30   ;;  %v3891_v30 = vld [vmem:[%s6392_s2 + $0x68] sm:$0xff]  }
 0x115   :  { %2533 = vperm.xlu0 %3876, %v2528_v45   ;;  %v3902_v45 = vld [vmem:[%s6392_s2 + $0xc0] sm:$0xff]  }
 0x118   :  { %585 = vperm.xlu1 %3877, %v367_v33   ;;  %v3893_v33 = vld [vmem:[%s6392_s2 + $0x78] sm:$0xff]  }
 0x119   :  { %2543 = vperm.xlu0 %3876, %v2530_v47   ;;  %v4704_v47 = vpop.permute.xlu0 %460 }
 0x11c   :  { %595 = vperm.xlu1 %3877, %v369_v36   ;;  %v3895_v36 = vld [vmem:[%s6392_s2 + $0x88] sm:$0xff]  }
 0x120   :  { %605 = vperm.xlu1 %3877, %v371_v38   ;;  %v3897_v38 = vld [vmem:[%s6392_s2 + $0x98] sm:$0xff]  }
 0x124   :  { %615 = vperm.xlu1 %3877, %v373_v41   ;;  %v3899_v41 = vld [vmem:[%s6392_s2 + $0xa8] sm:$0xff]  }
 0x128   :  { %625 = vperm.xlu1 %3877, %v375_v43   ;;  %v3901_v43 = vld [vmem:[%s6392_s2 + $0xb8] sm:$0xff]  }
 0x12c   :  { %635 = vperm.xlu1 %3877, %v377_v46   ;;  %v3903_v46 = vld [vmem:[%s6392_s2 + $0xc8] sm:$0xff]  }
 0x130   :  { %2538 = vperm.xlu1 %3877, %v2529_v48   ;;  %v4706_v48 = vpop.permute.xlu0 %465 }
 0x131   :  { %6448 = vst [vmem:[#allocation14_spill] sm:$0xff] %v4706_v48 }
 0x1ce   :  { %v234_v49 = vpop.f32.mrb[0].mxu1 }
 0x1cf   :  { %v235_v50 = vadd.f32 1e-05, %v234_v49  ;;  %v3587_v51 = vpop.f32.mrb[1].mxu1  ;;  %v381_v49 = vpop.permute.xlu1 %380 }
 0x1d1   :  { %3930 = vrsqrt.f32 %v235_v50  ;;  %v4708_v50 = vpop.permute.xlu0 %470 }
 0x1d2   :  { %v239_v52 = vpop.f32.mrb[2].mxu1 }
 0x1d3   :  { %v240_v53 = vadd.f32 1e-05, %v239_v52  ;;  %v3590_v54 = vpop.f32.mrb[3].mxu1  ;;  %v386_v51 = vpop.permute.xlu1 %385 }
 0x1d5   :  { %3932 = vrsqrt.f32 %v240_v53  ;;  %v391_v52 = vpop.permute.xlu0 %390 }
 0x1d6   :  { %v244_v55 = vpop.f32.mrb[4].mxu1 }
 0x1d7   :  { %v245_v56 = vadd.f32 1e-05, %v244_v55  ;;  %v3593_v57 = vpop.f32.mrb[5].mxu1  ;;  %v4710_v53 = vpop.permute.xlu1 %475 }
 0x1d9   :  { %3934 = vrsqrt.f32 %v245_v56  ;;  %v4712_v54 = vpop.permute.xlu0 %480 }
 0x1da   :  { %6449 = vst [vmem:[#allocation15_spill] sm:$0xff] %v4712_v54 }
 0x1db   :  { %v3931_v58 = vpop.eup %3930  ;;  %v396_v55 = vpop.permute.xlu1 %395 }
 0x1dc   :  { %v251_v59 = vmul.f32 %v3931_v58, %v4390_v31 }
 0x1dd   :  { %v401_v56 = vpop.permute.xlu0 %400 }
 0x1de   :  { %v260_v63 = vmul.f32 %v3221_v60, %v251_v59 }
 0x1df   :  { %v3933_v61 = vpop.eup %3932  ;;  %v4714_v57 = vpop.permute.xlu1 %485 }
 0x1e0   :  { %v252_v62 = vmul.f32 %v3933_v61, %v4394_v35  ;;  %v269_v5 = vadd.f32 %v3222_v0, %v260_v63  ;;  %6450 = vst [vmem:[#allocation16_spill] sm:$0xff] %v4714_v57 }
 0x1e1   :  { %v4716_v58 = vpop.permute.xlu0 %490 }
 0x1e2   :  { %v261_v1 = vmul.f32 %v3221_v60, %v252_v62  ;;  %6451 = vst [vmem:[#allocation17_spill] sm:$0xff] %v4716_v58 }
 0x1e3   :  { %v3935_v2 = vpop.eup %3934 }
 0x1e4   :  { %v270_v8 = vadd.f32 %v3222_v0, %v261_v1  ;;  %v253_v9 = vmul.f32 %v3935_v2, %v4400_v39  ;;  %v3881_v39 = vld [vmem:[%s6392_s2 + $0x18] sm:$0xff]   ;;  %s3210_s2 = sshll.u32 %s4193_s30, 4  ;;  %s3211_s2 = int_to_ptr.vmem [resolvable:$true] %s3210_s2 }
 0x1e5   :  { %v411_v63 = vpop.permute.xlu0 %410  ;;  %p4170_p1 = scmp.lt.s32.totalorder %s3211_s2, %s3211_s2 }
 0x1e6   :  { %v324_v10 = vpack.c.bf16 %v270_v8, %v269_v5  ;;  %v262_v31 = vmul.f32 %v3221_v60, %v253_v9  ;;  %v406_v60 = vpop.permute.xlu1 %405 }
 0x1e8   :  { %3594 = vmatprep.subr.bf16.mxu0 %v324_v10  ;;  %v271_v11 = vadd.f32 %v3222_v0, %v262_v31 }
 0x1e9   :  { %3595 = vmatpush3.bf16.msra.mxu0 %v324_v10 }
 0x1ea   :  { %v325_v12 = vpack.c.bf16 %v271_v11, %v271_v11 }
 0x1ec   :  { %3868 = vmatprep.subr.msk.bf16.mxu0 %vm847_vm2, %v325_v12  ;;  %v849_v35 = vsel %vm847_vm2, %v325_v12, 0 }
 0x1ed   :  { %3597 = vmatpush3.bf16.msra.mxu0 %v849_v35 }
 0x1ee   :  { %3844 = vmatprep.subr.bf16.mxu0 %v6408_v3 }
 0x1f0   :  { %3599 = vmatmul.mubr.msk.bf16.vlgmr.msra.gmra.mrb[8].mxu0 %vm768_vm1, %v3879_v13  ;;  %v4734_v13 = vpop.permute.xlu1 %495 }
 0x1f1   :  { %3602 = vmatprep.mubr.msk.bf16.mxu0 %vm768_vm1, %v3880_v14  ;;  %3846 = vmatpush3.bf16.msra.mxu0 %v4286_v4  ;;  %6452 = vst [vmem:[#allocation18_spill] sm:$0xff] %v4734_v13 }
 0x1f2   :  { %3847 = vmatprep.subr.bf16.mxu0 %v6408_v3 }
 0x1f5   :  { %3849 = vmatpush3.bf16.msra.mxu0 %v4298_v7 }
 0x1f6   :  { %3850 = vmatprep.subr.bf16.mxu0 %v6408_v3 }
 0x1f8   :  { %3603 = vmatmul.mubr.msk.bf16.gmra.mrb[12].mxu0 %vm768_vm1, %v3881_v39 }
 0x1f9   :  { %3606 = vmatprep.mubr.msk.bf16.mxu0 %vm768_vm1, %v3882_v16  ;;  %3852 = vmatpush3.bf16.msra.mxu0 %v4325_v15 }
 0x1fa   :  { %3853 = vmatprep.subr.bf16.mxu0 %v6408_v3 }
 0x1fd   :  { %3855 = vmatpush3.bf16.msra.mxu0 %v4337_v18 }
 0x1fe   :  { %3856 = vmatprep.subr.bf16.mxu0 %v6408_v3 }
 0x200   :  { %3607 = vmatmul.mubr.msk.bf16.gmra.mrb[16].mxu0 %vm768_vm1, %v3883_v17  ;;  %v4737_v17 = vpop.permute.xlu0 %500 }
 0x201   :  { %3610 = vmatprep.mubr.msk.bf16.mxu0 %vm768_vm1, %v3884_v19  ;;  %3858 = vmatpush3.bf16.msra.mxu0 %v4349_v21  ;;  %6453 = vst [vmem:[#allocation19_spill] sm:$0xff] %v4737_v17 }
 0x202   :  { %3859 = vmatprep.subr.bf16.mxu0 %v6408_v3 }
 0x205   :  { %3861 = vmatpush3.bf16.msra.mxu0 %v4361_v24 }
 0x206   :  { %3862 = vmatprep.subr.bf16.mxu0 %v6408_v3 }
 0x208   :  { %3611 = vmatmul.mubr.msk.bf16.gmra.mrb[20].mxu0 %vm768_vm1, %v3885_v20 }
 0x209   :  { %3614 = vmatprep.mubr.msk.bf16.mxu0 %vm768_vm1, %v3886_v22  ;;  %3864 = vmatpush3.bf16.msra.mxu0 %v4373_v27 }
 0x20a   :  { %3865 = vmatprep.subr.bf16.mxu0 %v6408_v3 }
 0x20d   :  { %3867 = vmatpush3.bf16.msra.mxu0 %v4379_v28 }
 0x210   :  { %3615 = vmatmul.mubr.msk.bf16.gmra.mrb[24].mxu0 %vm768_vm1, %v3887_v23 }
 0x211   :  { %3618 = vmatprep.mubr.msk.bf16.mxu0 %vm768_vm1, %v3888_v25 }
 0x218   :  { %3619 = vmatmul.mubr.msk.bf16.gmra.mrb[28].mxu0 %vm768_vm1, %v3889_v26 }
 0x219   :  { %3622 = vmatprep.mubr.msk.bf16.mxu0 %vm768_vm1, %v3890_v29 }
 0x220   :  { %3623 = vmatmul.mubr.msk.bf16.gmra.mrb[32].mxu0 %vm768_vm1, %v3891_v30 }
 0x221   :  { %3626 = vmatprep.mubr.msk.bf16.mxu0 %vm768_vm1, %v3892_v32 }
 0x228   :  { %3627 = vmatmul.mubr.msk.bf16.gmra.mrb[36].mxu0 %vm768_vm1, %v3893_v33 }
 0x229   :  { %3630 = vmatprep.mubr.msk.bf16.mxu0 %vm768_vm1, %v3894_v34 }
 0x230   :  { %3631 = vmatmul.mubr.msk.bf16.gmra.mrb[40].mxu0 %vm768_vm1, %v3895_v36 }
 0x231   :  { %3634 = vmatprep.mubr.msk.bf16.mxu0 %vm768_vm1, %v3896_v37 }
 0x238   :  { %3635 = vmatmul.mubr.msk.bf16.gmra.mrb[44].mxu0 %vm768_vm1, %v3897_v38  ;;  %v416_v38 = vpop.permute.xlu1 %415 }
 0x239   :  { %3638 = vmatprep.mubr.msk.bf16.mxu0 %vm768_vm1, %v3898_v40 }
 0x240   :  { %3639 = vmatmul.mubr.msk.bf16.gmra.mrb[48].mxu0 %vm768_vm1, %v3899_v41 }
 0x241   :  { %3642 = vmatprep.mubr.msk.bf16.mxu0 %vm768_vm1, %v3900_v42 }
 0x248   :  { %3643 = vmatmul.mubr.msk.bf16.gmra.mrb[52].mxu0 %vm768_vm1, %v3901_v43 }
 0x249   :  { %3646 = vmatprep.mubr.msk.bf16.mxu0 %vm768_vm1, %v3902_v45  ;;  %v4744_v45 = vpop.permute.xlu0 %420 }
 0x250   :  { %3647 = vmatmul.mubr.msk.bf16.gmra.mrb[56].mxu0 %vm768_vm1, %v3903_v46 }
 0x251   :  { %3723 = vmatprep.mubr.msk.f32.mxu0 %vm4190_vm0, %v6406_v6 }
 0x2c3   :  { %v3600_v59 = vpop.f32.mrb[8].mxu0 }
 0x2c4   :  { %v894_v61 = vadd.f32 %v3600_v59, %v391_v52  ;;  %v885_v62 = vpop.f32.mrb[9].mxu0 }
 0x2c5   :  { %v886_v0 = vadd.f32 %v885_v62, %v381_v49  ;;  %v3601_v1 = vpop.f32.mrb[10].mxu0 }
 0x2c6   :  { %v4718_v2 = vmul.f32 0.70710677, %v894_v61  ;;  %v4720_v5 = vadd.f32 %v3601_v1, %v396_v55  ;;  %v888_v8 = vpop.f32.mrb[11].mxu0 }
 0x2c7   :  { %v4722_v9 = vmul.f32 0.70710677, %v886_v0  ;;  %v4724_v10 = vadd.f32 %v888_v8, %v386_v51 }
 0x2c8   :  { %v1198_v31 = vand.u32 2147483647, %v4718_v2  ;;  %v4728_v11 = vmul.f32 0.70710677, %v4720_v5  ;;  %vm2186_vm3 = vcmp.lt.f32.partialorder %v4718_v2, 0.0 }
 0x2c9   :  { %v1196_v12 = vand.u32 2147483647, %v4722_v9  ;;  %v4732_v35 = vmul.f32 0.70710677, %v4724_v10  ;;  %vm2184_vm4 = vcmp.lt.f32.partialorder %v4722_v9, 0.0 }
 0x2ca   :  { %v1250_v14 = vmul.f32 0.3275911, %v1198_v31  ;;  %v1926_v39 = vsub.f32 0.0, %v1198_v31  ;;  %v1199_v16 = vand.u32 2147483647, %v4728_v11  ;;  %vm2187_vm5 = vcmp.lt.f32.partialorder %v4728_v11, 0.0 }
 0x2cb   :  { %v1248_v19 = vmul.f32 0.3275911, %v1196_v12  ;;  %v1197_v20 = vand.u32 2147483647, %v4732_v35  ;;  %v1924_v23 = vsub.f32 0.0, %v1196_v12  ;;  %v3604_v26 = vpop.f32.mrb[12].mxu0 }
 0x2cc   :  { %v1302_v22 = vadd.f32 1.0, %v1250_v14  ;;  %v1251_v25 = vmul.f32 0.3275911, %v1199_v16  ;;  %v901_v32 = vpop.f32.mrb[13].mxu0  ;;  %v1978_v33 = vmul.f32 %v1926_v39, %v1198_v31  ;;  %v4740_v42 = vadd.f32 %v3604_v26, %v411_v63 }
 0x2cd   :  { %v1300_v29 = vadd.f32 1.0, %v1248_v19  ;;  %v1249_v30 = vmul.f32 0.3275911, %v1197_v20  ;;  %v3605_v36 = vpop.f32.mrb[14].mxu0  ;;  %v1976_v40 = vmul.f32 %v1924_v23, %v1196_v12  ;;  %v4742_v43 = vadd.f32 %v901_v32, %v401_v56 }
 0x2ce   :  { %3936 = vrcp.f32 %v1302_v22  ;;  %v1303_v34 = vadd.f32 1.0, %v1251_v25  ;;  %v904_v37 = vpop.f32.mrb[15].mxu0  ;;  %v1927_v46 = vsub.f32 0.0, %v1199_v16  ;;  %v4746_v49 = vadd.f32 %v3605_v36, %v416_v38 }
 0x2cf   :  { %3938 = vrcp.f32 %v1300_v29  ;;  %v1301_v41 = vadd.f32 1.0, %v1249_v30  ;;  %v2032_v51 = vmul.f32 1.442695, %v1978_v33  ;;  %v4749_v52 = vmul.f32 0.70710677, %v4740_v42  ;;  %v4773_v29 = vpop.permute.xlu0 %510 }
 0x2d0   :  { %3940 = vrcp.f32 %v1303_v34  ;;  %v4751_v55 = vadd.f32 %v904_v37, %v406_v60  ;;  %v1925_v59 = vsub.f32 0.0, %v1197_v20  ;;  %v4754_v62 = vmul.f32 0.70710677, %v4742_v43  ;;  %6454 = vst [vmem:[#allocation20_spill] sm:$0xff] %v4773_v29 }
 0x2d1   :  { %v4757_v63 = vmul.f32 0.70710677, %v4746_v49  ;;  %v2028_v1 = vmul.f32 1.442695, %v1976_v40  ;;  %3942 = vrcp.f32 %v1301_v41  ;;  %v1202_v8 = vand.u32 2147483647, %v4749_v52 }
 0x2d2   :  { %v4762_v12 = vmul.f32 0.5, %v894_v61  ;;  %v1979_v14 = vmul.f32 %v1927_v46, %v1199_v16  ;;  %v1200_v60 = vand.u32 2147483647, %v4754_v62  ;;  %v4768_v22 = vmul.f32 0.5, %v886_v0 }
 0x2d3   :  { %v3608_v56 = vpop.f32.mrb[16].mxu0  ;;  %v1203_v39 = vand.u32 2147483647, %v4757_v63  ;;  %v1254_v23 = vmul.f32 0.3275911, %v1202_v8  ;;  %v1930_v25 = vsub.f32 0.0, %v1202_v8  ;;  %v1977_v30 = vmul.f32 %v1925_v59, %v1197_v20 }
 0x2d4   :  { %v4760_v31 = vpop.f32.mrb[17].mxu0  ;;  %v4771_v26 = vmul.f32 0.70710677, %v4751_v55  ;;  %v1252_v32 = vmul.f32 0.3275911, %v1200_v60  ;;  %v1928_v61 = vsub.f32 0.0, %v1200_v60  ;;  %3944 = vpow2.f32 %v2032_v51 }
 0x2d5   :  { %v4766_v19 = vpop.f32.mrb[18].mxu0  ;;  %v1255_v33 = vmul.f32 0.3275911, %v1203_v39  ;;  %v1306_v34 = vadd.f32 1.0, %v1254_v23  ;;  %v1982_v36 = vmul.f32 %v1930_v25, %v1202_v8  ;;  %v2034_v41 = vmul.f32 1.442695, %v1979_v14  ;;  %v431_v14 = vpop.permute.xlu0 %430 }
 0x2d6   :  { %v1201_v37 = vand.u32 2147483647, %v4771_v26  ;;  %v4778_v0 = vpop.f32.mrb[19].mxu0  ;;  %v1304_v46 = vadd.f32 1.0, %v1252_v32  ;;  %v1931_v6 = vsub.f32 0.0, %v1203_v39  ;;  %v1980_v59 = vmul.f32 %v1928_v61, %v1200_v60 }
 0x2d7   :  { %3946 = vrcp.f32 %v1306_v34  ;;  %v1307_v3 = vadd.f32 1.0, %v1255_v33  ;;  %v2030_v51 = vmul.f32 1.442695, %v1977_v30  ;;  %v2040_v23 = vmul.f32 1.442695, %v1982_v36 }
 0x2d8   :  { %v4775_v16 = vpop.eup %3936  ;;  %3948 = vrcp.f32 %v1304_v46  ;;  %v1253_v28 = vmul.f32 0.3275911, %v1201_v37  ;;  %v1929_v27 = vsub.f32 0.0, %v1201_v37  ;;  %v1983_v60 = vmul.f32 %v1931_v6, %v1203_v39 }
 0x2d9   :  { %v4780_v38 = vpop.eup %3938  ;;  %v1458_v40 = vmul.f32 1.0614054, %v4775_v16  ;;  %3950 = vpow2.f32 %v2028_v1  ;;  %v2036_v34 = vmul.f32 1.442695, %v1980_v59  ;;  %v4795_v1 = vadd.f32 %v3608_v56, %v431_v14 }
 0x2da   :  { %v1456_v20 = vmul.f32 1.0614054, %v4780_v38  ;;  %v4784_v8 = vpop.eup %3940  ;;  %3952 = vpow2.f32 %v2034_v41  ;;  %v1305_v6 = vadd.f32 1.0, %v1253_v28  ;;  %v1981_v39 = vmul.f32 %v1929_v27, %v1201_v37  ;;  %v4811_v28 = vpop.permute.xlu1 %505 }
 0x2db   :  { %v1510_v44 = vadd.f32 -1.4531521, %v1458_v40  ;;  %v4786_v24 = vpop.f32.mrb[20].mxu0  ;;  %v1459_v21 = vmul.f32 1.0614054, %v4784_v8  ;;  %v4792_v30 = vpop.eup %3942  ;;  %3954 = vrcp.f32 %v1307_v3  ;;  %v4809_v14 = vmul.f32 0.5, %v4720_v5 }
 0x2dc   :  { %v1508_v25 = vadd.f32 -1.4531521, %v1456_v20  ;;  %v4790_v61 = vpop.f32.mrb[21].mxu0  ;;  %3956 = vpow2.f32 %v2030_v51  ;;  %v4805_v56 = vmul.f32 0.70710677, %v4795_v1  ;;  %6455 = vst [vmem:[#allocation21_spill] sm:$0xff] %v4811_v28 }
 0x2dd   :  { %v1562_v32 = vmul.f32 %v4775_v16, %v1510_v44  ;;  %v4797_v36 = vpop.f32.mrb[22].mxu0  ;;  %v1511_v46 = vadd.f32 -1.4531521, %v1459_v21  ;;  %v1457_v44 = vmul.f32 1.0614054, %v4792_v30  ;;  %3958 = vpow2.f32 %v2040_v23 }
 0x2de   :  { %v1560_v33 = vmul.f32 %v4780_v38, %v1508_v25  ;;  %v4800_v41 = vpop.f32.mrb[23].mxu0  ;;  %v3945_v25 = vpop.eup %3944  ;;  %3960 = vpow2.f32 %v2036_v34  ;;  %v2042_v51 = vmul.f32 1.442695, %v1983_v60  ;;  %v4822_v5 = vmul.f32 1.442695, %v1981_v39 }
 0x2df   :  { %v1614_v40 = vadd.f32 1.4214138, %v1562_v32  ;;  %v1563_v59 = vmul.f32 %v4784_v8, %v1511_v46  ;;  %v1509_v3 = vadd.f32 -1.4531521, %v1457_v44  ;;  %v4815_v32 = vand.u32 2147483647, %v4805_v56  ;;  %v4847_v13 = vpop.permute.xlu1 %425 }
 0x2e0   :  { %v1612_v20 = vadd.f32 1.4214138, %v1560_v33  ;;  %v4820_v46 = vmul.f32 0.5, %v4724_v10  ;;  %3962 = vrcp.f32 %v1305_v6  ;;  %vm2185_vm6 = vcmp.lt.f32.partialorder %v4732_v35, 0.0 }
 0x2e1   :  { %v1666_v18 = vmul.f32 %v4775_v16, %v1614_v40  ;;  %v1615_v37 = vadd.f32 1.4214138, %v1563_v59  ;;  %v1561_v23 = vmul.f32 %v4792_v30, %v1509_v3  ;;  %v4817_v33 = vpop.eup %3946  ;;  %3964 = vpow2.f32 %v2042_v51 }
 0x2e2   :  { %v1664_v21 = vmul.f32 %v4780_v38, %v1612_v20  ;;  %v4824_v34 = vpop.eup %3948  ;;  %v1462_v20 = vmul.f32 1.0614054, %v4817_v33  ;;  %v1258_v39 = vmul.f32 0.3275911, %v4815_v32  ;;  %v4843_v51 = vadd.f32 %v4760_v31, %v4744_v45 }
 0x2e3   :  { %v1718_v27 = vadd.f32 -0.28449672, %v1666_v18  ;;  %v1667_v18 = vmul.f32 %v4784_v8, %v1615_v37  ;;  %v1613_v44 = vadd.f32 1.4214138, %v1561_v23  ;;  %v4829_v59 = vpop.f32.mrb[24].mxu0  ;;  %v3951_v3 = vpop.eup %3950  ;;  %vm2190_vm7 = vcmp.lt.f32.partialorder %v4749_v52, 0.0 }
 0x2e4   :  { %v1716_v40 = vadd.f32 -0.28449672, %v1664_v21  ;;  %v1460_v6 = vmul.f32 1.0614054, %v4824_v34  ;;  %v4835_v21 = vpop.f32.mrb[25].mxu0  ;;  %vm2191_vm8 = vcmp.lt.f32.partialorder %v4757_v63, 0.0 }
 0x2e5   :  { %v1770_v60 = vmul.f32 %v4775_v16, %v1718_v27  ;;  %v3953_v27 = vpop.eup %3952  ;;  %v1719_v37 = vadd.f32 -0.28449672, %v1667_v18  ;;  %v1665_v23 = vmul.f32 %v4792_v30, %v1613_v44  ;;  %v1514_v7 = vadd.f32 -1.4531521, %v1462_v20  ;;  %v4845_v29 = vpop.f32.mrb[26].mxu0 }
 0x2e6   :  { %v1768_v10 = vmul.f32 %v4780_v38, %v1716_v40  ;;  %v4839_v4 = vpop.eup %3954  ;;  %v1512_v17 = vadd.f32 -1.4531521, %v1460_v6  ;;  %v1310_v40 = vadd.f32 1.0, %v1258_v39  ;;  %6456 = vst [vmem:[#allocation22_spill] sm:$0xff] %v4845_v29  ;;  %v4852_v54 = vpop.f32.mrb[27].mxu0  ;;  %vm2188_vm9 = vcmp.lt.f32.partialorder %v4754_v62, 0.0 }
 0x2e7   :  { %v1822_v15 = vadd.f32 0.2548296, %v1770_v60  ;;  %v3957_v57 = vpop.eup %3956  ;;  %v1771_v18 = vmul.f32 %v4784_v8, %v1719_v37  ;;  %v1717_v44 = vadd.f32 -0.28449672, %v1665_v23  ;;  %v1566_v20 = vmul.f32 %v4817_v33, %v1514_v7  ;;  %6457 = vst [vmem:[#allocation23_spill] sm:$0xff] %v4852_v54 }
 0x2e8   :  { %v1820_v28 = vadd.f32 0.2548296, %v1768_v10  ;;  %v4854_v10 = vpop.eup %3958  ;;  %v1564_v45 = vmul.f32 %v4824_v34, %v1512_v17  ;;  %v1463_v31 = vmul.f32 1.0614054, %v4839_v4  ;;  %3966 = vrcp.f32 %v1310_v40 }
 0x2e9   :  { %v1874_v60 = vmul.f32 %v4775_v16, %v1822_v15  ;;  %v1823_v15 = vadd.f32 0.2548296, %v1771_v18  ;;  %v1769_v16 = vmul.f32 %v4792_v30, %v1717_v44  ;;  %v1618_v37 = vadd.f32 1.4214138, %v1566_v20  ;;  %v4863_v7 = vpop.eup %3960 }
 0x2ea   :  { %v1872_v6 = vmul.f32 %v4780_v38, %v1820_v28  ;;  %v1616_v38 = vadd.f32 1.4214138, %v1564_v45  ;;  %v1515_v28 = vadd.f32 -1.4531521, %v1463_v31  ;;  %v4867_v54 = vmul.f32 0.70710677, %v4843_v51  ;;  %v4872_v18 = vpop.eup %3962  ;;  %v4878_v31 = vpop.permute.xlu1 %515 }
 0x2eb   :  { %v2134_v39 = vmul.f32 %v3945_v25, %v1874_v60  ;;  %v4861_v23 = vpop.f32.mrb[28].mxu0  ;;  %v1875_v25 = vmul.f32 %v4784_v8, %v1823_v15  ;;  %v1821_v40 = vadd.f32 0.2548296, %v1769_v16  ;;  %6461 = vst [vmem:[#allocation27_spill] sm:$0xff] %v4878_v31  ;;  %3968 = vpow2.f32 %v4822_v5 }
 0x2ec   :  { %6458 = vst [vmem:[#allocation24_spill] sm:$0xff] %v4861_v23  ;;  %v2132_v58 = vmul.f32 %v3951_v3, %v1872_v6  ;;  %v4870_v60 = vpop.f32.mrb[29].mxu0  ;;  %v1670_v3 = vmul.f32 %v4817_v33, %v1618_v37  ;;  %v1668_v6 = vmul.f32 %v4824_v34, %v1616_v38  ;;  %v1567_v15 = vmul.f32 %v4839_v4, %v1515_v28 }
 0x2ed   :  { %v3277_v17 = vadd.f32 -1.0, %v2134_v39  ;;  %v2290_v48 = vsub.f32 1.0, %v2134_v39  ;;  %6459 = vst [vmem:[#allocation25_spill] sm:$0xff] %v4870_v60  ;;  %v4876_v45 = vpop.f32.mrb[30].mxu0  ;;  %v2135_v23 = vmul.f32 %v3953_v27, %v1875_v25  ;;  %v1873_v8 = vmul.f32 %v4792_v30, %v1821_v40  ;;  %v4886_v60 = vpop.eup %3964 }
 0x2ee   :  { %v3275_v44 = vadd.f32 -1.0, %v2132_v58  ;;  %v2288_v20 = vsub.f32 1.0, %v2132_v58  ;;  %6460 = vst [vmem:[#allocation26_spill] sm:$0xff] %v4876_v45  ;;  %v4884_v16 = vpop.f32.mrb[31].mxu0  ;;  %v1722_v37 = vadd.f32 -0.28449672, %v1670_v3  ;;  %v4892_v27 = vpop.permute.xlu0 %520 }
 0x2ef   :  { %v2342_v39 = vsel %vm2186_vm3, %v3277_v17, %v2290_v48  ;;  %v1720_v38 = vadd.f32 -0.28449672, %v1668_v6  ;;  %v1934_v45 = vsub.f32 0.0, %v4815_v32  ;;  %v3278_v31 = vadd.f32 -1.0, %v2135_v23  ;;  %6462 = vst [vmem:[#allocation28_spill] sm:$0xff] %v4892_v27 }
 0x2f0   :  { %v2340_v58 = vsel %vm2184_vm4, %v3275_v44, %v2288_v20  ;;  %v2291_v29 = vsub.f32 1.0, %v2135_v23  ;;  %v2133_v2 = vmul.f32 %v3957_v57, %v1873_v8  ;;  %v1461_v48 = vmul.f32 1.0614054, %v4872_v18 }
 0x2f1   :  { %v2394_v30 = vadd.f32 1.0, %v2342_v39  ;;  %v1774_v28 = vmul.f32 %v4817_v33, %v1722_v37  ;;  %v1772_v17 = vmul.f32 %v4824_v34, %v1720_v38  ;;  %v1619_v25 = vadd.f32 1.4214138, %v1567_v15  ;;  %v436_v37 = vpop.permute.xlu1 %435 }
 0x2f2   :  { %v2392_v40 = vadd.f32 1.0, %v2340_v58  ;;  %v2343_v9 = vsel %vm2187_vm5, %v3278_v31, %v2291_v29  ;;  %v3276_v44 = vadd.f32 -1.0, %v2133_v2  ;;  %v2289_v20 = vsub.f32 1.0, %v2133_v2  ;;  %v4900_v23 = vpop.eup %3966 }
 0x2f3   :  { %v4898_v3 = vpop.f32.mrb[32].mxu0  ;;  %v2395_v57 = vadd.f32 1.0, %v2343_v9  ;;  %v1826_v6 = vadd.f32 0.2548296, %v1774_v28  ;;  %v1824_v8 = vadd.f32 0.2548296, %v1772_v17  ;;  %v1671_v39 = vmul.f32 %v4839_v4, %v1619_v25 }
 0x2f4   :  { %v4903_v27 = vpop.f32.mrb[33].mxu0  ;;  %v2341_v15 = vsel %vm2185_vm6, %v3276_v44, %v2289_v20  ;;  %v1513_v58 = vadd.f32 -1.4531521, %v1461_v48  ;;  %v1466_v11 = vmul.f32 1.0614054, %v4900_v23  ;;  %v1986_v29 = vmul.f32 %v1934_v45, %v4815_v32  ;;  %v4924_v32 = vpop.permute.xlu0 %440 }
 0x2f5   :  { %v4910_v31 = vmul.f32 %v2394_v30, %v4762_v12  ;;  %v4913_v38 = vmul.f32 %v2395_v57, %v4809_v14  ;;  %v2393_v2 = vadd.f32 1.0, %v2341_v15  ;;  %v1878_v28 = vmul.f32 %v4817_v33, %v1826_v6  ;;  %v4916_v17 = vpop.f32.mrb[34].mxu0 }
 0x2f6   :  { %v4919_v25 = vmul.f32 %v2392_v40, %v4768_v22  ;;  %v1723_v35 = vadd.f32 -0.28449672, %v1671_v39  ;;  %v1565_v48 = vmul.f32 %v4872_v18, %v1513_v58  ;;  %v1518_v9 = vadd.f32 -1.4531521, %v1466_v11  ;;  %v4922_v44 = vpop.f32.mrb[35].mxu0 }
 0x2f7   :  { %6463 = vst [vmem:[#allocation29_spill] sm:$0xff] %v4910_v31  ;;  %6464 = vst [vmem:[#allocation30_spill] sm:$0xff] %v4913_v38  ;;  %v4929_v14 = vmul.f32 %v2393_v2, %v4820_v46  ;;  %v2138_v33 = vmul.f32 %v4854_v10, %v1878_v28  ;;  %v1876_v45 = vmul.f32 %v4824_v34, %v1824_v8  ;;  %v1204_v20 = vand.u32 2147483647, %v4867_v54  ;;  %v4939_v46 = vpop.permute.xlu1 %525 }
 0x2f8   :  { %6465 = vst [vmem:[#allocation31_spill] sm:$0xff] %v4919_v25  ;;  %v1775_v22 = vmul.f32 %v4839_v4, %v1723_v35  ;;  %v1617_v30 = vadd.f32 1.4214138, %v1565_v48  ;;  %v1570_v40 = vmul.f32 %v4900_v23, %v1518_v9  ;;  %v2048_v39 = vmul.f32 1.442695, %v1986_v29 }
 0x2f9   :  { %6466 = vst [vmem:[#allocation32_spill] sm:$0xff] %v4929_v14  ;;  %v3281_v6 = vadd.f32 -1.0, %v2138_v33  ;;  %v2294_v15 = vsub.f32 1.0, %v2138_v33  ;;  %v1098_v11 = vmul.f32 0.5, %v4740_v42  ;;  %v2136_v2 = vmul.f32 %v4863_v7, %v1876_v45 }
 0x2fa   :  { %v1827_v10 = vadd.f32 0.2548296, %v1775_v22  ;;  %v1669_v34 = vmul.f32 %v4872_v18, %v1617_v30  ;;  %v1622_v8 = vadd.f32 1.4214138, %v1570_v40  ;;  %v1256_v28 = vmul.f32 0.3275911, %v1204_v20  ;;  %v4955_v22 = vpop.permute.xlu0 %530 }
 0x2fb   :  { %v4942_v58 = vpop.f32.mrb[36].mxu0  ;;  %v1099_v48 = vmul.f32 0.5, %v4746_v49  ;;  %v4951_v9 = vadd.f32 %v4766_v19, %v436_v37  ;;  %v2346_v45 = vsel %vm2190_vm7, %v3281_v6, %v2294_v15  ;;  %3970 = vpow2.f32 %v2048_v39 }
 0x2fc   :  { %v4946_v35 = vpop.f32.mrb[37].mxu0  ;;  %v1879_v5 = vmul.f32 %v4839_v4, %v1827_v10  ;;  %v1721_v29 = vadd.f32 -0.28449672, %v1669_v34  ;;  %v1674_v42 = vmul.f32 %v4900_v23, %v1622_v8  ;;  %v1308_v7 = vadd.f32 1.0, %v1256_v28  ;;  %v4964_v10 = vpop.permute.xlu1 %445 }
 0x2fd   :  { %v4953_v33 = vpop.f32.mrb[38].mxu0  ;;  %v3279_v30 = vadd.f32 -1.0, %v2136_v2  ;;  %v2292_v19 = vsub.f32 1.0, %v2136_v2  ;;  %v4967_v8 = vmul.f32 0.70710677, %v4951_v9  ;;  %v2398_v6 = vadd.f32 1.0, %v2346_v45 }
 0x2fe   :  { %v2139_v49 = vmul.f32 %v4886_v60, %v1879_v5  ;;  %v1773_v4 = vmul.f32 %v4872_v18, %v1721_v29  ;;  %v1726_v37 = vadd.f32 -0.28449672, %v1674_v42  ;;  %3972 = vrcp.f32 %v1308_v7  ;;  %v4962_v40 = vpop.f32.mrb[39].mxu0  ;;  %v3969_v29 = vpop.eup %3968 }
 0x2ff   :  { %v1932_v15 = vsub.f32 0.0, %v1204_v20  ;;  %v4972_v39 = vadd.f32 %v4778_v0, %v4847_v13  ;;  %v1207_v5 = vand.u32 2147483647, %v4967_v8  ;;  %v451_v42 = vpop.permute.xlu0 %450  ;;  %v2344_v7 = vsel %vm2188_vm9, %v3279_v30, %v2292_v19 }
 0x300   :  { %v3282_v52 = vadd.f32 -1.0, %v2139_v49  ;;  %v2295_v34 = vsub.f32 1.0, %v2139_v49  ;;  %v1825_v12 = vadd.f32 0.2548296, %v1773_v4  ;;  %v1778_v60 = vmul.f32 %v4900_v23, %v1726_v37 }
 0x301   :  { %v4980_v4 = vmul.f32 0.70710677, %v4972_v39  ;;  %v1259_v13 = vmul.f32 0.3275911, %v1207_v5  ;;  %v4983_v0 = vadd.f32 %v4786_v24, %v451_v42  ;;  %v4985_v62 = vmul.f32 %v2398_v6, %v1098_v11 }
 0x302   :  { %v2347_v2 = vsel %vm2191_vm8, %v3282_v52, %v2295_v34  ;;  %v1877_v28 = vmul.f32 %v4872_v18, %v1825_v12  ;;  %v1830_v49 = vadd.f32 0.2548296, %v1778_v60  ;;  %v1984_v18 = vmul.f32 %v1932_v15, %v1204_v20  ;;  %v4990_v52 = vpop.permute.xlu1 %535 }
 0x303   :  { %v2399_v45 = vadd.f32 1.0, %v2347_v2  ;;  %6467 = vst [vmem:[#allocation33_spill] sm:$0xff] %v4985_v62  ;;  %v1205_v12 = vand.u32 2147483647, %v4980_v4  ;;  %v2396_v30 = vadd.f32 1.0, %v2344_v7  ;;  %v1311_v60 = vadd.f32 1.0, %v1259_v13 }
 0x304   :  { %v2137_v37 = vmul.f32 %v3969_v29, %v1877_v28  ;;  %vm2189_vm10 = vcmp.lt.f32.partialorder %v4771_v26, 0.0  ;;  %v1882_v24 = vmul.f32 %v4900_v23, %v1830_v49  ;;  %v4998_v15 = vmul.f32 0.70710677, %v4983_v0  ;;  %v5007_v49 = vpop.f32.mrb[40].mxu0 }
 0x305   :  { %v4987_v63 = vmul.f32 %v2399_v45, %v1099_v48  ;;  %v1257_v11 = vmul.f32 0.3275911, %v1205_v12  ;;  %v3971_v6 = vpop.eup %3970  ;;  %v1096_v48 = vmul.f32 0.5, %v4742_v43  ;;  %3974 = vrcp.f32 %v1311_v60 }
 0x306   :  { %v3280_v19 = vadd.f32 -1.0, %v2137_v37  ;;  %v2293_v34 = vsub.f32 1.0, %v2137_v37  ;;  %v1097_v29 = vmul.f32 0.5, %v4751_v55  ;;  %v2044_v7 = vmul.f32 1.442695, %v1984_v18  ;;  %v456_v60 = vpop.permute.xlu1 %455 }
 0x307   :  { %6468 = vst [vmem:[#allocation34_spill] sm:$0xff] %v4987_v63  ;;  %v1309_v45 = vadd.f32 1.0, %v1257_v11  ;;  %v5003_v37 = vmul.f32 %v2396_v30, %v1096_v48  ;;  %v1210_v23 = vand.u32 2147483647, %v4998_v15  ;;  %v2142_v13 = vmul.f32 %v3971_v6, %v1882_v24 }
 0x308   :  { %v2345_v20 = vsel %vm2189_vm10, %v3280_v19, %v2293_v34  ;;  %v5000_v28 = vpop.eup %3972  ;;  %v1935_v19 = vsub.f32 0.0, %v1207_v5  ;;  %v5011_v34 = vpop.f32.mrb[41].mxu0  ;;  %v5014_v55 = vmul.f32 0.5, %v4795_v1  ;;  %v1933_v30 = vsub.f32 0.0, %v1205_v12 }
 0x309   :  { %v2397_v42 = vadd.f32 1.0, %v2345_v20  ;;  %6469 = vst [vmem:[#allocation35_spill] sm:$0xff] %v5003_v37  ;;  %v1464_v26 = vmul.f32 1.0614054, %v5000_v28  ;;  %3976 = vrcp.f32 %v1309_v45  ;;  %v1262_v48 = vmul.f32 0.3275911, %v1210_v23 }
 0x30a   :  { %v5020_v20 = vadd.f32 %v4790_v61, %v4924_v32  ;;  %v5023_v24 = vadd.f32 %v4797_v36, %v456_v60  ;;  %vm2194_vm11 = vcmp.lt.f32.partialorder %v4805_v56, 0.0  ;;  %v5027_v6 = vmul.f32 0.5, %v4843_v51 }
 0x30b   :  { %v5009_v43 = vmul.f32 %v2397_v42, %v1097_v29  ;;  %v1516_v18 = vadd.f32 -1.4531521, %v1464_v26  ;;  %3978 = vpow2.f32 %v2044_v7  ;;  %v3285_v29 = vadd.f32 -1.0, %v2142_v13  ;;  %v5041_v7 = vpop.f32.mrb[42].mxu0 }
 0x30c   :  { %v1987_v42 = vmul.f32 %v1935_v19, %v1207_v5  ;;  %v1314_v45 = vadd.f32 1.0, %v1262_v48  ;;  %v5031_v26 = vmul.f32 0.70710677, %v5020_v20  ;;  %v2298_v2 = vsub.f32 1.0, %v2142_v13  ;;  %6471 = vst [vmem:[#allocation37_spill] sm:$0xff] %v5041_v7 }
 0x30d   :  { %6470 = vst [vmem:[#allocation36_spill] sm:$0xff] %v5009_v43  ;;  %v1568_v1 = vmul.f32 %v5000_v28, %v1516_v18  ;;  %v1985_v32 = vmul.f32 %v1933_v30, %v1205_v12  ;;  %v5034_v36 = vmul.f32 0.70710677, %v5023_v24  ;;  %v1938_v60 = vsub.f32 0.0, %v1210_v23 }
 0x30e   :  { %3980 = vrcp.f32 %v1314_v45  ;;  %v1208_v51 = vand.u32 2147483647, %v5031_v26  ;;  %v5039_v18 = vadd.f32 %v4800_v41, %v4964_v10  ;;  %v5047_v13 = vmul.f32 0.5, %v4951_v9 }
 0x30f   :  { %v1620_v61 = vadd.f32 1.4214138, %v1568_v1  ;;  %v5043_v5 = vpop.eup %3974  ;;  %v5050_v12 = vmul.f32 0.5, %v4972_v39  ;;  %v1211_v30 = vand.u32 2147483647, %v5034_v36  ;;  %v2350_v41 = vsel %vm2194_vm11, %v3285_v29, %v2298_v2 }
 0x310   :  { %v1467_v48 = vmul.f32 1.0614054, %v5043_v5  ;;  %v2050_v1 = vmul.f32 1.442695, %v1987_v42  ;;  %v1260_v45 = vmul.f32 0.3275911, %v1208_v51  ;;  %v1990_v9 = vmul.f32 %v1938_v60, %v1210_v23 }
 0x311   :  { %v1672_v19 = vmul.f32 %v5000_v28, %v1620_v61  ;;  %v2046_v11 = vmul.f32 1.442695, %v1985_v32  ;;  %v1263_v57 = vmul.f32 0.3275911, %v1211_v30  ;;  %v5059_v39 = vmul.f32 0.70710677, %v5039_v18 }
 0x312   :  { %v1519_v61 = vadd.f32 -1.4531521, %v1467_v48  ;;  %v1312_v63 = vadd.f32 1.0, %v1260_v45  ;;  %v1936_v42 = vsub.f32 0.0, %v1208_v51  ;;  %v5067_v29 = vadd.f32 %v4829_v59, %v4708_v50 }
 0x313   :  { %v1724_v10 = vadd.f32 -0.28449672, %v1672_v19  ;;  %v5056_v62 = vpop.eup %3976  ;;  %v1315_v31 = vadd.f32 1.0, %v1263_v57  ;;  %v1209_v2 = vand.u32 2147483647, %v5059_v39  ;;  %v1939_v19 = vsub.f32 0.0, %v1211_v30 }
 0x314   :  { %v1465_v43 = vmul.f32 1.0614054, %v5056_v62  ;;  %v1571_v56 = vmul.f32 %v5043_v5, %v1519_v61  ;;  %3982 = vrcp.f32 %v1312_v63  ;;  %v2402_v48 = vadd.f32 1.0, %v2350_v41 }
 0x315   :  { %v1776_v37 = vmul.f32 %v5000_v28, %v1724_v10  ;;  %v3979_v23 = vpop.eup %3978  ;;  %3984 = vrcp.f32 %v1315_v31  ;;  %v1261_v10 = vmul.f32 0.3275911, %v1209_v2  ;;  %vm2192_vm12 = vcmp.lt.f32.partialorder %v4867_v54, 0.0 }
 0x316   :  { %v1517_v60 = vadd.f32 -1.4531521, %v1465_v43  ;;  %v1623_v45 = vadd.f32 1.4214138, %v1571_v56  ;;  %3986 = vpow2.f32 %v2050_v1  ;;  %v1988_v61 = vmul.f32 %v1936_v42, %v1208_v51  ;;  %v5079_v56 = vpop.f32.mrb[43].mxu0 }
 0x317   :  { %v1828_v32 = vadd.f32 0.2548296, %v1776_v37  ;;  %3988 = vpow2.f32 %v2046_v11  ;;  %v2056_v59 = vmul.f32 1.442695, %v1990_v9  ;;  %v1313_v37 = vadd.f32 1.0, %v1261_v10  ;;  %6472 = vst [vmem:[#allocation38_spill] sm:$0xff] %v5079_v56 }
 0x318   :  { %v1569_v63 = vmul.f32 %v5056_v62, %v1517_v60  ;;  %v5072_v38 = vpop.eup %3980  ;;  %v1675_v50 = vmul.f32 %v5043_v5, %v1623_v45  ;;  %v5076_v31 = vmul.f32 0.70710677, %v5067_v29  ;;  %v1937_v11 = vsub.f32 0.0, %v1209_v2 }
 0x319   :  { %v1880_v57 = vmul.f32 %v5000_v28, %v1828_v32  ;;  %v1470_v41 = vmul.f32 1.0614054, %v5072_v38  ;;  %v1991_v28 = vmul.f32 %v1939_v19, %v1211_v30  ;;  %3990 = vrcp.f32 %v1313_v37 }
 0x31a   :  { %v1621_v1 = vadd.f32 1.4214138, %v1569_v63  ;;  %v1727_v32 = vadd.f32 -0.28449672, %v1675_v50  ;;  %v5082_v51 = vand.u32 2147483647, %v5076_v31  ;;  %v5085_v42 = vmul.f32 %v2402_v48, %v5014_v55 }
 0x31b   :  { %v2140_v43 = vmul.f32 %v3979_v23, %v1880_v57  ;;  %v1522_v60 = vadd.f32 -1.4531521, %v1470_v41  ;;  %v2052_v45 = vmul.f32 1.442695, %v1988_v61  ;;  %vm2195_vm13 = vcmp.lt.f32.partialorder %v4967_v8, 0.0 }
 0x31c   :  { %6473 = vst [vmem:[#allocation39_spill] sm:$0xff] %v5085_v42  ;;  %v1673_v9 = vmul.f32 %v5056_v62, %v1621_v1  ;;  %v1779_v57 = vmul.f32 %v5043_v5, %v1727_v32  ;;  %v1266_v30 = vmul.f32 0.3275911, %v5082_v51  ;;  %3992 = vpow2.f32 %v2056_v59 }
 0x31d   :  { %v3283_v23 = vadd.f32 -1.0, %v2140_v43  ;;  %v2296_v10 = vsub.f32 1.0, %v2140_v43  ;;  %v1574_v63 = vmul.f32 %v5072_v38, %v1522_v60  ;;  %v2058_v50 = vmul.f32 1.442695, %v1991_v28 }
 0x31e   :  { %v1725_v19 = vadd.f32 -0.28449672, %v1673_v9  ;;  %v5092_v37 = vpop.eup %3982  ;;  %v1831_v55 = vadd.f32 0.2548296, %v1779_v57  ;;  %v1989_v48 = vmul.f32 %v1937_v11, %v1209_v2  ;;  %v1318_v1 = vadd.f32 1.0, %v1266_v30 }
 0x31f   :  { %v5096_v61 = vadd.f32 %v4835_v21, %v4704_v47  ;;  %v5098_v43 = vpop.eup %3984  ;;  %v1626_v32 = vadd.f32 1.4214138, %v1574_v63  ;;  %v1468_v9 = vmul.f32 1.0614054, %v5092_v37  ;;  %3994 = vpow2.f32 %v2052_v45 }
 0x320   :  { %v1777_v41 = vmul.f32 %v5056_v62, %v1725_v19  ;;  %v3987_v60 = vpop.eup %3986  ;;  %v2348_v59 = vsel %vm2192_vm12, %v3283_v23, %v2296_v10  ;;  %v1883_v28 = vmul.f32 %v5043_v5, %v1831_v55  ;;  %vm2193_vm14 = vcmp.lt.f32.partialorder %v4980_v4, 0.0 }
 0x321   :  { %v1471_v2 = vmul.f32 1.0614054, %v5098_v43  ;;  %3996 = vrcp.f32 %v1318_v1  ;;  %v3989_v47 = vpop.eup %3988  ;;  %v1678_v11 = vmul.f32 %v5072_v38, %v1626_v32  ;;  %v1520_v57 = vadd.f32 -1.4531521, %v1468_v9 }
 0x322   :  { %v1829_v21 = vadd.f32 0.2548296, %v1777_v41  ;;  %3998 = vpow2.f32 %v2058_v50  ;;  %v2143_v30 = vmul.f32 %v3987_v60, %v1883_v28  ;;  %v2054_v45 = vmul.f32 1.442695, %v1989_v48 }
 0x323   :  { %v1523_v19 = vadd.f32 -1.4531521, %v1471_v2  ;;  %v5109_v63 = vmul.f32 0.70710677, %v5096_v61  ;;  %v2400_v54 = vadd.f32 1.0, %v2348_v59  ;;  %v1572_v10 = vmul.f32 %v5092_v37, %v1520_v57  ;;  %v5113_v55 = vpop.eup %3990 }
 0x324   :  { %v1881_v5 = vmul.f32 %v5056_v62, %v1829_v21  ;;  %v1730_v23 = vadd.f32 -0.28449672, %v1678_v11  ;;  %v3286_v1 = vadd.f32 -1.0, %v2143_v30  ;;  %v2299_v41 = vsub.f32 1.0, %v2143_v30  ;;  %v5124_v21 = vpop.f32.mrb[44].mxu0 }
 0x325   :  { %v1575_v32 = vmul.f32 %v5098_v43, %v1523_v19  ;;  %v5117_v50 = vand.u32 2147483647, %v5109_v63  ;;  %v1624_v60 = vadd.f32 1.4214138, %v1572_v10  ;;  %v1469_v59 = vmul.f32 1.0614054, %v5113_v55 }
 0x326   :  { %v2141_v9 = vmul.f32 %v3989_v47, %v1881_v5  ;;  %v1782_v48 = vmul.f32 %v5072_v38, %v1730_v23  ;;  %v2351_v62 = vsel %vm2195_vm13, %v3286_v1, %v2299_v41  ;;  %4000 = vpow2.f32 %v2054_v45  ;;  %6474 = vst [vmem:[#allocation40_spill] sm:$0xff] %v5124_v21  ;;  %v3993_v11 = vpop.eup %3992  ;;  %v5128_v14 = vpop.f32.mrb[45].mxu0 }
 0x327   :  { %v1627_v28 = vadd.f32 1.4214138, %v1575_v32  ;;  %v1264_v2 = vmul.f32 0.3275911, %v5117_v50  ;;  %v2403_v57 = vadd.f32 1.0, %v2351_v62  ;;  %v1676_v47 = vmul.f32 %v5092_v37, %v1624_v60  ;;  %6475 = vst [vmem:[#allocation41_spill] sm:$0xff] %v5128_v14 }
 0x328   :  { %v3284_v30 = vadd.f32 -1.0, %v2141_v9  ;;  %v2297_v19 = vsub.f32 1.0, %v2141_v9  ;;  %v1834_v25 = vadd.f32 0.2548296, %v1782_v48  ;;  %v1521_v23 = vadd.f32 -1.4531521, %v1469_v59 }
 0x329   :  { %v1679_v5 = vmul.f32 %v5098_v43, %v1627_v28  ;;  %v1316_v10 = vadd.f32 1.0, %v1264_v2  ;;  %v3995_v8 = vpop.eup %3994  ;;  %v5131_v45 = vmul.f32 %v2400_v54, %v5027_v6  ;;  %v5134_v1 = vmul.f32 %v2403_v57, %v5047_v13 }
 0x32a   :  { %v2349_v41 = vsel %vm2193_vm14, %v3284_v30, %v2297_v19  ;;  %v1886_v32 = vmul.f32 %v5072_v38, %v1834_v25  ;;  %v1728_v60 = vadd.f32 -0.28449672, %v1676_v47  ;;  %v1573_v62 = vmul.f32 %v5113_v55, %v1521_v23  ;;  %v6479_v47 = vld [vmem:[#allocation22_spill] sm:$0xff] }
 0x32b   :  { %6476 = vst [vmem:[#allocation42_spill] sm:$0xff] %v5131_v45  ;;  %6477 = vst [vmem:[#allocation43_spill] sm:$0xff] %v5134_v1  ;;  %v5139_v9 = vpop.eup %3996  ;;  %v2401_v48 = vadd.f32 1.0, %v2349_v41  ;;  %v1731_v59 = vadd.f32 -0.28449672, %v1679_v5  ;;  %4002 = vrcp.f32 %v1316_v10  ;;  %v5152_v5 = vadd.f32 %v6479_v47, %v4710_v53 }
 0x32c   :  { %v3999_v28 = vpop.eup %3998  ;;  %v2146_v54 = vmul.f32 %v3993_v11, %v1886_v32  ;;  %v1474_v13 = vmul.f32 1.0614054, %v5139_v9  ;;  %v1780_v38 = vmul.f32 %v5092_v37, %v1728_v60  ;;  %v1625_v2 = vadd.f32 1.4214138, %v1573_v62  ;;  %v5158_v32 = vpop.f32.mrb[46].mxu0 }
 0x32d   :  { %v5146_v4 = vmul.f32 %v2401_v48, %v5050_v12  ;;  %v1783_v25 = vmul.f32 %v5098_v43, %v1731_v59  ;;  %6480 = vst [vmem:[#allocation22_spill] sm:$0xff] %v5158_v32  ;;  %vm2198_vm15 = vcmp.lt.f32.partialorder %v4998_v15, 0.0  ;;  %vm2199_vm1 = vcmp.lt.f32.partialorder %v5034_v36, 0.0 }
 0x32e   :  { %v3289_v57 = vadd.f32 -1.0, %v2146_v54  ;;  %v2302_v30 = vsub.f32 1.0, %v2146_v54  ;;  %v1526_v19 = vadd.f32 -1.4531521, %v1474_v13  ;;  %v1832_v23 = vadd.f32 0.2548296, %v1780_v38 }
 0x32f   :  { %6478 = vst [vmem:[#allocation44_spill] sm:$0xff] %v5146_v4  ;;  %v1835_v10 = vadd.f32 0.2548296, %v1783_v25  ;;  %v1677_v12 = vmul.f32 %v5113_v55, %v1625_v2  ;;  %v5164_v54 = vmul.f32 0.70710677, %v5152_v5  ;;  %vm2196_vm2 = vcmp.lt.f32.partialorder %v5031_v26, 0.0 }
 0x330   :  { %v1578_v41 = vmul.f32 %v5139_v9, %v1526_v19  ;;  %v4001_v48 = vpop.eup %4000  ;;  %v1884_v60 = vmul.f32 %v5092_v37, %v1832_v23  ;;  %v2354_v62 = vsel %vm2198_vm15, %v3289_v57, %v2302_v30  ;;  %v6481_v23 = vld [vmem:[#allocation14_spill] sm:$0xff]  ;;  %v5175_v57 = vpop.f32.mrb[47].mxu0  ;;  %vm2197_vm3 = vcmp.lt.f32.partialorder %v5059_v39, 0.0 }
 0x331   :  { %v1887_v59 = vmul.f32 %v5098_v43, %v1835_v10  ;;  %v1729_v53 = vadd.f32 -0.28449672, %v1677_v12  ;;  %v5169_v19 = vand.u32 2147483647, %v5164_v54  ;;  %v2406_v15 = vadd.f32 1.0, %v2354_v62  ;;  %v6482_v43 = vld [vmem:[#allocation23_spill] sm:$0xff] }
 0x332   :  { %v2144_v13 = vmul.f32 %v3995_v8, %v1884_v60  ;;  %v1630_v2 = vadd.f32 1.4214138, %v1578_v41  ;;  %v5173_v10 = vadd.f32 %v6482_v43, %v6481_v23  ;;  %6483 = vst [vmem:[#allocation14_spill] sm:$0xff] %v5175_v57  ;;  %v1106_v62 = vmul.f32 0.5, %v4983_v0 }
 0x333   :  { %v2147_v38 = vmul.f32 %v3999_v28, %v1887_v59  ;;  %v1781_v25 = vmul.f32 %v5113_v55, %v1729_v53  ;;  %v1267_v41 = vmul.f32 0.3275911, %v5169_v19  ;;  %v1942_v59 = vsub.f32 0.0, %v5082_v51 }
 0x334   :  { %v3287_v8 = vadd.f32 -1.0, %v2144_v13  ;;  %v2300_v28 = vsub.f32 1.0, %v2144_v13  ;;  %v1682_v60 = vmul.f32 %v5139_v9, %v1630_v2  ;;  %v5188_v6 = vmul.f32 0.70710677, %v5173_v10 }
 0x335   :  { %v3290_v47 = vadd.f32 -1.0, %v2147_v38  ;;  %v2303_v37 = vsub.f32 1.0, %v2147_v38  ;;  %v5177_v30 = vpop.eup %4002  ;;  %v1833_v12 = vadd.f32 0.2548296, %v1781_v25  ;;  %v1107_v38 = vmul.f32 0.5, %v5023_v24 }
 0x336   :  { %v1472_v53 = vmul.f32 1.0614054, %v5177_v30  ;;  %v1319_v25 = vadd.f32 1.0, %v1267_v41  ;;  %v2352_v2 = vsel %vm2196_vm2, %v3287_v8, %v2300_v28  ;;  %v1734_v42 = vadd.f32 -0.28449672, %v1682_v60  ;;  %v6486_v41 = vld [vmem:[#allocation17_spill] sm:$0xff] }
 0x337   :  { %v2355_v36 = vsel %vm2199_vm1, %v3290_v47, %v2303_v37  ;;  %v1885_v43 = vmul.f32 %v5113_v55, %v1833_v12  ;;  %v5190_v47 = vmul.f32 %v2406_v15, %v1106_v62  ;;  %v1994_v0 = vmul.f32 %v1942_v59, %v5082_v51  ;;  %v5204_v8 = vpop.f32.mrb[48].mxu0 }
 0x338   :  { %v2407_v23 = vadd.f32 1.0, %v2355_v36  ;;  %v1524_v13 = vadd.f32 -1.4531521, %v1472_v53  ;;  %4004 = vrcp.f32 %v1319_v25  ;;  %v5196_v24 = vand.u32 2147483647, %v5188_v6  ;;  %v6487_v36 = vld [vmem:[#allocation24_spill] sm:$0xff] }
 0x339   :  { %6484 = vst [vmem:[#allocation23_spill] sm:$0xff] %v5190_v47  ;;  %v2145_v11 = vmul.f32 %v4001_v48, %v1885_v43  ;;  %v5202_v15 = vadd.f32 %v6487_v36, %v6486_v41  ;;  %6488 = vst [vmem:[#allocation17_spill] sm:$0xff] %v5204_v8  ;;  %v2404_v28 = vadd.f32 1.0, %v2352_v2  ;;  %v1104_v60 = vmul.f32 0.5, %v5020_v20  ;;  %v6489_v25 = vld [vmem:[#allocation15_spill] sm:$0xff]  ;;  %v6490_v2 = vld [vmem:[#allocation25_spill] sm:$0xff] }
 0x33a   :  { %v5192_v37 = vmul.f32 %v2407_v23, %v1107_v38  ;;  %v1576_v51 = vmul.f32 %v5177_v30, %v1524_v13  ;;  %v1265_v48 = vmul.f32 0.3275911, %v5196_v24  ;;  %v1105_v53 = vmul.f32 0.5, %v5039_v18  ;;  %v5219_v13 = vpop.f32.mrb[49].mxu0 }
 0x33b   :  { %v3288_v55 = vadd.f32 -1.0, %v2145_v11  ;;  %v2301_v12 = vsub.f32 1.0, %v2145_v11  ;;  %v2064_v11 = vmul.f32 1.442695, %v1994_v0  ;;  %v1786_v23 = vmul.f32 %v5139_v9, %v1734_v42  ;;  %6491 = vst [vmem:[#allocation24_spill] sm:$0xff] %v5219_v13 }
 0x33c   :  { %6485 = vst [vmem:[#allocation45_spill] sm:$0xff] %v5192_v37  ;;  %v1317_v38 = vadd.f32 1.0, %v1265_v48  ;;  %v5213_v43 = vmul.f32 0.70710677, %v5202_v15  ;;  %v5217_v39 = vadd.f32 %v6490_v2, %v6489_v25  ;;  %v5221_v41 = vmul.f32 %v2404_v28, %v1104_v60  ;;  %v6494_v28 = vld [vmem:[#allocation18_spill] sm:$0xff] }
 0x33d   :  { %v2353_v59 = vsel %vm2197_vm3, %v3288_v55, %v2301_v12  ;;  %v1628_v55 = vadd.f32 1.4214138, %v1576_v51  ;;  %v1940_v18 = vsub.f32 0.0, %v5117_v50  ;;  %v6495_v48 = vld [vmem:[#allocation26_spill] sm:$0xff]  ;;  %v5239_v51 = vpop.f32.mrb[50].mxu0  ;;  %vm2202_vm4 = vcmp.lt.f32.partialorder %v5076_v31, 0.0 }
 0x33e   :  { %v2405_v62 = vadd.f32 1.0, %v2353_v59  ;;  %6492 = vst [vmem:[#allocation15_spill] sm:$0xff] %v5221_v41  ;;  %4006 = vrcp.f32 %v1317_v38  ;;  %v5227_v0 = vand.u32 2147483647, %v5213_v43  ;;  %v5233_v36 = vmul.f32 0.70710677, %v5217_v39 }
 0x33f   :  { %4008 = vpow2.f32 %v2064_v11  ;;  %v5237_v60 = vadd.f32 %v6495_v48, %v6494_v28  ;;  %6496 = vst [vmem:[#allocation18_spill] sm:$0xff] %v5239_v51  ;;  %v1992_v38 = vmul.f32 %v1940_v18, %v5117_v50  ;;  %v6497_v50 = vld [vmem:[#allocation16_spill] sm:$0xff]  ;;  %v6500_v51 = vld [vmem:[#allocation19_spill] sm:$0xff]  ;;  %v5309_v8 = vmul.f32 0.5, %v5152_v5 }
 0x340   :  { %v5223_v20 = vmul.f32 %v2405_v62, %v1105_v53  ;;  %v1270_v12 = vmul.f32 0.3275911, %v5227_v0  ;;  %v1838_v53 = vadd.f32 0.2548296, %v1786_v23  ;;  %v1680_v62 = vmul.f32 %v5177_v30, %v1628_v55 }
 0x341   :  { %v5247_v2 = vand.u32 2147483647, %v5233_v36  ;;  %v5250_v26 = vmul.f32 0.70710677, %v5237_v60  ;;  %v1943_v23 = vsub.f32 0.0, %v5169_v19  ;;  %v5259_v18 = vadd.f32 %v4884_v16, %v6497_v50 }
 0x342   :  { %6493 = vst [vmem:[#allocation25_spill] sm:$0xff] %v5223_v20  ;;  %v5241_v59 = vpop.eup %4004  ;;  %v1322_v25 = vadd.f32 1.0, %v1270_v12  ;;  %v1732_v42 = vadd.f32 -0.28449672, %v1680_v62  ;;  %v1890_v12 = vmul.f32 %v5139_v9, %v1838_v53  ;;  %v2060_v47 = vmul.f32 1.442695, %v1992_v38 }
 0x343   :  { %v1475_v11 = vmul.f32 1.0614054, %v5241_v59  ;;  %v1268_v48 = vmul.f32 0.3275911, %v5247_v2  ;;  %v5255_v55 = vand.u32 2147483647, %v5250_v26  ;;  %v1995_v16 = vmul.f32 %v1943_v23, %v5169_v19 }
 0x344   :  { %4010 = vrcp.f32 %v1322_v25  ;;  %v1784_v45 = vmul.f32 %v5177_v30, %v1732_v42  ;;  %v5270_v9 = vmul.f32 0.70710677, %v5259_v18  ;;  %vm2200_vm5 = vcmp.lt.f32.partialorder %v5109_v63, 0.0 }
 0x345   :  { %v1527_v28 = vadd.f32 -1.4531521, %v1475_v11  ;;  %v1320_v41 = vadd.f32 1.0, %v1268_v48  ;;  %v1271_v25 = vmul.f32 0.3275911, %v5255_v55  ;;  %v5353_v56 = vmul.f32 0.5, %v5237_v60 }
 0x346   :  { %vm2203_vm6 = vcmp.lt.f32.partialorder %v5164_v54, 0.0  ;;  %v5372_v63 = vmul.f32 0.5, %v5259_v18  ;;  %vm2201_vm7 = vcmp.lt.f32.partialorder %v5188_v6, 0.0  ;;  %vm2206_vm8 = vcmp.lt.f32.partialorder %v5213_v43, 0.0 }
 0x347   :  { %v1579_v37 = vmul.f32 %v5241_v59, %v1527_v28  ;;  %4012 = vrcp.f32 %v1320_v41  ;;  %v1323_v50 = vadd.f32 1.0, %v1271_v25  ;;  %v6498_v28 = vld [vmem:[#allocation20_spill] sm:$0xff]  ;;  %v5281_v41 = vand.u32 2147483647, %v5270_v9 }
 0x348   :  { %v5263_v11 = vpop.eup %4006  ;;  %4014 = vpow2.f32 %v2060_v47  ;;  %v5274_v48 = vadd.f32 %v4898_v3, %v6498_v28  ;;  %v5286_v47 = vpop.f32.mrb[51].mxu0  ;;  %v2066_v3 = vmul.f32 1.442695, %v1995_v16  ;;  %v5292_v25 = vmul.f32 0.5, %v5096_v61 }
 0x349   :  { %v1631_v62 = vadd.f32 1.4214138, %v1579_v37  ;;  %v1473_v20 = vmul.f32 1.0614054, %v5263_v11  ;;  %v4009_v1 = vpop.eup %4008  ;;  %v5277_v37 = vmul.f32 0.5, %v5067_v29  ;;  %4016 = vrcp.f32 %v1323_v50  ;;  %6499 = vst [vmem:[#allocation26_spill] sm:$0xff] %v5286_v47 }
 0x34a   :  { %v2150_v53 = vmul.f32 %v4009_v1, %v1890_v12  ;;  %v1941_v1 = vsub.f32 0.0, %v5196_v24  ;;  %v1269_v23 = vmul.f32 0.3275911, %v5281_v41  ;;  %vm2204_vm9 = vcmp.lt.f32.partialorder %v5233_v36, 0.0 }
 0x34b   :  { %v1525_v38 = vadd.f32 -1.4531521, %v1473_v20  ;;  %v1683_v19 = vmul.f32 %v5241_v59, %v1631_v62  ;;  %v1836_v20 = vadd.f32 0.2548296, %v1784_v45  ;;  %v5295_v62 = vmul.f32 0.70710677, %v5274_v48 }
 0x34c   :  { %v3293_v12 = vadd.f32 -1.0, %v2150_v53  ;;  %v1321_v50 = vadd.f32 1.0, %v1269_v23  ;;  %v5300_v45 = vadd.f32 %v4903_v27, %v6500_v51  ;;  %v1993_v13 = vmul.f32 %v1941_v1, %v5196_v24 }
 0x34d   :  { %v1577_v42 = vmul.f32 %v5263_v11, %v1525_v38  ;;  %v2306_v38 = vsub.f32 1.0, %v2150_v53  ;;  %v1735_v16 = vadd.f32 -0.28449672, %v1683_v19  ;;  %v5305_v61 = vand.u32 2147483647, %v5295_v62 }
 0x34e   :  { %v5289_v29 = vpop.eup %4010  ;;  %4018 = vrcp.f32 %v1321_v50  ;;  %v5314_v27 = vmul.f32 0.5, %v5173_v10  ;;  %v1946_v51 = vsub.f32 0.0, %v5227_v0  ;;  %vm2207_vm10 = vcmp.lt.f32.partialorder %v5250_v26, 0.0 }
 0x34f   :  { %v1629_v28 = vadd.f32 1.4214138, %v1577_v42  ;;  %v1478_v4 = vmul.f32 1.0614054, %v5289_v29  ;;  %v1888_v42 = vmul.f32 %v5177_v30, %v1836_v20  ;;  %4020 = vpow2.f32 %v2066_v3 }
 0x350   :  { %v1274_v24 = vmul.f32 0.3275911, %v5305_v61  ;;  %v2358_v19 = vsel %vm2202_vm4, %v3293_v12, %v2306_v38  ;;  %v1787_v10 = vmul.f32 %v5241_v59, %v1735_v16  ;;  %v2062_v3 = vmul.f32 1.442695, %v1993_v13 }
 0x351   :  { %v1681_v47 = vmul.f32 %v5263_v11, %v1629_v28  ;;  %v1530_v53 = vadd.f32 -1.4531521, %v1478_v4  ;;  %v5311_v23 = vpop.eup %4012  ;;  %v5323_v4 = vmul.f32 0.70710677, %v5300_v45  ;;  %v2410_v38 = vadd.f32 1.0, %v2358_v19 }
 0x352   :  { %v1476_v5 = vmul.f32 1.0614054, %v5311_v23  ;;  %v4015_v1 = vpop.eup %4014  ;;  %v1326_v28 = vadd.f32 1.0, %v1274_v24  ;;  %v1998_v14 = vmul.f32 %v1946_v51, %v5227_v0  ;;  %v1839_v24 = vadd.f32 0.2548296, %v1787_v10 }
 0x353   :  { %v1582_v30 = vmul.f32 %v5289_v29, %v1530_v53  ;;  %v1733_v20 = vadd.f32 -0.28449672, %v1681_v47  ;;  %v2148_v50 = vmul.f32 %v4015_v1, %v1888_v42  ;;  %v5328_v31 = vand.u32 2147483647, %v5323_v4  ;;  %v5330_v12 = vpop.eup %4016 }
 0x354   :  { %v1528_v32 = vadd.f32 -1.4531521, %v1476_v5  ;;  %v5333_v53 = vmul.f32 0.5, %v5202_v15  ;;  %4022 = vrcp.f32 %v1326_v28  ;;  %v1944_v47 = vsub.f32 0.0, %v5247_v2 }
 0x355   :  { %v1634_v57 = vadd.f32 1.4214138, %v1582_v30  ;;  %v1479_v42 = vmul.f32 1.0614054, %v5330_v12  ;;  %4024 = vpow2.f32 %v2062_v3  ;;  %v5341_v30 = vmul.f32 0.5, %v5217_v39 }
 0x356   :  { %v1580_v13 = vmul.f32 %v5311_v23, %v1528_v32  ;;  %v1272_v19 = vmul.f32 0.3275911, %v5328_v31  ;;  %v3291_v15 = vadd.f32 -1.0, %v2148_v50  ;;  %v2304_v5 = vsub.f32 1.0, %v2148_v50 }
 0x357   :  { %v1686_v16 = vmul.f32 %v5289_v29, %v1634_v57  ;;  %v1785_v0 = vmul.f32 %v5263_v11, %v1733_v20  ;;  %v1947_v51 = vsub.f32 0.0, %v5255_v55  ;;  %v5347_v57 = vmul.f32 %v2410_v38, %v5277_v37  ;;  %v6501_v38 = vld [vmem:[#allocation27_spill] sm:$0xff] }
 0x358   :  { %v1531_v1 = vadd.f32 -1.4531521, %v1479_v42  ;;  %v1324_v28 = vadd.f32 1.0, %v1272_v19  ;;  %v5349_v21 = vpop.eup %4018  ;;  %v2072_v10 = vmul.f32 1.442695, %v1998_v14  ;;  %v1996_v39 = vmul.f32 %v1944_v47, %v5247_v2 }
 0x359   :  { %v1738_v32 = vadd.f32 -0.28449672, %v1686_v16  ;;  %v1632_v3 = vadd.f32 1.4214138, %v1580_v13  ;;  %v4021_v50 = vpop.eup %4020  ;;  %v1891_v20 = vmul.f32 %v5241_v59, %v1839_v24  ;;  %v1477_v37 = vmul.f32 1.0614054, %v5349_v21 }
 0x35a   :  { %v1583_v7 = vmul.f32 %v5330_v12, %v1531_v1  ;;  %v5360_v16 = vadd.f32 %v4916_v17, %v6501_v38  ;;  %v2356_v14 = vsel %vm2200_vm5, %v3291_v15, %v2304_v5  ;;  %v1837_v13 = vadd.f32 0.2548296, %v1785_v0  ;;  %v5367_v24 = vpop.f32.mrb[52].mxu0 }
 0x35b   :  { %v1999_v2 = vmul.f32 %v1947_v51, %v5255_v55  ;;  %4026 = vrcp.f32 %v1324_v28  ;;  %v1790_v60 = vmul.f32 %v5289_v29, %v1738_v32  ;;  %v1529_v42 = vadd.f32 -1.4531521, %v1477_v37 }
 0x35c   :  { %v1635_v47 = vadd.f32 1.4214138, %v1583_v7  ;;  %v1945_v59 = vsub.f32 0.0, %v5281_v41  ;;  %4028 = vpow2.f32 %v2072_v10  ;;  %v1684_v17 = vmul.f32 %v5311_v23, %v1632_v3 }
 0x35d   :  { %v2068_v19 = vmul.f32 1.442695, %v1996_v39  ;;  %v2408_v55 = vadd.f32 1.0, %v2356_v14  ;;  %v2151_v5 = vmul.f32 %v4021_v50, %v1891_v20  ;;  %v1581_v7 = vmul.f32 %v5349_v21, %v1529_v42 }
 0x35e   :  { %v5374_v15 = vpop.eup %4022  ;;  %v5378_v0 = vmul.f32 0.70710677, %v5360_v16  ;;  %v1889_v51 = vmul.f32 %v5263_v11, %v1837_v13  ;;  %v1687_v32 = vmul.f32 %v5330_v12, %v1635_v47  ;;  %v2074_v1 = vmul.f32 1.442695, %v1999_v2 }
 0x35f   :  { %v1482_v28 = vmul.f32 1.0614054, %v5374_v15  ;;  %v4025_v10 = vpop.eup %4024  ;;  %v1842_v3 = vadd.f32 0.2548296, %v1790_v60  ;;  %v1633_v18 = vadd.f32 1.4214138, %v1581_v7  ;;  %v1997_v39 = vmul.f32 %v1945_v59, %v5281_v41 }
 0x360   :  { %v5385_v37 = vand.u32 2147483647, %v5378_v0  ;;  %v1736_v50 = vadd.f32 -0.28449672, %v1684_v17  ;;  %4030 = vpow2.f32 %v2068_v19  ;;  %v1950_v38 = vsub.f32 0.0, %v5305_v61 }
 0x361   :  { %v1534_v20 = vadd.f32 -1.4531521, %v1482_v28  ;;  %v3294_v14 = vadd.f32 -1.0, %v2151_v5  ;;  %v2307_v11 = vsub.f32 1.0, %v2151_v5  ;;  %v1685_v13 = vmul.f32 %v5349_v21, %v1633_v18 }
 0x362   :  { %v1275_v2 = vmul.f32 0.3275911, %v5385_v37  ;;  %v2149_v47 = vmul.f32 %v4025_v10, %v1889_v51  ;;  %v1739_v60 = vadd.f32 -0.28449672, %v1687_v32  ;;  %v5392_v41 = vmul.f32 0.5, %v5274_v48  ;;  %v6502_v51 = vld [vmem:[#allocation21_spill] sm:$0xff] }
 0x363   :  { %v1586_v42 = vmul.f32 %v5374_v15, %v1534_v20  ;;  %v1894_v59 = vmul.f32 %v5289_v29, %v1842_v3  ;;  %4032 = vpow2.f32 %v2074_v1  ;;  %v2070_v17 = vmul.f32 1.442695, %v1997_v39  ;;  %v5403_v32 = vpop.f32.mrb[53].mxu0 }
 0x364   :  { %v1327_v19 = vadd.f32 1.0, %v1275_v2  ;;  %v1788_v5 = vmul.f32 %v5311_v23, %v1736_v50  ;;  %v1737_v28 = vadd.f32 -0.28449672, %v1685_v13  ;;  %v5401_v10 = vadd.f32 %v4922_v44, %v6502_v51  ;;  %v5410_v39 = vpop.f32.mrb[54].mxu0 }
 0x365   :  { %v5396_v7 = vpop.eup %4026  ;;  %v1638_v18 = vadd.f32 1.4214138, %v1586_v42  ;;  %v2359_v48 = vsel %vm2203_vm6, %v3294_v14, %v2307_v11  ;;  %v2002_v29 = vmul.f32 %v1950_v38, %v5305_v61  ;;  %v1948_v3 = vsub.f32 0.0, %v5328_v31  ;;  %v5414_v2 = vpop.f32.mrb[55].mxu0 }
 0x366   :  { %v1480_v1 = vmul.f32 1.0614054, %v5396_v7  ;;  %v4029_v50 = vpop.eup %4028  ;;  %v3292_v20 = vadd.f32 -1.0, %v2149_v47  ;;  %v1791_v13 = vmul.f32 %v5330_v12, %v1739_v60  ;;  %4034 = vrcp.f32 %v1327_v19  ;;  %6503 = vst [vmem:[#allocation16_spill] sm:$0xff] %v5414_v2 }
 0x367   :  { %v1690_v44 = vmul.f32 %v5374_v15, %v1638_v18  ;;  %v2305_v42 = vsub.f32 1.0, %v2149_v47  ;;  %v2154_v54 = vmul.f32 %v4029_v50, %v1894_v59  ;;  %v5419_v38 = vadd.f32 %v4942_v58, %v4955_v22 }
 0x368   :  { %v1532_v61 = vadd.f32 -1.4531521, %v1480_v1  ;;  %v5422_v14 = vmul.f32 %v2408_v55, %v5292_v25  ;;  %v1840_v11 = vadd.f32 0.2548296, %v1788_v5  ;;  %v1789_v60 = vmul.f32 %v5349_v21, %v1737_v28 }
 0x369   :  { %v5426_v18 = vmul.f32 0.70710677, %v5401_v10  ;;  %v2411_v19 = vadd.f32 1.0, %v2359_v48  ;;  %4036 = vpow2.f32 %v2070_v17  ;;  %v1742_v47 = vadd.f32 -0.28449672, %v1690_v44 }
 0x36a   :  { %v2080_v59 = vmul.f32 1.442695, %v2002_v29  ;;  %v4031_v51 = vpop.eup %4030  ;;  %v1843_v50 = vadd.f32 0.2548296, %v1791_v13  ;;  %v1584_v1 = vmul.f32 %v5396_v7, %v1532_v61  ;;  %v2000_v58 = vmul.f32 %v1948_v3, %v5328_v31 }
 0x36b   :  { %v5431_v22 = vand.u32 2147483647, %v5426_v18  ;;  %v2357_v25 = vsel %vm2201_vm7, %v3292_v20, %v2305_v42  ;;  %v3297_v55 = vadd.f32 -1.0, %v2154_v54  ;;  %v5436_v5 = vmul.f32 0.5, %v5300_v45 }
 0x36c   :  { %v5439_v17 = vmul.f32 0.70710677, %v5419_v38  ;;  %v2310_v28 = vsub.f32 1.0, %v2154_v54  ;;  %v1892_v48 = vmul.f32 %v5311_v23, %v1840_v11  ;;  %v1841_v29 = vadd.f32 0.2548296, %v1789_v60 }
 0x36d   :  { %v1636_v13 = vadd.f32 1.4214138, %v1584_v1  ;;  %v4033_v44 = vpop.eup %4032  ;;  %v1794_v31 = vmul.f32 %v5374_v15, %v1742_v47  ;;  %4038 = vpow2.f32 %v2080_v59  ;;  %v1273_v3 = vmul.f32 0.3275911, %v5431_v22 }
 0x36e   :  { %v5445_v6 = vand.u32 2147483647, %v5439_v17  ;;  %v5448_v45 = vmul.f32 %v2411_v19, %v5309_v8  ;;  %v2409_v20 = vadd.f32 1.0, %v2357_v25  ;;  %v1895_v42 = vmul.f32 %v5330_v12, %v1843_v50  ;;  %v6504_v19 = vld [vmem:[#allocation28_spill] sm:$0xff]  ;;  %v5463_v12 = vpop.f32.mrb[56].mxu0 }
 0x36f   :  { %v2076_v54 = vmul.f32 1.442695, %v2000_v58  ;;  %v1688_v23 = vmul.f32 %v5396_v7, %v1636_v13  ;;  %v1951_v61 = vsub.f32 0.0, %v5385_v37  ;;  %v1325_v11 = vadd.f32 1.0, %v1273_v3  ;;  %6505 = vst [vmem:[#allocation20_spill] sm:$0xff] %v5463_v12 }
 0x370   :  { %v1278_v60 = vmul.f32 0.3275911, %v5445_v6  ;;  %v5454_v47 = vpop.eup %4034  ;;  %v2362_v59 = vsel %vm2206_vm8, %v3297_v55, %v2310_v28  ;;  %v2152_v1 = vmul.f32 %v4031_v51, %v1892_v48  ;;  %v1893_v8 = vmul.f32 %v5349_v21, %v1841_v29 }
 0x371   :  { %v5461_v25 = vadd.f32 %v4946_v35, %v6504_v19  ;;  %v1846_v50 = vadd.f32 0.2548296, %v1794_v31  ;;  %v1483_v58 = vmul.f32 1.0614054, %v5454_v47  ;;  %4040 = vrcp.f32 %v1325_v11 }
 0x372   :  { %v1330_v13 = vadd.f32 1.0, %v1278_v60  ;;  %v2155_v43 = vmul.f32 %v4033_v44, %v1895_v42  ;;  %4042 = vpow2.f32 %v2076_v54  ;;  %v5469_v51 = vmul.f32 0.5, %v5360_v16 }
 0x373   :  { %v5472_v21 = vmul.f32 0.5, %v5401_v10  ;;  %v4037_v35 = vpop.eup %4036  ;;  %v5475_v55 = vmul.f32 %v2409_v20, %v5314_v27  ;;  %v2414_v28 = vadd.f32 1.0, %v2362_v59  ;;  %vm2205_vm11 = vcmp.lt.f32.partialorder %v5270_v9, 0.0  ;;  %v5492_v59 = vpop.permute.xlu0 %540 }
 0x374   :  { %v1740_v48 = vadd.f32 -0.28449672, %v1688_v23  ;;  %v1535_v29 = vadd.f32 -1.4531521, %v1483_v58  ;;  %v3295_v31 = vadd.f32 -1.0, %v2152_v1  ;;  %v2308_v3 = vsub.f32 1.0, %v2152_v1 }
 0x375   :  { %v2153_v11 = vmul.f32 %v4037_v35, %v1893_v8  ;;  %4044 = vrcp.f32 %v1330_v13  ;;  %v1898_v44 = vmul.f32 %v5374_v15, %v1846_v50  ;;  %v2003_v10 = vmul.f32 %v1951_v61, %v5385_v37  ;;  %v5499_v8 = vpop.f32.mrb[57].mxu0 }
 0x376   :  { %v1587_v16 = vmul.f32 %v5454_v47, %v1535_v29  ;;  %v5482_v42 = vmul.f32 0.70710677, %v5461_v25  ;;  %v3298_v27 = vadd.f32 -1.0, %v2155_v43  ;;  %v2311_v20 = vsub.f32 1.0, %v2155_v43  ;;  %6506 = vst [vmem:[#allocation19_spill] sm:$0xff] %v5499_v8 }
 0x377   :  { %v5486_v54 = vadd.f32 %v4953_v33, %v4990_v52  ;;  %v5490_v23 = vadd.f32 %v4962_v40, %v4939_v46  ;;  %v4039_v60 = vpop.eup %4038  ;;  %v1792_v15 = vmul.f32 %v5396_v7, %v1740_v48  ;;  %v1949_v37 = vsub.f32 0.0, %v5431_v22  ;;  %v5507_v40 = vpop.f32.mrb[58].mxu0 }
 0x378   :  { %v1639_v1 = vadd.f32 1.4214138, %v1587_v16  ;;  %v5497_v61 = vand.u32 2147483647, %v5482_v42  ;;  %v5502_v33 = vmul.f32 %v2414_v28, %v5333_v53  ;;  %v3296_v52 = vadd.f32 -1.0, %v2153_v11  ;;  %6508 = vst [vmem:[#allocation21_spill] sm:$0xff] %v5507_v40 }
 0x379   :  { %v2309_v19 = vsub.f32 1.0, %v2153_v11  ;;  %v5505_v46 = vmul.f32 0.70710677, %v5486_v54  ;;  %v2158_v50 = vmul.f32 %v4039_v60, %v1898_v44  ;;  %vm2210_vm12 = vcmp.lt.f32.partialorder %v5295_v62, 0.0 }
 0x37a   :  { %6507 = vst [vmem:[#allocation27_spill] sm:$0xff] %v5502_v33  ;;  %v1691_v58 = vmul.f32 %v5454_v47, %v1639_v1  ;;  %v1276_v13 = vmul.f32 0.3275911, %v5497_v61  ;;  %v5513_v43 = vmul.f32 0.70710677, %v5490_v23  ;;  %v2360_v53 = vsel %vm2204_vm9, %v3295_v31, %v2308_v3 }
 0x37b   :  { %v2363_v35 = vsel %vm2207_vm10, %v3298_v27, %v2311_v20  ;;  %v2082_v28 = vmul.f32 1.442695, %v2003_v10  ;;  %v5520_v48 = vand.u32 2147483647, %v5505_v46  ;;  %v5522_v29 = vpop.eup %4040  ;;  %v1844_v11 = vadd.f32 0.2548296, %v1792_v15  ;;  %v551_v10 = vpop.permute.xlu0 %550 }
 0x37c   :  { %v2001_v44 = vmul.f32 %v1949_v37, %v5431_v22  ;;  %v1328_v16 = vadd.f32 1.0, %v1276_v13  ;;  %v5526_v60 = vand.u32 2147483647, %v5513_v43  ;;  %v4043_v1 = vpop.eup %4042  ;;  %v2361_v36 = vsel %vm2205_vm11, %v3296_v52, %v2309_v19 }
 0x37d   :  { %v1481_v26 = vmul.f32 1.0614054, %v5522_v29  ;;  %v1954_v31 = vsub.f32 0.0, %v5445_v6  ;;  %v1279_v3 = vmul.f32 0.3275911, %v5520_v48  ;;  %v3301_v27 = vadd.f32 -1.0, %v2158_v50 }
 0x37e   :  { %v2314_v20 = vsub.f32 1.0, %v2158_v50  ;;  %v1743_v15 = vadd.f32 -0.28449672, %v1691_v58  ;;  %4046 = vrcp.f32 %v1328_v16  ;;  %v1277_v40 = vmul.f32 0.3275911, %v5526_v60  ;;  %v5542_v16 = vpop.f32.mrb[59].mxu0 }
 0x37f   :  { %v5533_v22 = vpop.eup %4044  ;;  %v1533_v37 = vadd.f32 -1.4531521, %v1481_v26  ;;  %v1331_v13 = vadd.f32 1.0, %v1279_v3  ;;  %v5537_v9 = vadd.f32 %v5007_v49, %v551_v10  ;;  %v2412_v52 = vadd.f32 1.0, %v2360_v53  ;;  %6509 = vst [vmem:[#allocation28_spill] sm:$0xff] %v5542_v16 }
 0x380   :  { %v1896_v19 = vmul.f32 %v5396_v7, %v1844_v11  ;;  %4048 = vpow2.f32 %v2082_v28  ;;  %v1486_v8 = vmul.f32 1.0614054, %v5533_v22  ;;  %v2415_v33 = vadd.f32 1.0, %v2363_v35 }
 0x381   :  { %v1585_v50 = vmul.f32 %v5522_v29, %v1533_v37  ;;  %4050 = vrcp.f32 %v1331_v13  ;;  %v1329_v58 = vadd.f32 1.0, %v1277_v40  ;;  %v2413_v26 = vadd.f32 1.0, %v2361_v36 }
 0x382   :  { %v2078_v3 = vmul.f32 1.442695, %v2001_v44  ;;  %v1538_v12 = vadd.f32 -1.4531521, %v1486_v8  ;;  %v2006_v2 = vmul.f32 %v1954_v31, %v5445_v6  ;;  %v2366_v49 = vsel %vm2210_vm12, %v3301_v27, %v2314_v20 }
 0x383   :  { %vm2208_vm13 = vcmp.lt.f32.partialorder %v5323_v4, 0.0  ;;  %v1795_v7 = vmul.f32 %v5454_v47, %v1743_v15  ;;  %v1637_v53 = vadd.f32 1.4214138, %v1585_v50  ;;  %v5550_v35 = vmul.f32 0.70710677, %v5537_v9 }
 0x384   :  { %v2156_v28 = vmul.f32 %v4043_v1, %v1896_v19  ;;  %v5553_v40 = vmul.f32 0.5, %v5419_v38  ;;  %v1590_v11 = vmul.f32 %v5533_v22, %v1538_v12  ;;  %4052 = vrcp.f32 %v1329_v58  ;;  %v5570_v12 = vpop.permute.xlu1 %545 }
 0x385   :  { %v5557_v6 = vmul.f32 %v2412_v52, %v5341_v30  ;;  %v1689_v62 = vmul.f32 %v5522_v29, %v1637_v53  ;;  %v5561_v8 = vand.u32 2147483647, %v5550_v35  ;;  %v5565_v44 = vadd.f32 %v5011_v34, %v5492_v59 }
 0x386   :  { %v5568_v1 = vmul.f32 %v2415_v33, %v5353_v56  ;;  %v2418_v38 = vadd.f32 1.0, %v2366_v49  ;;  %v1642_v36 = vadd.f32 1.4214138, %v1590_v11  ;;  %v2088_v31 = vmul.f32 1.442695, %v2006_v2 }
 0x387   :  { %6510 = vst [vmem:[#allocation46_spill] sm:$0xff] %v5557_v6  ;;  %v5573_v30 = vmul.f32 %v2413_v26, %v5372_v63  ;;  %v1847_v10 = vadd.f32 0.2548296, %v1795_v7  ;;  %4054 = vpow2.f32 %v2078_v3  ;;  %v1282_v27 = vmul.f32 0.3275911, %v5561_v8 }
 0x388   :  { %6511 = vst [vmem:[#allocation47_spill] sm:$0xff] %v5568_v1  ;;  %v5576_v20 = vpop.eup %4046  ;;  %v3299_v15 = vadd.f32 -1.0, %v2156_v28  ;;  %v2312_v34 = vsub.f32 1.0, %v2156_v28  ;;  %v1952_v59 = vsub.f32 0.0, %v5497_v61  ;;  %v5580_v56 = vmul.f32 0.70710677, %v5565_v44  ;;  %v556_v28 = vpop.permute.xlu1 %555 }
 0x389   :  { %6512 = vst [vmem:[#allocation48_spill] sm:$0xff] %v5573_v30  ;;  %v1741_v33 = vadd.f32 -0.28449672, %v1689_v62  ;;  %v5583_v2 = vmul.f32 0.5, %v5461_v25  ;;  %v1484_v63 = vmul.f32 1.0614054, %v5576_v20  ;;  %v5587_v52 = vmul.f32 %v2418_v38, %v5392_v41 }
 0x38a   :  { %v1334_v37 = vadd.f32 1.0, %v1282_v27  ;;  %v4049_v13 = vpop.eup %4048  ;;  %v1694_v19 = vmul.f32 %v5533_v22, %v1642_v36  ;;  %4056 = vpow2.f32 %v2088_v31  ;;  %v5591_v50 = vand.u32 2147483647, %v5580_v56  ;;  %v6515_v31 = vld [vmem:[#allocation37_spill] sm:$0xff] }
 0x38b   :  { %6513 = vst [vmem:[#allocation49_spill] sm:$0xff] %v5587_v52  ;;  %v5593_v58 = vpop.eup %4050  ;;  %v1899_v26 = vmul.f32 %v5454_v47, %v1847_v10  ;;  %v1536_v3 = vadd.f32 -1.4531521, %v1484_v63  ;;  %v5597_v25 = vmul.f32 0.5, %v5486_v54  ;;  %v2364_v49 = vsel %vm2208_vm13, %v3299_v15, %v2312_v34 }
 0x38c   :  { %4058 = vrcp.f32 %v1334_v37  ;;  %v2004_v41 = vmul.f32 %v1952_v59, %v5497_v61  ;;  %v1487_v7 = vmul.f32 1.0614054, %v5593_v58  ;;  %v1280_v53 = vmul.f32 0.3275911, %v5591_v50 }
 0x38d   :  { %v1793_v11 = vmul.f32 %v5522_v29, %v1741_v33  ;;  %v1588_v62 = vmul.f32 %v5576_v20, %v1536_v3  ;;  %v1955_v47 = vsub.f32 0.0, %v5520_v48  ;;  %v5608_v54 = vmul.f32 0.5, %v5490_v23 }
 0x38e   :  { %v5610_v38 = vpop.eup %4052  ;;  %vm2211_vm14 = vcmp.lt.f32.partialorder %v5378_v0, 0.0  ;;  %v1746_v4 = vadd.f32 -0.28449672, %v1694_v19  ;;  %v1539_v61 = vadd.f32 -1.4531521, %v1487_v7  ;;  %v1332_v36 = vadd.f32 1.0, %v1280_v53 }
 0x38f   :  { %6514 = vst [vmem:[#allocation50_spill] sm:$0xff] %v5608_v54  ;;  %v5614_v10 = vadd.f32 %v6515_v31, %v556_v28  ;;  %v2416_v27 = vadd.f32 1.0, %v2364_v49  ;;  %v2159_v15 = vmul.f32 %v4049_v13, %v1899_v26  ;;  %v1640_v34 = vadd.f32 1.4214138, %v1588_v62 }
 0x390   :  { %v1485_v59 = vmul.f32 1.0614054, %v5610_v38  ;;  %v2084_v33 = vmul.f32 1.442695, %v2004_v41  ;;  %v1591_v63 = vmul.f32 %v5593_v58, %v1539_v61  ;;  %v1953_v23 = vsub.f32 0.0, %v5526_v60 }
 0x391   :  { %4060 = vrcp.f32 %v1332_v36  ;;  %v4055_v37 = vpop.eup %4054  ;;  %v1692_v3 = vmul.f32 %v5576_v20, %v1640_v34  ;;  %v2007_v19 = vmul.f32 %v1955_v47, %v5520_v48  ;;  %v1958_v53 = vsub.f32 0.0, %v5561_v8 }
 0x392   :  { %v1537_v7 = vadd.f32 -1.4531521, %v1485_v59  ;;  %v1845_v28 = vadd.f32 0.2548296, %v1793_v11  ;;  %v1798_v13 = vmul.f32 %v5533_v22, %v1746_v4  ;;  %v1643_v26 = vadd.f32 1.4214138, %v1591_v63 }
 0x393   :  { %v5624_v49 = vmul.f32 0.70710677, %v5614_v10  ;;  %v3302_v41 = vadd.f32 -1.0, %v2159_v15  ;;  %v2315_v62 = vsub.f32 1.0, %v2159_v15  ;;  %v1744_v61 = vadd.f32 -0.28449672, %v1692_v3 }
 0x394   :  { %v1589_v36 = vmul.f32 %v5610_v38, %v1537_v7  ;;  %v4057_v31 = vpop.eup %4056  ;;  %v5628_v34 = vmul.f32 %v2416_v27, %v5436_v5  ;;  %4062 = vpow2.f32 %v2084_v33  ;;  %v1695_v48 = vmul.f32 %v5593_v58, %v1643_v26 }
 0x395   :  { %v2005_v11 = vmul.f32 %v1953_v23, %v5526_v60  ;;  %v1796_v4 = vmul.f32 %v5576_v20, %v1744_v61  ;;  %v2010_v63 = vmul.f32 %v1958_v53, %v5561_v8  ;;  %v1231_v15 = vand.u32 2147483647, %v5624_v49  ;;  %v6517_v53 = vld [vmem:[#allocation38_spill] sm:$0xff] }
 0x396   :  { %6516 = vst [vmem:[#allocation37_spill] sm:$0xff] %v5628_v34  ;;  %v5632_v47 = vpop.eup %4058  ;;  %v1641_v59 = vadd.f32 1.4214138, %v1589_v36  ;;  %v1897_v3 = vmul.f32 %v5522_v29, %v1845_v28  ;;  %v1850_v7 = vadd.f32 0.2548296, %v1798_v13  ;;  %v2367_v27 = vsel %vm2211_vm14, %v3302_v41, %v2315_v62 }
 0x397   :  { %v2090_v52 = vmul.f32 1.442695, %v2007_v19  ;;  %v1490_v5 = vmul.f32 1.0614054, %v5632_v47  ;;  %v1747_v33 = vadd.f32 -0.28449672, %v1695_v48  ;;  %v5647_v36 = vadd.f32 %v6517_v53, %v5570_v12 }
 0x398   :  { %v5642_v60 = vmul.f32 0.5, %v5537_v9  ;;  %v1283_v23 = vmul.f32 0.3275911, %v1231_v15  ;;  %v1693_v26 = vmul.f32 %v5610_v38, %v1641_v59  ;;  %v2086_v61 = vmul.f32 1.442695, %v2005_v11  ;;  %v5655_v11 = vpop.permute.xlu0 %560 }
 0x399   :  { %v1542_v8 = vadd.f32 -1.4531521, %v1490_v5  ;;  %vm2209_vm15 = vcmp.lt.f32.partialorder %v5426_v18, 0.0  ;;  %v1848_v29 = vadd.f32 0.2548296, %v1796_v4  ;;  %v1956_v0 = vsub.f32 0.0, %v5591_v50 }
 0x39a   :  { %v2096_v19 = vmul.f32 1.442695, %v2010_v63  ;;  %v1335_v28 = vadd.f32 1.0, %v1283_v23  ;;  %v2419_v9 = vadd.f32 1.0, %v2367_v27  ;;  %v2157_v41 = vmul.f32 %v4055_v37, %v1897_v3 }
 0x39b   :  { %v5651_v13 = vpop.eup %4060  ;;  %v1902_v62 = vmul.f32 %v5533_v22, %v1850_v7  ;;  %v1594_v48 = vmul.f32 %v5632_v47, %v1542_v8  ;;  %v1799_v12 = vmul.f32 %v5593_v58, %v1747_v33  ;;  %v1959_v4 = vsub.f32 0.0, %v1231_v15 }
 0x39c   :  { %v1488_v59 = vmul.f32 1.0614054, %v5651_v13  ;;  %4064 = vrcp.f32 %v1335_v28  ;;  %v1745_v63 = vadd.f32 -0.28449672, %v1693_v26  ;;  %v5660_v23 = vmul.f32 0.70710677, %v5647_v36 }
 0x39d   :  { %4066 = vpow2.f32 %v2090_v52  ;;  %v1646_v5 = vadd.f32 1.4214138, %v1594_v48  ;;  %v1900_v37 = vmul.f32 %v5576_v20, %v1848_v29  ;;  %v2008_v3 = vmul.f32 %v1956_v0, %v5591_v50  ;;  %v3906_v20 = vld [vmem:[%s6394_s4 + $0x4] ss:$16 sps:$4 sm:$0xff]   ;;  %v571_v0 = vpop.permute.xlu0 %570 }
 0x39e   :  { %4068 = vpow2.f32 %v2096_v19  ;;  %v1540_v22 = vadd.f32 -1.4531521, %v1488_v59  ;;  %v4063_v7 = vpop.eup %4062  ;;  %v3300_v27 = vadd.f32 -1.0, %v2157_v41  ;;  %v2313_v8 = vsub.f32 1.0, %v2157_v41  ;;  %2617 = vmatprep.mubr.bf16.mxu1 %v3906_v20  ;;  %v566_v20 = vpop.permute.xlu1 %565 }
 0x39f   :  { %v1698_v33 = vmul.f32 %v5632_v47, %v1646_v5  ;;  %v1229_v53 = vand.u32 2147483647, %v5660_v23  ;;  %v2162_v28 = vmul.f32 %v4057_v31, %v1902_v62  ;;  %v1851_v52 = vadd.f32 0.2548296, %v1799_v12 }
 0x3a0   :  { %v1592_v26 = vmul.f32 %v5651_v13, %v1540_v22  ;;  %v2011_v48 = vmul.f32 %v1959_v4, %v1231_v15  ;;  %vm2214_vm1 = vcmp.lt.f32.partialorder %v5439_v17, 0.0  ;;  %v1797_v50 = vmul.f32 %v5610_v38, %v1745_v63  ;;  %v6519_v4 = vld [vmem:[#allocation40_spill] sm:$0xff] }
 0x3a1   :  { %4070 = vpow2.f32 %v2086_v61  ;;  %v1750_v29 = vadd.f32 -0.28449672, %v1698_v33  ;;  %v5673_v19 = vmul.f32 0.5, %v5565_v44  ;;  %v2160_v41 = vmul.f32 %v4063_v7, %v1900_v37 }
 0x3a2   :  { %vm2212_vm2 = vcmp.lt.f32.partialorder %v5482_v42, 0.0  ;;  %v1644_v31 = vadd.f32 1.4214138, %v1592_v26  ;;  %v2092_v62 = vmul.f32 1.442695, %v2008_v3  ;;  %v5677_v12 = vmul.f32 %v2419_v9, %v5469_v51 }
 0x3a3   :  { %v1281_v15 = vmul.f32 0.3275911, %v1229_v53  ;;  %v2365_v59 = vsel %vm2209_vm15, %v3300_v27, %v2313_v8  ;;  %v1802_v61 = vmul.f32 %v5632_v47, %v1750_v29  ;;  %v5683_v63 = vadd.f32 %v6519_v4, %v571_v0 }
 0x3a4   :  { %6518 = vst [vmem:[#allocation38_spill] sm:$0xff] %v5677_v12  ;;  %v3305_v44 = vadd.f32 -1.0, %v2162_v28  ;;  %v1903_v5 = vmul.f32 %v5593_v58, %v1851_v52  ;;  %v1696_v37 = vmul.f32 %v5651_v13, %v1644_v31  ;;  %v2098_v22 = vmul.f32 1.442695, %v2011_v48 }
 0x3a5   :  { %v2318_v3 = vsub.f32 1.0, %v2162_v28  ;;  %v1849_v7 = vadd.f32 0.2548296, %v1797_v50  ;;  %v1854_v33 = vadd.f32 0.2548296, %v1802_v61  ;;  %v1333_v26 = vadd.f32 1.0, %v1281_v15 }
 0x3a6   :  { %v5687_v51 = vpop.eup %4064  ;;  %v3303_v9 = vadd.f32 -1.0, %v2160_v41  ;;  %v1748_v18 = vadd.f32 -0.28449672, %v1696_v37  ;;  %4072 = vpow2.f32 %v2092_v62  ;;  %v5690_v27 = vmul.f32 0.70710677, %v5683_v63 }
 0x3a7   :  { %v4067_v8 = vpop.eup %4066  ;;  %v2316_v29 = vsub.f32 1.0, %v2160_v41  ;;  %v1906_v58 = vmul.f32 %v5632_v47, %v1854_v33  ;;  %v1491_v52 = vmul.f32 1.0614054, %v5687_v51  ;;  %4074 = vrcp.f32 %v1333_v26  ;;  %v6520_v47 = vld [vmem:[#allocation41_spill] sm:$0xff] }
 0x3a8   :  { %v4069_v28 = vpop.eup %4068  ;;  %v2163_v48 = vmul.f32 %v4067_v8, %v1903_v5  ;;  %vm2215_vm3 = vcmp.lt.f32.partialorder %v5505_v46, 0.0  ;;  %v1800_v50 = vmul.f32 %v5651_v13, %v1748_v18  ;;  %v1957_v0 = vsub.f32 0.0, %v1229_v53 }
 0x3a9   :  { %v1234_v31 = vand.u32 2147483647, %v5690_v27  ;;  %v1901_v62 = vmul.f32 %v5610_v38, %v1849_v7  ;;  %v5699_v15 = vmul.f32 0.5, %v5614_v10  ;;  %v1543_v41 = vadd.f32 -1.4531521, %v1491_v52  ;;  %v576_v52 = vpop.permute.xlu1 %575 }
 0x3aa   :  { %v1030_v61 = vadd.f32 %v6520_v47, %v5655_v11  ;;  %v5703_v4 = vadd.f32 1.0, %v2365_v59  ;;  %v2370_v5 = vsel %vm2214_vm1, %v3305_v44, %v2318_v3  ;;  %v2166_v37 = vmul.f32 %v4069_v28, %v1906_v58  ;;  %v6521_v47 = vld [vmem:[#allocation22_spill] sm:$0xff] }
 0x3ab   :  { %vm2218_vm4 = vcmp.lt.f32.partialorder %v5550_v35, 0.0  ;;  %v1286_v33 = vmul.f32 0.3275911, %v1234_v31  ;;  %v4071_v26 = vpop.eup %4070  ;;  %v2368_v38 = vsel %vm2212_vm2, %v3303_v9, %v2316_v29  ;;  %v1852_v7 = vadd.f32 0.2548296, %v1800_v50  ;;  %v6522_v9 = vld [vmem:[#allocation14_spill] sm:$0xff] }
 0x3ac   :  { %v1595_v10 = vmul.f32 %v5687_v51, %v1543_v41  ;;  %4076 = vpow2.f32 %v2098_v22  ;;  %v3306_v18 = vadd.f32 -1.0, %v2163_v48  ;;  %v2009_v8 = vmul.f32 %v1957_v0, %v1229_v53 }
 0x3ad   :  { %v1338_v11 = vadd.f32 1.0, %v1286_v33  ;;  %v5711_v59 = vmul.f32 0.70710677, %v1030_v61  ;;  %v2319_v17 = vsub.f32 1.0, %v2163_v48  ;;  %v5713_v44 = vmul.f32 %v4071_v26, %v1901_v62  ;;  %v5778_v6 = vpop.permute.xlu1 %585 }
 0x3ae   :  { %v1647_v3 = vadd.f32 1.4214138, %v1595_v10  ;;  %v1962_v58 = vsub.f32 0.0, %v1234_v31  ;;  %v3309_v28 = vadd.f32 -1.0, %v2166_v37  ;;  %v1041_v42 = vadd.f32 %v6521_v47, %v576_v52 }
 0x3af   :  { %4078 = vrcp.f32 %v1338_v11  ;;  %v5717_v29 = vadd.f32 %v6522_v9, %v566_v20  ;;  %v2322_v50 = vsub.f32 1.0, %v2166_v37  ;;  %v1904_v22 = vmul.f32 %v5651_v13, %v1852_v7  ;;  %v581_v20 = vpop.permute.xlu0 %580 }
 0x3b0   :  { %v1699_v53 = vmul.f32 %v5687_v51, %v1647_v3  ;;  %v5722_v0 = vand.u32 2147483647, %v5711_v59  ;;  %v4073_v48 = vpop.eup %4072  ;;  %v5724_v62 = vadd.f32 1.0, %v2370_v5  ;;  %v5726_v41 = vadd.f32 1.0, %v2368_v38 }
 0x3b1   :  { %v5729_v33 = vmul.f32 0.5, %v5647_v36  ;;  %v2094_v26 = vmul.f32 1.442695, %v2009_v8  ;;  %v5731_v10 = vpop.eup %4074  ;;  %v5735_v13 = vsel %vm2215_vm3, %v3306_v18, %v2319_v17  ;;  %v5738_v37 = vadd.f32 -1.0, %v5713_v44 }
 0x3b2   :  { %v1751_v7 = vadd.f32 -0.28449672, %v1699_v53  ;;  %v1284_v5 = vmul.f32 0.3275911, %v5722_v0  ;;  %v1489_v38 = vmul.f32 1.0614054, %v5731_v10  ;;  %v2014_v11 = vmul.f32 %v1962_v58, %v1234_v31 }
 0x3b3   :  { %v5742_v52 = vmul.f32 0.70710677, %v1041_v42  ;;  %v5745_v36 = vmul.f32 0.70710677, %v5717_v29  ;;  %v2374_v8 = vsel %vm2218_vm4, %v3309_v28, %v2322_v50  ;;  %v2164_v46 = vmul.f32 %v4073_v48, %v1904_v22 }
 0x3b4   :  { %v1803_v18 = vmul.f32 %v5687_v51, %v1751_v7  ;;  %v1336_v17 = vadd.f32 1.0, %v1284_v5  ;;  %vm2219_vm5 = vcmp.lt.f32.partialorder %v5624_v49, 0.0  ;;  %v1541_v47 = vadd.f32 -1.4531521, %v1489_v38 }
 0x3b5   :  { %4080 = vpow2.f32 %v2094_v26  ;;  %v1235_v31 = vand.u32 2147483647, %v5742_v52  ;;  %vm2216_vm6 = vcmp.lt.f32.partialorder %v5580_v56, 0.0  ;;  %v5755_v53 = vmul.f32 0.5, %v5683_v63  ;;  %v591_v26 = vpop.permute.xlu0 %590 }
 0x3b6   :  { %v4077_v58 = vpop.eup %4076  ;;  %v1855_v9 = vadd.f32 0.2548296, %v1803_v18  ;;  %v5757_v35 = vmul.f32 0.5, %v1030_v61  ;;  %4082 = vrcp.f32 %v1336_v17  ;;  %v2426_v28 = vadd.f32 1.0, %v2374_v8  ;;  %v6523_v8 = vld [vmem:[#allocation17_spill] sm:$0xff] }
 0x3b7   :  { %v1593_v50 = vmul.f32 %v5731_v10, %v1541_v47  ;;  %v1287_v22 = vmul.f32 0.3275911, %v1235_v31  ;;  %v5761_v48 = vand.u32 2147483647, %v5745_v36  ;;  %v3307_v7 = vadd.f32 -1.0, %v2164_v46 }
 0x3b8   :  { %v1907_v5 = vmul.f32 %v5687_v51, %v1855_v9  ;;  %v2104_v38 = vmul.f32 1.442695, %v2014_v11  ;;  %v5764_v3 = vmul.f32 0.5, %v1041_v42  ;;  %v5770_v12 = vadd.f32 %v6523_v8, %v591_v26 }
 0x3b9   :  { %v5766_v18 = vpop.eup %4078  ;;  %v1645_v63 = vadd.f32 1.4214138, %v1593_v50  ;;  %v1339_v61 = vadd.f32 1.0, %v1287_v22  ;;  %v1285_v17 = vmul.f32 0.3275911, %v5761_v48  ;;  %v2320_v47 = vsub.f32 1.0, %v2164_v46 }
 0x3ba   :  { %v2167_v34 = vmul.f32 %v4077_v58, %v1907_v5  ;;  %v1494_v54 = vmul.f32 1.0614054, %v5766_v18  ;;  %v1960_v16 = vsub.f32 0.0, %v5722_v0  ;;  %v1963_v42 = vsub.f32 0.0, %v1235_v31  ;;  %v6524_v22 = vld [vmem:[#allocation24_spill] sm:$0xff] }
 0x3bb   :  { %v1697_v51 = vmul.f32 %v5731_v10, %v1645_v63  ;;  %4084 = vrcp.f32 %v1339_v61  ;;  %v1337_v11 = vadd.f32 1.0, %v1285_v17  ;;  %v5776_v30 = vadd.f32 %v6524_v22, %v581_v20  ;;  %v596_v22 = vpop.permute.xlu1 %595 }
 0x3bc   :  { %v3310_v9 = vadd.f32 -1.0, %v2167_v34  ;;  %v2323_v1 = vsub.f32 1.0, %v2167_v34  ;;  %v1546_v50 = vadd.f32 -1.4531521, %v1494_v54  ;;  %v5781_v46 = vmul.f32 %v2426_v28, %v5642_v60 }
 0x3bd   :  { %6525 = vst [vmem:[#allocation40_spill] sm:$0xff] %v5776_v30  ;;  %v1749_v58 = vadd.f32 -0.28449672, %v1697_v51  ;;  %4086 = vpow2.f32 %v2104_v38  ;;  %v5784_v26 = vmul.f32 0.70710677, %v5770_v12  ;;  %v5790_v54 = vmul.f32 0.5, %v5717_v29 }
 0x3be   :  { %6526 = vst [vmem:[#allocation41_spill] sm:$0xff] %v5781_v46  ;;  %v2375_v5 = vsel %vm2219_vm5, %v3310_v9, %v2323_v1  ;;  %v1598_v63 = vmul.f32 %v5766_v18, %v1546_v50  ;;  %4088 = vrcp.f32 %v1337_v11  ;;  %v2372_v20 = vsel %vm2216_vm6, %v3307_v7, %v2320_v47 }
 0x3bf   :  { %v4081_v34 = vpop.eup %4080  ;;  %v2427_v60 = vadd.f32 1.0, %v2375_v5  ;;  %v1801_v28 = vmul.f32 %v5731_v10, %v1749_v58  ;;  %v1238_v38 = vand.u32 2147483647, %v5784_v26  ;;  %vm2217_vm7 = vcmp.lt.f32.partialorder %v5660_v23, 0.0 }
 0x3c0   :  { %v5796_v61 = vpop.eup %4082  ;;  %v1650_v1 = vadd.f32 1.4214138, %v1598_v63  ;;  %v2012_v49 = vmul.f32 %v1960_v16, %v5722_v0  ;;  %v2015_v17 = vmul.f32 %v1963_v42, %v1235_v31  ;;  %v5801_v29 = vmul.f32 0.70710677, %v5776_v30  ;;  %v6528_v63 = vld [vmem:[#allocation18_spill] sm:$0xff] }
 0x3c1   :  { %v5804_v8 = vmul.f32 %v2427_v60, %v5699_v15  ;;  %v1853_v56 = vadd.f32 0.2548296, %v1801_v28  ;;  %v1492_v7 = vmul.f32 1.0614054, %v5796_v61  ;;  %v1290_v47 = vmul.f32 0.3275911, %v1238_v38 }
 0x3c2   :  { %6527 = vst [vmem:[#allocation22_spill] sm:$0xff] %v5801_v29  ;;  %v2424_v51 = vadd.f32 1.0, %v2372_v20  ;;  %v1702_v11 = vmul.f32 %v5766_v18, %v1650_v1  ;;  %v1961_v9 = vsub.f32 0.0, %v5761_v48  ;;  %v1236_v50 = vand.u32 2147483647, %v5801_v29 }
 0x3c3   :  { %v1905_v0 = vmul.f32 %v5731_v10, %v1853_v56  ;;  %v1544_v31 = vadd.f32 -1.4531521, %v1492_v7  ;;  %v1342_v15 = vadd.f32 1.0, %v1290_v47  ;;  %v2100_v58 = vmul.f32 1.442695, %v2012_v49 }
 0x3c4   :  { %v1754_v42 = vadd.f32 -0.28449672, %v1702_v11  ;;  %v1288_v5 = vmul.f32 0.3275911, %v1236_v50  ;;  %v5814_v60 = vadd.f32 %v6528_v63, %v596_v22  ;;  %v2106_v29 = vmul.f32 1.442695, %v2015_v17 }
 0x3c5   :  { %v5816_v20 = vpop.eup %4084  ;;  %v2165_v28 = vmul.f32 %v4081_v34, %v1905_v0  ;;  %v1596_v1 = vmul.f32 %v5796_v61, %v1544_v31  ;;  %4090 = vrcp.f32 %v1342_v15  ;;  %v2013_v10 = vmul.f32 %v1961_v9, %v5761_v48 }
 0x3c6   :  { %v1806_v30 = vmul.f32 %v5766_v18, %v1754_v42  ;;  %v1495_v16 = vmul.f32 1.0614054, %v5816_v20  ;;  %v1340_v56 = vadd.f32 1.0, %v1288_v5  ;;  %v1966_v22 = vsub.f32 0.0, %v1238_v38 }
 0x3c7   :  { %v4087_v7 = vpop.eup %4086  ;;  %v3308_v49 = vadd.f32 -1.0, %v2165_v28  ;;  %v2321_v47 = vsub.f32 1.0, %v2165_v28  ;;  %v1648_v11 = vadd.f32 1.4214138, %v1596_v1  ;;  %4092 = vpow2.f32 %v2100_v58 }
 0x3c8   :  { %v5822_v63 = vpop.eup %4088  ;;  %v1858_v46 = vadd.f32 0.2548296, %v1806_v30  ;;  %v1547_v34 = vadd.f32 -1.4531521, %v1495_v16  ;;  %v5825_v17 = vmul.f32 0.70710677, %v5814_v60  ;;  %4094 = vrcp.f32 %v1340_v56 }
 0x3c9   :  { %v2373_v0 = vsel %vm2217_vm7, %v3308_v49, %v2321_v47  ;;  %v1700_v31 = vmul.f32 %v5796_v61, %v1648_v11  ;;  %v1493_v48 = vmul.f32 1.0614054, %v5822_v63  ;;  %v2102_v5 = vmul.f32 1.442695, %v2013_v10 }
 0x3ca   :  { %v2425_v9 = vadd.f32 1.0, %v2373_v0  ;;  %v1910_v15 = vmul.f32 %v5766_v18, %v1858_v46  ;;  %v1599_v42 = vmul.f32 %v5816_v20, %v1547_v34  ;;  %v5834_v30 = vmul.f32 %v2424_v51, %v5673_v19  ;;  %v6529_v34 = vld [vmem:[#allocation26_spill] sm:$0xff] }
 0x3cb   :  { %v1752_v16 = vadd.f32 -0.28449672, %v1700_v31  ;;  %v1545_v58 = vadd.f32 -1.4531521, %v1493_v48  ;;  %v1239_v28 = vand.u32 2147483647, %v5825_v17  ;;  %v2018_v49 = vmul.f32 %v1966_v22, %v1238_v38 }
 0x3cc   :  { %v5838_v23 = vmul.f32 %v2425_v9, %v5729_v33  ;;  %v1651_v1 = vadd.f32 1.4214138, %v1599_v42  ;;  %v1964_v47 = vsub.f32 0.0, %v1236_v50  ;;  %vm2222_vm8 = vcmp.lt.f32.partialorder %v5690_v27, 0.0 }
 0x3cd   :  { %v1804_v18 = vmul.f32 %v5796_v61, %v1752_v16  ;;  %4096 = vpow2.f32 %v2106_v29  ;;  %v1597_v46 = vmul.f32 %v5822_v63, %v1545_v58  ;;  %v1291_v10 = vmul.f32 0.3275911, %v1239_v28 }
 0x3ce   :  { %v2170_v51 = vmul.f32 %v4087_v7, %v1910_v15  ;;  %v1703_v56 = vmul.f32 %v5816_v20, %v1651_v1  ;;  %4098 = vpow2.f32 %v2102_v5  ;;  %v5850_v0 = vadd.f32 %v6529_v34, %v5778_v6 }
 0x3cf   :  { %v5846_v33 = vpop.eup %4090  ;;  %v1856_v11 = vadd.f32 0.2548296, %v1804_v18  ;;  %v1649_v38 = vadd.f32 1.4214138, %v1597_v46  ;;  %v1343_v22 = vadd.f32 1.0, %v1291_v10  ;;  %v2016_v9 = vmul.f32 %v1964_v47, %v1236_v50 }
 0x3d0   :  { %v1755_v29 = vadd.f32 -0.28449672, %v1703_v56  ;;  %v1498_v31 = vmul.f32 1.0614054, %v5846_v33  ;;  %v2112_v48 = vmul.f32 1.442695, %v2018_v49  ;;  %v5865_v56 = vpop.permute.xlu0 %600 }
 0x3d1   :  { %v1908_v42 = vmul.f32 %v5796_v61, %v1856_v11  ;;  %v1701_v7 = vmul.f32 %v5822_v63, %v1649_v38  ;;  %4100 = vrcp.f32 %v1343_v22  ;;  %v1967_v15 = vsub.f32 0.0, %v1239_v28  ;;  %v4093_v5 = vpop.eup %4092 }
 0x3d2   :  { %v3313_v16 = vadd.f32 -1.0, %v2170_v51  ;;  %v2326_v58 = vsub.f32 1.0, %v2170_v51  ;;  %vm2220_vm9 = vcmp.lt.f32.partialorder %v5711_v59, 0.0  ;;  %v1807_v1 = vmul.f32 %v5816_v20, %v1755_v29  ;;  %v5857_v18 = vpop.eup %4094 }
 0x3d3   :  { %v1550_v6 = vadd.f32 -1.4531521, %v1498_v31  ;;  %v2168_v46 = vmul.f32 %v4093_v5, %v1908_v42  ;;  %vm2223_vm10 = vcmp.lt.f32.partialorder %v5742_v52, 0.0  ;;  %v1753_v50 = vadd.f32 -0.28449672, %v1701_v7 }
 0x3d4   :  { %v5861_v61 = vmul.f32 0.70710677, %v5850_v0  ;;  %v1859_v49 = vadd.f32 0.2548296, %v1807_v1  ;;  %v1496_v10 = vmul.f32 1.0614054, %v5857_v18  ;;  %4102 = vpow2.f32 %v2112_v48  ;;  %v611_v19 = vpop.permute.xlu0 %610 }
 0x3d5   :  { %v1602_v47 = vmul.f32 %v5846_v33, %v1550_v6  ;;  %v2108_v51 = vmul.f32 1.442695, %v2016_v9  ;;  %v1805_v11 = vmul.f32 %v5822_v63, %v1753_v50  ;;  %v2019_v38 = vmul.f32 %v1967_v15, %v1239_v28 }
 0x3d6   :  { %v5869_v22 = vand.u32 2147483647, %v5861_v61  ;;  %v2378_v34 = vsel %vm2222_vm8, %v3313_v16, %v2326_v58  ;;  %v1911_v29 = vmul.f32 %v5816_v20, %v1859_v49  ;;  %vm2221_vm11 = vcmp.lt.f32.partialorder %v5745_v36, 0.0 }
 0x3d7   :  { %v1654_v31 = vadd.f32 1.4214138, %v1602_v47  ;;  %v1548_v42 = vadd.f32 -1.4531521, %v1496_v10  ;;  %v4097_v7 = vpop.eup %4096  ;;  %v3311_v9 = vadd.f32 -1.0, %v2168_v46  ;;  %v2324_v5 = vsub.f32 1.0, %v2168_v46 }
 0x3d8   :  { %v1857_v1 = vadd.f32 0.2548296, %v1805_v11  ;;  %v1289_v6 = vmul.f32 0.3275911, %v5869_v22  ;;  %v4099_v48 = vpop.eup %4098  ;;  %v2171_v28 = vmul.f32 %v4097_v7, %v1911_v29  ;;  %4104 = vpow2.f32 %v2108_v51 }
 0x3d9   :  { %v1706_v15 = vmul.f32 %v5846_v33, %v1654_v31  ;;  %v1600_v50 = vmul.f32 %v5857_v18, %v1548_v42  ;;  %v2430_v27 = vadd.f32 1.0, %v2378_v34  ;;  %v2510_v58 = vpack.c.bf16 %v5475_v55, %v5422_v14  ;;  %v6530_v55 = vld [vmem:[#allocation32_spill] sm:$0xff]  ;;  %v6531_v34 = vld [vmem:[#allocation31_spill] sm:$0xff] }
 0x3da   :  { %v1909_v20 = vmul.f32 %v5822_v63, %v1857_v1  ;;  %v1341_v16 = vadd.f32 1.0, %v1289_v6  ;;  %v3314_v49 = vadd.f32 -1.0, %v2171_v28  ;;  %v2327_v47 = vsub.f32 1.0, %v2171_v28 }
 0x3db   :  { %v1758_v46 = vadd.f32 -0.28449672, %v1706_v15  ;;  %v2114_v10 = vmul.f32 1.442695, %v2019_v38  ;;  %v5881_v11 = vpop.eup %4100  ;;  %v2376_v29 = vsel %vm2220_vm9, %v3311_v9, %v2324_v5  ;;  %v1652_v42 = vadd.f32 1.4214138, %v1600_v50  ;;  %3426 = vmatprep.subr.bf16.mxu1 %v2510_v58 }
 0x3dc   :  { %v2169_v31 = vmul.f32 %v4099_v48, %v1909_v20  ;;  %4106 = vrcp.f32 %v1341_v16  ;;  %v2379_v63 = vsel %vm2223_vm10, %v3314_v49, %v2327_v47  ;;  %v1499_v14 = vmul.f32 1.0614054, %v5881_v11  ;;  %v606_v16 = vpop.permute.xlu1 %605 }
 0x3dd   :  { %v1810_v51 = vmul.f32 %v5846_v33, %v1758_v46  ;;  %v6532_v38 = vpack.c.bf16 %v6530_v55, %v6531_v34  ;;  %v5893_v7 = vadd.f32 %v5367_v24, %v611_v19  ;;  %vm2213_vm12 = vcmp.lt.f32.partialorder %v5513_v43, 0.0  ;;  %v6534_v55 = vld [vmem:[#allocation29_spill] sm:$0xff] }
 0x3de   :  { %v2431_v59 = vadd.f32 1.0, %v2379_v63  ;;  %v3312_v9 = vadd.f32 -1.0, %v2169_v31  ;;  %v2325_v5 = vsub.f32 1.0, %v2169_v31  ;;  %v1704_v1 = vmul.f32 %v5857_v18, %v1652_v42  ;;  %v4103_v15 = vpop.eup %4102 }
 0x3df   :  { %3427 = vmatpush3.bf16.msra.mxu1 %v6532_v38  ;;  %v5898_v52 = vmul.f32 %v2430_v27, %v5755_v53  ;;  %v2428_v6 = vadd.f32 1.0, %v2376_v29  ;;  %v1862_v48 = vadd.f32 0.2548296, %v1810_v51  ;;  %v1551_v28 = vadd.f32 -1.4531521, %v1499_v14  ;;  %v6533_v14 = vld [vmem:[#allocation30_spill] sm:$0xff] }
 0x3e0   :  { %v5901_v50 = vmul.f32 %v2431_v59, %v5764_v3  ;;  %v2377_v24 = vsel %vm2221_vm11, %v3312_v9, %v2325_v5  ;;  %v1756_v19 = vadd.f32 -0.28449672, %v1704_v1  ;;  %v5906_v20 = vmul.f32 0.70710677, %v5893_v7  ;;  %v616_v9 = vpop.permute.xlu1 %615 }
 0x3e1   :  { %v2429_v58 = vadd.f32 1.0, %v2377_v24  ;;  %v1914_v49 = vmul.f32 %v5846_v33, %v1862_v48  ;;  %v1603_v53 = vmul.f32 %v5881_v11, %v1551_v28  ;;  %v2511_v27 = vpack.c.bf16 %v5448_v45, %v5347_v57 }
 0x3e2   :  { %v1808_v47 = vmul.f32 %v5857_v18, %v1756_v19  ;;  %v1965_v36 = vsub.f32 0.0, %v5869_v22  ;;  %v1242_v46 = vand.u32 2147483647, %v5906_v20  ;;  %v4105_v29 = vpop.eup %4104  ;;  %v5918_v31 = vmul.f32 %v2428_v6, %v5757_v35  ;;  %v5972_v19 = vpop.permute.xlu0 %620 }
 0x3e3   :  { %v5921_v33 = vmul.f32 %v2429_v58, %v5790_v54  ;;  %v1655_v42 = vadd.f32 1.4214138, %v1603_v53  ;;  %3428 = vmatprep.subr.bf16.mxu1 %v2511_v27  ;;  %v5925_v57 = vadd.f32 %v5403_v32, %v5865_v56  ;;  %v5929_v45 = vmul.f32 %v5703_v4, %v5472_v21  ;;  %v6537_v53 = vld [vmem:[#allocation40_spill] sm:$0xff] }
 0x3e4   :  { %v2174_v63 = vmul.f32 %v4103_v15, %v1914_v49  ;;  %4108 = vpow2.f32 %v2114_v10  ;;  %v1294_v51 = vmul.f32 0.3275911, %v1242_v46  ;;  %v6535_v35 = vpack.c.bf16 %v6533_v14, %v6534_v55 }
 0x3e5   :  { %v5936_v54 = vmul.f32 %v5724_v62, %v5553_v40  ;;  %v2423_v34 = vadd.f32 1.0, %v5735_v13  ;;  %v2520_v32 = vpack.c.bf16 %v5921_v33, %v5918_v31  ;;  %v1707_v56 = vmul.f32 %v5881_v11, %v1655_v42 }
 0x3e6   :  { %3429 = vmatpush3.bf16.msra.mxu1 %v6535_v35  ;;  %v5942_v21 = vpop.eup %4106  ;;  %v5946_v4 = vmul.f32 %v5726_v41, %v5583_v2  ;;  %v1860_v10 = vadd.f32 0.2548296, %v1808_v47  ;;  %v2017_v38 = vmul.f32 %v1965_v36, %v5869_v22  ;;  %v1346_v59 = vadd.f32 1.0, %v1294_v51 }
 0x3e7   :  { %v6536_v40 = vsub.f32 1.0, %v5713_v44  ;;  %v1759_v13 = vadd.f32 -0.28449672, %v1707_v56  ;;  %v1497_v5 = vmul.f32 1.0614054, %v5942_v21  ;;  %v3317_v6 = vadd.f32 -1.0, %v2174_v63 }
 0x3e8   :  { %v5956_v1 = vmul.f32 0.70710677, %v5925_v57  ;;  %v2330_v2 = vsub.f32 1.0, %v2174_v63  ;;  %4110 = vrcp.f32 %v1346_v59  ;;  %v5959_v41 = vadd.f32 %v5410_v39, %v616_v9  ;;  %v6541_v9 = vld [vmem:[#allocation48_spill] sm:$0xff] }
 0x3e9   :  { %v2369_v62 = vsel %vm2213_vm12, %v5738_v37, %v6536_v40  ;;  %v5962_v22 = vmul.f32 %v2423_v34, %v5597_v25  ;;  %v1811_v44 = vmul.f32 %v5881_v11, %v1759_v13  ;;  %v1549_v48 = vadd.f32 -1.4531521, %v1497_v5 }
 0x3ea   :  { %v5966_v43 = vand.u32 2147483647, %v5956_v1  ;;  %v5968_v37 = vadd.f32 1.0, %v2369_v62  ;;  %v1134_v28 = vmul.f32 0.5, %v5770_v12  ;;  %v1912_v15 = vmul.f32 %v5857_v18, %v1860_v10  ;;  %v6538_v12 = vld [vmem:[#allocation22_spill] sm:$0xff] }
 0x3eb   :  { %v2110_v24 = vmul.f32 1.442695, %v2017_v38  ;;  %vm2226_vm13 = vcmp.lt.f32.partialorder %v5784_v26, 0.0  ;;  %v1863_v39 = vadd.f32 0.2548296, %v1811_v44  ;;  %v1601_v25 = vmul.f32 %v5942_v21, %v1549_v48  ;;  %v6539_v26 = vld [vmem:[#allocation16_spill] sm:$0xff] }
 0x3ec   :  { %v1292_v58 = vmul.f32 0.3275911, %v5966_v43  ;;  %v2382_v49 = vsel %vm2226_vm13, %v3317_v6, %v2330_v2  ;;  %v5978_v27 = vmul.f32 0.5, %v6537_v53  ;;  %v1970_v47 = vsub.f32 0.0, %v1242_v46  ;;  %v6544_v53 = vld [vmem:[#allocation35_spill] sm:$0xff] }
 0x3ed   :  { %v5981_v36 = vmul.f32 0.70710677, %v5959_v41  ;;  %vm2224_vm14 = vcmp.lt.f32.partialorder %v6538_v12, 0.0  ;;  %v1915_v18 = vmul.f32 %v5881_v11, %v1863_v39  ;;  %v1653_v42 = vadd.f32 1.4214138, %v1601_v25 }
 0x3ee   :  { %v1344_v63 = vadd.f32 1.0, %v1292_v58  ;;  %v5986_v51 = vadd.f32 %v6539_v26, %v606_v16  ;;  %v4109_v14 = vpop.eup %4108  ;;  %v2172_v55 = vmul.f32 %v4105_v29, %v1912_v15  ;;  %v1135_v35 = vmul.f32 0.5, %v5814_v60  ;;  %v6540_v16 = vld [vmem:[#allocation46_spill] sm:$0xff]  ;;  %v631_v29 = vpop.permute.xlu0 %630  ;;  %v6542_v15 = vld [vmem:[#allocation20_spill] sm:$0xff] }
 0x3ef   :  { %4112 = vpow2.f32 %v2110_v24  ;;  %v5990_v34 = vand.u32 2147483647, %v5981_v36  ;;  %v2175_v56 = vmul.f32 %v4109_v14, %v1915_v18  ;;  %vm2227_vm15 = vcmp.lt.f32.partialorder %v5825_v17, 0.0 }
 0x3f0   :  { %v1705_v10 = vmul.f32 %v5942_v21, %v1653_v42  ;;  %4114 = vrcp.f32 %v1344_v63  ;;  %v2434_v11 = vadd.f32 1.0, %v2382_v49  ;;  %v2022_v38 = vmul.f32 %v1970_v47, %v1242_v46  ;;  %v6543_v49 = vld [vmem:[#allocation36_spill] sm:$0xff] }
 0x3f1   :  { %v1295_v59 = vmul.f32 0.3275911, %v5990_v34  ;;  %v2512_v40 = vpack.c.bf16 %v6541_v9, %v6540_v16  ;;  %v3318_v62 = vadd.f32 -1.0, %v2175_v56  ;;  %v2331_v60 = vsub.f32 1.0, %v2175_v56  ;;  %v6547_v56 = vld [vmem:[#allocation47_spill] sm:$0xff] }
 0x3f2   :  { %v1757_v13 = vadd.f32 -0.28449672, %v1705_v10  ;;  %v5998_v5 = vmul.f32 0.70710677, %v5986_v51  ;;  %v6000_v6 = vpop.eup %4110  ;;  %v3315_v2 = vadd.f32 -1.0, %v2172_v55  ;;  %v2328_v44 = vsub.f32 1.0, %v2172_v55 }
 0x3f3   :  { %v1347_v48 = vadd.f32 1.0, %v1295_v59  ;;  %3430 = vmatprep.subr.bf16.mxu1 %v2512_v40  ;;  %v6003_v46 = vadd.f32 %v6542_v15, %v631_v29  ;;  %v2383_v24 = vsel %vm2227_vm15, %v3318_v62, %v2331_v60  ;;  %v1502_v25 = vmul.f32 1.0614054, %v6000_v6  ;;  %v6546_v55 = vld [vmem:[#allocation27_spill] sm:$0xff] }
 0x3f4   :  { %v1809_v39 = vmul.f32 %v5942_v21, %v1757_v13  ;;  %v6010_v58 = vand.u32 2147483647, %v5998_v5  ;;  %v6545_v47 = vpack.c.bf16 %v6543_v49, %v6544_v53  ;;  %v2435_v18 = vadd.f32 1.0, %v2383_v24 }
 0x3f5   :  { %v1133_v42 = vmul.f32 0.5, %v5850_v0  ;;  %v1968_v63 = vsub.f32 0.0, %v5966_v43  ;;  %4116 = vrcp.f32 %v1347_v48  ;;  %v1554_v17 = vadd.f32 -1.4531521, %v1502_v25  ;;  %v626_v48 = vpop.permute.xlu1 %625 }
 0x3f6   :  { %3431 = vmatpush3.bf16.msra.mxu1 %v6545_v47  ;;  %v1861_v26 = vadd.f32 0.2548296, %v1809_v39  ;;  %v1293_v14 = vmul.f32 0.3275911, %v6010_v58  ;;  %v2513_v10 = vpack.c.bf16 %v6547_v56, %v6546_v55  ;;  %v6020_v59 = vmul.f32 %v2434_v11, %v1134_v28  ;;  %v6548_v11 = vld [vmem:[#allocation19_spill] sm:$0xff] }
 0x3f7   :  { %v2380_v16 = vsel %vm2224_vm14, %v3315_v2, %v2328_v44  ;;  %v6024_v9 = vmul.f32 %v2435_v18, %v1135_v35  ;;  %v2120_v40 = vmul.f32 1.442695, %v2022_v38  ;;  %v1606_v29 = vmul.f32 %v6000_v6, %v1554_v17  ;;  %v6550_v2 = vld [vmem:[#allocation33_spill] sm:$0xff] }
 0x3f8   :  { %v1913_v0 = vmul.f32 %v5942_v21, %v1861_v26  ;;  %v1345_v62 = vadd.f32 1.0, %v1293_v14  ;;  %v6029_v60 = vmul.f32 0.70710677, %v6003_v46  ;;  %3432 = vmatprep.subr.bf16.mxu1 %v2513_v10  ;;  %v2020_v12 = vmul.f32 %v1968_v63, %v5966_v43  ;;  %v6549_v21 = vld [vmem:[#allocation34_spill] sm:$0xff] }
 0x3f9   :  { %v4113_v13 = vpop.eup %4112  ;;  %v1971_v35 = vsub.f32 0.0, %v5990_v34  ;;  %v6037_v38 = vadd.f32 %v6548_v11, %v5972_v19  ;;  %v6551_v44 = vpack.c.bf16 %v6549_v21, %v6550_v2  ;;  %v1658_v39 = vadd.f32 1.4214138, %v1606_v29 }
 0x3fa   :  { %v6042_v15 = vpop.eup %4114  ;;  %v2173_v24 = vmul.f32 %v4113_v13, %v1913_v0  ;;  %4118 = vrcp.f32 %v1345_v62  ;;  %v6045_v25 = vand.u32 2147483647, %v6029_v60  ;;  %v2432_v49 = vadd.f32 1.0, %v2380_v16 }
 0x3fb   :  { %3433 = vmatpush3.bf16.msra.mxu1 %v6551_v44  ;;  %vm2225_vm1 = vcmp.lt.f32.partialorder %v5861_v61, 0.0  ;;  %4120 = vpow2.f32 %v2120_v40  ;;  %v1500_v43 = vmul.f32 1.0614054, %v6042_v15  ;;  %v1710_v47 = vmul.f32 %v6000_v6, %v1658_v39  ;;  %v636_v40 = vpop.permute.xlu1 %635 }
 0x3fc   :  { %v3316_v19 = vadd.f32 -1.0, %v2173_v24  ;;  %v2329_v53 = vsub.f32 1.0, %v2173_v24  ;;  %v1298_v18 = vmul.f32 0.3275911, %v6045_v25  ;;  %v2116_v26 = vmul.f32 1.442695, %v2020_v12 }
 0x3fd   :  { %v1552_v63 = vadd.f32 -1.4531521, %v1500_v43  ;;  %v2023_v17 = vmul.f32 %v1971_v35, %v5990_v34  ;;  %v6053_v14 = vmul.f32 0.70710677, %v6037_v38  ;;  %v1762_v56 = vadd.f32 -0.28449672, %v1710_v47 }
 0x3fe   :  { %v2381_v55 = vsel %vm2225_vm1, %v3316_v19, %v2329_v53  ;;  %v1969_v61 = vsub.f32 0.0, %v6010_v58  ;;  %v1350_v10 = vadd.f32 1.0, %v1298_v18  ;;  %v6059_v0 = vmul.f32 %v2432_v49, %v5978_v27  ;;  %v6552_v35 = vld [vmem:[#allocation21_spill] sm:$0xff]  ;;  %v6553_v47 = vld [vmem:[#allocation28_spill] sm:$0xff] }
 0x3ff   :  { %v6056_v16 = vpop.eup %4116  ;;  %v2433_v29 = vadd.f32 1.0, %v2381_v55  ;;  %v1604_v62 = vmul.f32 %v6042_v15, %v1552_v63  ;;  %v1244_v13 = vand.u32 2147483647, %v6053_v14  ;;  %v1814_v34 = vmul.f32 %v6000_v6, %v1762_v56  ;;  %v6555_v43 = vld [vmem:[#allocation37_spill] sm:$0xff] }
 0x400   :  { %v1503_v12 = vmul.f32 1.0614054, %v6056_v16  ;;  %4122 = vrcp.f32 %v1350_v10  ;;  %v6066_v11 = vadd.f32 %v6552_v35, %v636_v40  ;;  %v2122_v39 = vmul.f32 1.442695, %v2023_v17 }
 0x401   :  { %v6068_v21 = vmul.f32 %v2433_v29, %v1133_v42  ;;  %v1656_v2 = vadd.f32 1.4214138, %v1604_v62  ;;  %4124 = vpow2.f32 %v2116_v26  ;;  %v1296_v44 = vmul.f32 0.3275911, %v1244_v13  ;;  %v6554_v42 = vld [vmem:[#allocation50_spill] sm:$0xff] }
 0x402   :  { %v1866_v27 = vadd.f32 0.2548296, %v1814_v34  ;;  %v1555_v24 = vadd.f32 -1.4531521, %v1503_v12  ;;  %v2021_v49 = vmul.f32 %v1969_v61, %v6010_v58  ;;  %v6075_v18 = vadd.f32 %v6553_v47, %v626_v48 }
 0x403   :  { %v1708_v19 = vmul.f32 %v6042_v15, %v1656_v2  ;;  %v1348_v53 = vadd.f32 1.0, %v1296_v44  ;;  %v6081_v26 = vmul.f32 %v5968_v37, %v6554_v42  ;;  %v6084_v55 = vmul.f32 0.5, %v5893_v7 }
 0x404   :  { %v6077_v63 = vpop.eup %4118  ;;  %v1607_v58 = vmul.f32 %v6056_v16, %v1555_v24  ;;  %v6088_v17 = vmul.f32 0.70710677, %v6066_v11  ;;  %v1918_v61 = vmul.f32 %v6000_v6, %v1866_v27  ;;  %v2118_v29 = vmul.f32 1.442695, %v2021_v49 }
 0x405   :  { %v4121_v56 = vpop.eup %4120  ;;  %v1760_v10 = vadd.f32 -0.28449672, %v1708_v19  ;;  %v1501_v48 = vmul.f32 1.0614054, %v6077_v63  ;;  %4126 = vrcp.f32 %v1348_v53  ;;  %v1974_v34 = vsub.f32 0.0, %v6045_v25 }
 0x406   :  { %v1659_v40 = vadd.f32 1.4214138, %v1607_v58  ;;  %4128 = vpow2.f32 %v2122_v39  ;;  %v6093_v37 = vand.u32 2147483647, %v6088_v17  ;;  %v6098_v12 = vmul.f32 0.70710677, %v6075_v18 }
 0x407   :  { %v1812_v7 = vmul.f32 %v6042_v15, %v1760_v10  ;;  %v1553_v62 = vadd.f32 -1.4531521, %v1501_v48  ;;  %vm2230_vm2 = vcmp.lt.f32.partialorder %v5906_v20, 0.0  ;;  %v6102_v6 = vmul.f32 0.5, %v5925_v57 }
 0x408   :  { %v1711_v35 = vmul.f32 %v6056_v16, %v1659_v40  ;;  %v1972_v2 = vsub.f32 0.0, %v1244_v13  ;;  %v2178_v44 = vmul.f32 %v4121_v56, %v1918_v61  ;;  %v1299_v39 = vmul.f32 0.3275911, %v6093_v37 }
 0x409   :  { %v1864_v27 = vadd.f32 0.2548296, %v1812_v7  ;;  %v1605_v24 = vmul.f32 %v6077_v63, %v1553_v62  ;;  %v6110_v19 = vmul.f32 0.5, %v5959_v41  ;;  %4130 = vpow2.f32 %v2118_v29 }
 0x40a   :  { %v6107_v49 = vpop.eup %4122  ;;  %v1763_v53 = vadd.f32 -0.28449672, %v1711_v35  ;;  %v6113_v47 = vand.u32 2147483647, %v6098_v12  ;;  %v2026_v61 = vmul.f32 %v1974_v34, %v6045_v25  ;;  %v2024_v48 = vmul.f32 %v1972_v2, %v1244_v13 }
 0x40b   :  { %v4125_v57 = vpop.eup %4124  ;;  %v1916_v42 = vmul.f32 %v6042_v15, %v1864_v27  ;;  %v1657_v58 = vadd.f32 1.4214138, %v1605_v24  ;;  %v1506_v56 = vmul.f32 1.0614054, %v6107_v49  ;;  %v1351_v40 = vadd.f32 1.0, %v1299_v39 }
 0x40c   :  { %v1815_v10 = vmul.f32 %v6056_v16, %v1763_v53  ;;  %v1297_v41 = vmul.f32 0.3275911, %v6113_v47  ;;  %v3321_v7 = vadd.f32 -1.0, %v2178_v44  ;;  %v2334_v62 = vsub.f32 1.0, %v2178_v44 }
 0x40d   :  { %v1709_v29 = vmul.f32 %v6077_v63, %v1657_v58  ;;  %v1558_v35 = vadd.f32 -1.4531521, %v1506_v56  ;;  %v2176_v28 = vmul.f32 %v4125_v57, %v1916_v42  ;;  %vm2228_vm3 = vcmp.lt.f32.partialorder %v5956_v1, 0.0 }
 0x40e   :  { %v1867_v15 = vadd.f32 0.2548296, %v1815_v10  ;;  %4132 = vrcp.f32 %v1351_v40  ;;  %v1349_v27 = vadd.f32 1.0, %v1297_v41  ;;  %vm2231_vm4 = vcmp.lt.f32.partialorder %v5981_v36, 0.0 }
 0x40f   :  { %v6122_v24 = vpop.eup %4126  ;;  %v6126_v25 = vmul.f32 0.5, %v5986_v51  ;;  %v1761_v13 = vadd.f32 -0.28449672, %v1709_v29  ;;  %v1610_v34 = vmul.f32 %v6107_v49, %v1558_v35  ;;  %v2128_v39 = vmul.f32 1.442695, %v2026_v61  ;;  %v6556_v61 = vld [vmem:[#allocation49_spill] sm:$0xff] }
 0x410   :  { %v4129_v2 = vpop.eup %4128  ;;  %v1919_v44 = vmul.f32 %v6056_v16, %v1867_v15  ;;  %v1504_v53 = vmul.f32 1.0614054, %v6122_v24  ;;  %v2124_v57 = vmul.f32 1.442695, %v2024_v48  ;;  %v2386_v42 = vsel %vm2230_vm2, %v3321_v7, %v2334_v62  ;;  %v6557_v15 = vld [vmem:[#allocation38_spill] sm:$0xff] }
 0x411   :  { %v1813_v58 = vmul.f32 %v6077_v63, %v1761_v13  ;;  %v1662_v56 = vadd.f32 1.4214138, %v1610_v34  ;;  %4134 = vrcp.f32 %v1349_v27  ;;  %v3319_v10 = vadd.f32 -1.0, %v2176_v28 }
 0x412   :  { %v2332_v51 = vsub.f32 1.0, %v2176_v28  ;;  %v2179_v40 = vmul.f32 %v4129_v2, %v1919_v44  ;;  %v1556_v41 = vadd.f32 -1.4531521, %v1504_v53  ;;  %v2514_v16 = vpack.c.bf16 %v5929_v45, %v6555_v43  ;;  %v6558_v53 = vld [vmem:[#allocation44_spill] sm:$0xff] }
 0x413   :  { %v1865_v29 = vadd.f32 0.2548296, %v1813_v58  ;;  %v1714_v35 = vmul.f32 %v6107_v49, %v1662_v56  ;;  %v2515_v48 = vpack.c.bf16 %v6557_v15, %v6556_v61  ;;  %v4131_v3 = vpop.eup %4130  ;;  %v1975_v27 = vsub.f32 0.0, %v6093_v37  ;;  %v6559_v58 = vld [vmem:[#allocation42_spill] sm:$0xff] }
 0x414   :  { %v3322_v20 = vadd.f32 -1.0, %v2179_v40  ;;  %v2335_v7 = vsub.f32 1.0, %v2179_v40  ;;  %v1608_v62 = vmul.f32 %v6122_v24, %v1556_v41  ;;  %v2438_v13 = vadd.f32 1.0, %v2386_v42  ;;  %3434 = vmatprep.subr.bf16.mxu1 %v2514_v16  ;;  %v6561_v16 = vld [vmem:[#allocation43_spill] sm:$0xff] }
 0x415   :  { %v1917_v28 = vmul.f32 %v6077_v63, %v1865_v29  ;;  %v1766_v34 = vadd.f32 -0.28449672, %v1714_v35  ;;  %v2516_v2 = vpack.c.bf16 %v6081_v26, %v5946_v4  ;;  %v1973_v44 = vsub.f32 0.0, %v6113_v47 }
 0x416   :  { %v2387_v45 = vsel %vm2231_vm4, %v3322_v20, %v2335_v7  ;;  %v1660_v43 = vadd.f32 1.4214138, %v1608_v62  ;;  %v6560_v56 = vpack.c.bf16 %v6558_v53, %v6559_v58  ;;  %v2517_v42 = vpack.c.bf16 %v5962_v22, %v5936_v54 }
 0x417   :  { %v2384_v63 = vsel %vm2228_vm3, %v3319_v10, %v2332_v51  ;;  %v2439_v40 = vadd.f32 1.0, %v2387_v45  ;;  %v2177_v41 = vmul.f32 %v4131_v3, %v1917_v28  ;;  %v1818_v4 = vmul.f32 %v6107_v49, %v1766_v34  ;;  %v6564_v45 = vld [vmem:[#allocation25_spill] sm:$0xff] }
 0x418   :  { %3435 = vmatpush3.bf16.msra.mxu1 %v6560_v56  ;;  %v6155_v36 = vpop.eup %4132  ;;  %vm2229_vm5 = vcmp.lt.f32.partialorder %v5998_v5, 0.0  ;;  %4136 = vpow2.f32 %v2128_v39  ;;  %v1712_v26 = vmul.f32 %v6122_v24, %v1660_v43  ;;  %v2027_v29 = vmul.f32 %v1975_v27, %v6093_v37  ;;  %v6562_v5 = vld [vmem:[#allocation39_spill] sm:$0xff] }
 0x419   :  { %3436 = vmatprep.subr.bf16.mxu1 %v2515_v48  ;;  %v6161_v35 = vmul.f32 %v2438_v13, %v6084_v55  ;;  %v6164_v54 = vmul.f32 %v2439_v40, %v6110_v19  ;;  %v3320_v1 = vadd.f32 -1.0, %v2177_v41  ;;  %v2333_v3 = vsub.f32 1.0, %v2177_v41  ;;  %v6565_v43 = vld [vmem:[#allocation15_spill] sm:$0xff] }
 0x41a   :  { %v2436_v22 = vadd.f32 1.0, %v2384_v63  ;;  %v1764_v10 = vadd.f32 -0.28449672, %v1712_v26  ;;  %4138 = vpow2.f32 %v2124_v57  ;;  %v1507_v51 = vmul.f32 1.0614054, %v6155_v36  ;;  %v6568_v26 = vld [vmem:[#allocation23_spill] sm:$0xff] }
 0x41b   :  { %v6563_v39 = vpack.c.bf16 %v6561_v16, %v6562_v5  ;;  %v4135_v61 = vpop.eup %4134  ;;  %v2525_v37 = vpack.c.bf16 %v6164_v54, %v6161_v35  ;;  %v2385_v55 = vsel %vm2229_vm5, %v3320_v1, %v2333_v3  ;;  %v1870_v15 = vadd.f32 0.2548296, %v1818_v4  ;;  %v3904_v63 = vld [vmem:[%s6394_s4] ss:$16 sps:$4 sm:$0xff]   ;;  %v6567_v4 = vld [vmem:[#allocation45_spill] sm:$0xff]  ;;  %v6579_v35 = vld [vmem:[#allocation7_spill] sm:$0xff] }
 0x41c   :  { %v2025_v19 = vmul.f32 %v1973_v44, %v6113_v47  ;;  %v2437_v48 = vadd.f32 1.0, %v2385_v55  ;;  %v1816_v20 = vmul.f32 %v6122_v24, %v1764_v10  ;;  %v1559_v7 = vadd.f32 -1.4531521, %v1507_v51  ;;  %v2500_v44 = vld [vmem:[%s6394_s4 + $0x20] sm:$0xff] }
 0x41d   :  { %3437 = vmatpush3.bf16.msra.mxu1 %v6563_v39  ;;  %v1505_v57 = vmul.f32 1.0614054, %v4135_v61  ;;  %v2130_v62 = vmul.f32 1.442695, %v2027_v29  ;;  %v6175_v27 = vmul.f32 %v2436_v22, %v6102_v6  ;;  %v6566_v53 = vpack.c.bf16 %v6564_v45, %v6565_v43  ;;  %v6580_v54 = vld [vmem:[#allocation8_spill] sm:$0xff] }
 0x41e   :  { %3438 = vmatprep.subr.bf16.mxu1 %v2516_v2  ;;  %v6178_v13 = vmul.f32 %v2437_v48, %v6126_v25  ;;  %v1611_v28 = vmul.f32 %v6155_v36, %v1559_v7  ;;  %v1868_v47 = vadd.f32 0.2548296, %v1816_v20  ;;  %v2126_v2 = vmul.f32 1.442695, %v2025_v19 }
 0x41f   :  { %v1557_v34 = vadd.f32 -1.4531521, %v1505_v57  ;;  %v1922_v25 = vmul.f32 %v6107_v49, %v1870_v15  ;;  %4140 = vpow2.f32 %v2130_v62  ;;  %v6569_v29 = vpack.c.bf16 %v6567_v4, %v6568_v26  ;;  %v6572_v62 = vld [vmem:[#allocation41_spill] sm:$0xff] }
 0x420   :  { %v2524_v6 = vpack.c.bf16 %v6178_v13, %v6175_v27  ;;  %v1663_v58 = vadd.f32 1.4214138, %v1611_v28  ;;  %v3332_v1 = vcombine.high %v2500_v44, %v2500_v44  ;;  %v1920_v3 = vmul.f32 %v6122_v24, %v1868_v47  ;;  %v6582_v27 = vld [vmem:[#allocation9_spill] sm:$0xff]  ;;  %v6583_v13 = vld [vmem:[#allocation10_spill] sm:$0xff] }
 0x421   :  { %3439 = vmatpush3.bf16.msra.mxu1 %v6566_v53  ;;  %v1609_v56 = vmul.f32 %v4135_v61, %v1557_v34  ;;  %v6570_v22 = vmov 0   ;;  %4142 = vpow2.f32 %v2126_v2  ;;  %v6571_v39 = vpack.c.bf16 %v5838_v23, %v5834_v30  ;;  %v3911_v30 = vld [vmem:[%s6394_s4 + $0xc] ss:$16 sps:$4 sm:$0xff]  }
 0x422   :  { %3440 = vmatprep.subr.bf16.mxu1 %v2517_v42  ;;  %v4137_v40 = vpop.eup %4136  ;;  %v1715_v41 = vmul.f32 %v6155_v36, %v1663_v58  ;;  %v3331_v7 = vcombine.low %v2500_v44, %v2500_v44  ;;  %vm2234_vm6 = vcmp.lt.f32.partialorder %v6029_v60, 0.0  ;;  %v6573_v28 = vpack.c.bf16 %v5804_v8, %v6572_v62 }
 0x423   :  { %v1661_v42 = vadd.f32 1.4214138, %v1609_v56  ;;  %v2182_v10 = vmul.f32 %v4137_v40, %v1922_v25  ;;  %vm2578_vm7 = vcmask 261120   ;;  %vm2232_vm8 = vcmp.lt.f32.partialorder %v6053_v14, 0.0 }
 0x424   :  { %v4139_v49 = vpop.eup %4138  ;;  %v1767_v51 = vadd.f32 -0.28449672, %v1715_v41  ;;  %vm2235_vm9 = vcmp.lt.f32.partialorder %v6088_v17, 0.0  ;;  %v1143_v14 = vmul.f32 0.5, %v6066_v11  ;;  %vm2233_vm10 = vcmp.lt.f32.partialorder %v6098_v12, 0.0 }
 0x425   :  { %3441 = vmatpush3.bf16.msra.mxu1 %v6569_v29  ;;  %v1713_v16 = vmul.f32 %v4135_v61, %v1661_v42  ;;  %v2180_v55 = vmul.f32 %v4139_v49, %v1920_v3  ;;  %v3325_v24 = vadd.f32 -1.0, %v2182_v10  ;;  %v2338_v19 = vsub.f32 1.0, %v2182_v10  ;;  %v6585_v3 = vld [vmem:[#allocation12_spill] sm:$0xff] }
 0x426   :  { %2633 = vmatprep.subr.bf16.mxu1 %v6570_v22  ;;  %v1819_v5 = vmul.f32 %v6155_v36, %v1767_v51  ;;  %v6574_v31 = vpack.c.bf16 %v5901_v50, %v5898_v52  ;;  %v1141_v4 = vmul.f32 0.5, %v6075_v18  ;;  %v6575_v12 = vpack.c.bf16 %v6068_v21, %v6059_v0  ;;  %v6578_v21 = vld [vmem:[#allocation6_spill] sm:$0xff] }
 0x427   :  { %v1765_v15 = vadd.f32 -0.28449672, %v1713_v16  ;;  %v3323_v34 = vadd.f32 -1.0, %v2180_v55  ;;  %v2336_v45 = vsub.f32 1.0, %v2180_v55  ;;  %v2390_v53 = vsel %vm2234_vm6, %v3325_v24, %v2338_v19 }
 0x428   :  { %2618 = vmatmul.mubr.bf16.vlgmr.msra.gmra.mrb[8].mxu1 %v3904_v63  ;;  %v1871_v48 = vadd.f32 0.2548296, %v1819_v5  ;;  %v2442_v44 = vadd.f32 1.0, %v2390_v53  ;;  %v6576_v50 = vpack.c.bf16 %v6024_v9, %v6020_v59  ;;  %v2501_v59 = vld [vmem:[%s6394_s4 + $0x28] sm:$0xff]  ;;  %v6577_v0 = vmov 0.0|0.0  }
 0x429   :  { %2634 = vmatpush1.bf16.msra.mxu1 %v6571_v39  ;;  %2625 = vmatprep.mubr.bf16.mxu1 %v3332_v1  ;;  %v1817_v20 = vmul.f32 %v4135_v61, %v1765_v15  ;;  %v4141_v23 = vpop.eup %4140  ;;  %v2388_v25 = vsel %vm2232_vm8, %v3323_v34, %v2336_v45  ;;  %v3909_v9 = vld [vmem:[%s6394_s4 + $0x8] ss:$16 sps:$4 sm:$0xff]   ;;  %v3333_v18 = vcombine.low %v2501_v59, %v2501_v59  ;;  %v4162_v45 = vld [vmem:[#allocation2] sm:$0xff] }
 0x42a   :  { %2635 = vmatprep.subr.bf16.mxu1 %v6570_v22  ;;  %v1923_v57 = vmul.f32 %v6155_v36, %v1871_v48  ;;  %v2440_v42 = vadd.f32 1.0, %v2388_v25 }
 0x42b   :  { %v1869_v43 = vadd.f32 0.2548296, %v1817_v20  ;;  %v4143_v36 = vpop.eup %4142  ;;  %v2534_v20 = vpop.permute.xlu0 %2533 }
 0x42c   :  { %v2183_v47 = vmul.f32 %v4141_v23, %v1923_v57  ;;  %v2539_v57 = vpop.permute.xlu1 %2538 }
 0x42d   :  { %2636 = vmatpush1.bf16.msra.mxu1 %v6573_v28  ;;  %v1921_v60 = vmul.f32 %v4135_v61, %v1869_v43  ;;  %v1142_v61 = vmul.f32 0.5, %v6003_v46  ;;  %v1140_v46 = vmul.f32 0.5, %v6037_v38  ;;  %v3334_v38 = vcombine.high %v2501_v59, %v2501_v59  ;;  %v3918_v59 = vld [vmem:[%s6396_s6 + $0x20] sm:$0xff]  }
 0x42e   :  { %2637 = vmatprep.subr.bf16.mxu1 %v6570_v22  ;;  %v3326_v8 = vadd.f32 -1.0, %v2183_v47  ;;  %v2339_v2 = vsub.f32 1.0, %v2183_v47 }
 0x42f   :  { %v2181_v58 = vmul.f32 %v4143_v36, %v1921_v60  ;;  %v2494_v33 = vmul.f32 %v2442_v44, %v1142_v61  ;;  %v2492_v29 = vmul.f32 %v2440_v42, %v1140_v46  ;;  %v2544_v60 = vpop.permute.xlu0 %2543  ;;  %v4163_v36 = vld [vmem:[#allocation2 + $0x8] sm:$0xff] }
 0x430   :  { %2626 = vmatmul.mubr.bf16.gmra.mrb[12].mxu1 %v3331_v7  ;;  %v2391_v56 = vsel %vm2235_vm9, %v3326_v8, %v2339_v2 }
 0x431   :  { %2638 = vmatpush1.bf16.msra.mxu1 %v2520_v32  ;;  %3335 = vmatprep.mubr.msk.bf16.mxu1 %vm2578_vm7, %v3911_v30  ;;  %v2443_v63 = vadd.f32 1.0, %v2391_v56  ;;  %v3324_v40 = vadd.f32 -1.0, %v2181_v58  ;;  %v2337_v41 = vsub.f32 1.0, %v2181_v58  ;;  %v4164_v56 = vld [vmem:[#allocation2 + $0x10] sm:$0xff] }
 0x432   :  { %2639 = vmatprep.subr.bf16.mxu1 %v6570_v22 }
 0x433   :  { %v2495_v32 = vmul.f32 %v2443_v63, %v1143_v14  ;;  %v2389_v17 = vsel %vm2233_vm10, %v3324_v40, %v2337_v41  ;;  %v3914_v40 = vld [vmem:[%s6396_s6] sm:$0xff]  }
 0x434   :  { %v2441_v11 = vadd.f32 1.0, %v2389_v17 }
 0x435   :  { %2640 = vmatpush1.bf16.msra.mxu1 %v6574_v31  ;;  %v2527_v26 = vpack.c.bf16 %v2495_v32, %v2494_v33 }
 0x436   :  { %2641 = vmatprep.subr.bf16.mxu1 %v6570_v22  ;;  %v2493_v1 = vmul.f32 %v2441_v11, %v1141_v4 }
 0x438   :  { %v2526_v52 = vpack.c.bf16 %v2493_v1, %v2492_v29 }
 0x439   :  { %2642 = vmatpush1.bf16.msra.mxu1 %v6575_v12  ;;  %v3915_v12 = vld [vmem:[%s6396_s6 + $0x8] sm:$0xff]  }
 0x43a   :  { %2643 = vmatprep.subr.bf16.mxu1 %v6570_v22 }
 0x43d   :  { %2644 = vmatpush1.bf16.msra.mxu1 %v6576_v50  ;;  %v3917_v50 = vld [vmem:[%s6396_s6 + $0x18] sm:$0xff]  }
 0x43e   :  { %2645 = vmatprep.subr.bf16.mxu1 %v6570_v22 }
 0x441   :  { %2646 = vmatpush1.bf16.msra.mxu1 %v2524_v6  ;;  %v6584_v6 = vld [vmem:[#allocation11_spill] sm:$0xff] }
 0x442   :  { %2647 = vmatprep.subr.bf16.mxu1 %v6570_v22 }
 0x445   :  { %2648 = vmatpush1.bf16.msra.mxu1 %v2525_v37  ;;  %v6581_v37 = vmov 0.0  }
 0x446   :  { %2649 = vmatprep.subr.bf16.mxu1 %v6570_v22 }
 0x449   :  { %2650 = vmatpush1.bf16.msra.mxu1 %v2526_v52  ;;  %v3916_v52 = vld [vmem:[%s6396_s6 + $0x10] sm:$0xff]  }
 0x44a   :  { %2651 = vmatprep.subr.bf16.mxu1 %v6570_v22  ;;  %v6586_v22 = vld [vmem:[#allocation13_spill] sm:$0xff] }
 0x44d   :  { %2652 = vmatpush1.bf16.msra.mxu1 %v2527_v26 }
 0x44e   :  { %3820 = vmatprep.subr.bf16.mxu1 %v6577_v0 }
 0x450   :  { %2666 = vmatmul.mubr.bf16.vlgmr.msra.gmra.mrb[16].mxu1 %v3909_v9  ;;  %v3919_v9 = vld [vmem:[%s6396_s6 + $0x28] sm:$0xff]  }
 0x451   :  { %3336 = vmatprep.mubr.msk.bf16.mxu1 %vm2578_vm7, %v3334_v38  ;;  %3822 = vmatpush3.bf16.msra.mxu1 %v6578_v21  ;;  %v3920_v38 = vld [vmem:[%s6396_s6 + $0x30] sm:$0xff]  }
 0x452   :  { %3823 = vmatprep.subr.bf16.mxu1 %v6577_v0 }
 0x455   :  { %3825 = vmatpush3.bf16.msra.mxu1 %v6579_v35 }
 0x456   :  { %3826 = vmatprep.subr.bf16.mxu1 %v6577_v0 }
 0x458   :  { %2674 = vmatmul.mubr.bf16.gmra.mrb[20].mxu1 %v3333_v18 }
 0x459   :  { %3828 = vmatpush3.bf16.msra.mxu1 %v6580_v54  ;;  %3682 = vmatprep.mubr.msk.f32.mxu1 %vm4190_vm0, %v6581_v37 }
 0x45a   :  { %3829 = vmatprep.subr.bf16.mxu1 %v6577_v0 }
 0x45d   :  { %3831 = vmatpush3.bf16.msra.mxu1 %v6582_v27 }
 0x45e   :  { %3832 = vmatprep.subr.bf16.mxu1 %v6577_v0 }
 0x461   :  { %3834 = vmatpush3.bf16.msra.mxu1 %v6583_v13 }
 0x462   :  { %3835 = vmatprep.subr.bf16.mxu1 %v6577_v0 }
 0x465   :  { %3837 = vmatpush3.bf16.msra.mxu1 %v6584_v6 }
 0x466   :  { %3838 = vmatprep.subr.bf16.mxu1 %v6577_v0 }
 0x469   :  { %3840 = vmatpush3.bf16.msra.mxu1 %v6585_v3 }
 0x46a   :  { %3841 = vmatprep.subr.bf16.mxu1 %v6577_v0  ;;  %v3921_v0 = vld [vmem:[%s6396_s6 + $0x38] sm:$0xff]  }
 0x46d   :  { %3843 = vmatpush3.bf16.msra.mxu1 %v6586_v22 }
 0x46e   :  { %3732 = vmatprep.subr.bf16.mxu1 %v3914_v40 }
 0x4fb   :  { %v3442_v49 = vpop.f32.mrb[8].mxu1 }
 0x4fc   :  { %v3443_v10 = vpop.f32.mrb[9].mxu1 }
 0x4fd   :  { %v3444_v51 = vadd.f32 %v3443_v10, %v3442_v49  ;;  %v3445_v16 = vpop.f32.mrb[10].mxu1  ;;  %v3337_v10 = vld [vmem:[%s6402_s12] ss:$0 sm:$0xff] }
 0x4fe   :  { %v3446_v5 = vpop.f32.mrb[11].mxu1 }
 0x4ff   :  { %v3447_v39 = vadd.f32 %v3446_v5, %v3445_v16  ;;  %v2620_v7 = vadd.f32 %v3444_v51, %v2534_v20 }
 0x501   :  { %v2623_v23 = vadd.f32 %v3447_v39, %v2539_v57  ;;  %v3338_v39 = vld [vmem:[%s6403_s13] ss:$0 sm:$0xff] }
 0x503   :  { %v3448_v55 = vpop.f32.mrb[12].mxu1 }
 0x504   :  { %v3449_v15 = vpop.f32.mrb[13].mxu1 }
 0x505   :  { %v3450_v24 = vadd.f32 %v3449_v15, %v3448_v55  ;;  %v3451_v19 = vpop.f32.mrb[14].mxu1 }
 0x506   :  { %v3452_v48 = vpop.f32.mrb[15].mxu1 }
 0x507   :  { %v2628_v2 = vadd.f32 %v3450_v24, %v2544_v60  ;;  %v3929_v60 = vld [vmem:[%s6398_s8 + $0x38] sm:$0xff]  }
 0x523   :  { %v2667_v62 = vpop.f32.mrb[16].mxu1 }
 0x524   :  { %v2668_v28 = vadd.f32 %v2667_v62, %v2620_v7  ;;  %v2669_v30 = vpop.f32.mrb[17].mxu1 }
 0x525   :  { %v2670_v34 = vpop.f32.mrb[18].mxu1  ;;  %v3923_v30 = vld [vmem:[%s6398_s8 + $0x8] sm:$0xff]  }
 0x526   :  { %v6271_v43 = vadd.f32 %v4162_v45, %v2668_v28  ;;  %v2671_v53 = vadd.f32 %v2670_v34, %v2623_v23  ;;  %v2672_v47 = vpop.f32.mrb[19].mxu1  ;;  %v3922_v28 = vld [vmem:[%s6398_s8] sm:$0xff]   ;;  %v3924_v23 = vld [vmem:[%s6398_s8 + $0x10] sm:$0xff]   ;;  %v3925_v34 = vld [vmem:[%s6398_s8 + $0x18] sm:$0xff]  }
 0x527   :  { %3752 = vmatprep.subr.bf16.mxu0 %v3922_v28  ;;  %v3926_v45 = vld [vmem:[%s6398_s8 + $0x20] sm:$0xff]   ;;  %v3928_v47 = vld [vmem:[%s6398_s8 + $0x30] sm:$0xff]  }
 0x528   :  { %3683 = vmatmul.mubr.f32.vlgmr.msra.gmra.mrb[6].mxu1 %v6271_v43  ;;  %v6276_v8 = vadd.f32 %v4163_v36, %v2671_v53  ;;  %v3927_v53 = vld [vmem:[%s6398_s8 + $0x28] sm:$0xff]   ;;  %v3339_v36 = vld [vmem:[%s6397_s7] ss:$0 sm:$0xff] }
 0x529   :  { %3685 = vmatprep.mubr.msk.f32.mxu1 %vm4190_vm0, %v6581_v37  ;;  %3733 = vmatpush3.bf16.msra.mxu1 %v3914_v40 }
 0x52a   :  { %3734 = vmatprep.subr.bf16.mxu1 %v3915_v12 }
 0x52b   :  { %v2675_v44 = vpop.f32.mrb[20].mxu1 }
 0x52c   :  { %v2676_v25 = vadd.f32 %v2675_v44, %v2628_v2  ;;  %3686 = vmatmul.mubr.f32.gmra.mrb[24].mxu1 %v6276_v8  ;;  %v2677_v58 = vpop.f32.mrb[21].mxu1 }
 0x52d   :  { %v2678_v61 = vpop.f32.mrb[22].mxu1  ;;  %3688 = vmatprep.mubr.msk.f32.mxu1 %vm4190_vm0, %v6581_v37  ;;  %3735 = vmatpush3.bf16.msra.mxu1 %v3915_v12 }
 0x52e   :  { %v6281_v14 = vadd.f32 %v4164_v56, %v2676_v25  ;;  %v2679_v63 = vpop.f32.mrb[23].mxu1  ;;  %3736 = vmatprep.subr.bf16.mxu1 %v3916_v52 }
 0x530   :  { %3689 = vmatmul.mubr.f32.gmra.mrb[26].mxu1 %v6281_v14 }
 0x531   :  { %3737 = vmatpush3.bf16.msra.mxu1 %v3916_v52 }
 0x532   :  { %3738 = vmatprep.subr.bf16.mxu1 %v3917_v50 }
 0x535   :  { %3739 = vmatpush3.bf16.msra.mxu1 %v3917_v50 }
 0x536   :  { %3740 = vmatprep.subr.bf16.mxu1 %v3918_v59 }
 0x539   :  { %3741 = vmatpush3.bf16.msra.mxu1 %v3918_v59 }
 0x53a   :  { %3742 = vmatprep.subr.bf16.mxu1 %v3919_v9 }
 0x53d   :  { %3743 = vmatpush3.bf16.msra.mxu1 %v3919_v9 }
 0x53e   :  { %3744 = vmatprep.subr.bf16.mxu1 %v3920_v38 }
 0x541   :  { %3745 = vmatpush3.bf16.msra.mxu1 %v3920_v38 }
 0x542   :  { %3746 = vmatprep.subr.bf16.mxu1 %v3921_v0 }
 0x545   :  { %3747 = vmatpush3.bf16.msra.mxu1 %v3921_v0 }
 0x5fb   :  { %v2752_v41 = vpop.f32.mrb[6].mxu1 }
 0x5fc   :  { %v2766_v42 = vsub.f32 %v6271_v43, %v2752_v41  ;;  %v3684_v31 = vpop.f32.mrb[7].mxu1 }
 0x5fe   :  { %v2769_v33 = vmul.f32 %v2766_v42, %v2766_v42 }
 0x5ff   :  { %v2757_v32 = vpop.f32.mrb[24].mxu1 }
 0x600   :  { %v2767_v17 = vsub.f32 %v6276_v8, %v2757_v32  ;;  %v3687_v46 = vpop.f32.mrb[25].mxu1  ;;  %3724 = vmatmul.mubr.f32.vlgmr.msra.gmra.mrb[6].mxu0 %v2769_v33 }
 0x601   :  { %3726 = vmatprep.mubr.msk.f32.mxu0 %vm4190_vm0, %v6581_v37  ;;  %3753 = vmatpush3.bf16.msra.mxu0 %v3922_v28 }
 0x602   :  { %v2770_v4 = vmul.f32 %v2767_v17, %v2767_v17  ;;  %3754 = vmatprep.subr.bf16.mxu0 %v3923_v30 }
 0x603   :  { %v2762_v11 = vpop.f32.mrb[26].mxu1 }
 0x604   :  { %v2768_v26 = vsub.f32 %v6281_v14, %v2762_v11  ;;  %v3690_v29 = vpop.f32.mrb[27].mxu1  ;;  %3727 = vmatmul.mubr.f32.gmra.mrb[60].mxu0 %v2770_v4 }
 0x605   :  { %3729 = vmatprep.mubr.msk.f32.mxu0 %vm4190_vm0, %v6581_v37  ;;  %3755 = vmatpush3.bf16.msra.mxu0 %v3923_v30 }
 0x606   :  { %v2771_v1 = vmul.f32 %v2768_v26, %v2768_v26  ;;  %3756 = vmatprep.subr.bf16.mxu0 %v3924_v23 }
 0x608   :  { %3730 = vmatmul.mubr.f32.gmra.mrb[62].mxu0 %v2771_v1 }
 0x609   :  { %3757 = vmatpush3.bf16.msra.mxu0 %v3924_v23 }
 0x60a   :  { %3758 = vmatprep.subr.bf16.mxu0 %v3925_v34 }
 0x60d   :  { %3759 = vmatpush3.bf16.msra.mxu0 %v3925_v34 }
 0x60e   :  { %3760 = vmatprep.subr.bf16.mxu0 %v3926_v45 }
 0x611   :  { %3761 = vmatpush3.bf16.msra.mxu0 %v3926_v45 }
 0x612   :  { %3762 = vmatprep.subr.bf16.mxu0 %v3927_v53 }
 0x615   :  { %3763 = vmatpush3.bf16.msra.mxu0 %v3927_v53 }
 0x616   :  { %3764 = vmatprep.subr.bf16.mxu0 %v3928_v47 }
 0x619   :  { %3765 = vmatpush3.bf16.msra.mxu0 %v3928_v47 }
 0x61a   :  { %3766 = vmatprep.subr.bf16.mxu0 %v3929_v60 }
 0x61d   :  { %3767 = vmatpush3.bf16.msra.mxu0 %v3929_v60 }
 0x6d3   :  { %v2838_v21 = vpop.f32.mrb[6].mxu0 }
 0x6d4   :  { %v2839_v18 = vadd.f32 1e-05, %v2838_v21  ;;  %v3725_v35 = vpop.f32.mrb[7].mxu0 }
 0x6d6   :  { %4144 = vrsqrt.f32 %v2839_v18 }
 0x6d7   :  { %v2843_v54 = vpop.f32.mrb[60].mxu0 }
 0x6d8   :  { %v2844_v37 = vadd.f32 1e-05, %v2843_v54  ;;  %v3728_v27 = vpop.f32.mrb[61].mxu0 }
 0x6da   :  { %4146 = vrsqrt.f32 %v2844_v37 }
 0x6db   :  { %v2848_v13 = vpop.f32.mrb[62].mxu0 }
 0x6dc   :  { %v2849_v6 = vadd.f32 1e-05, %v2848_v13  ;;  %v3731_v3 = vpop.f32.mrb[63].mxu0 }
 0x6de   :  { %4148 = vrsqrt.f32 %v2849_v6 }
 0x6e0   :  { %v4145_v22 = vpop.eup %4144 }
 0x6e1   :  { %v2855_v49 = vmul.f32 %v4145_v22, %v2766_v42 }
 0x6e3   :  { %v2864_v5 = vmul.f32 %v3337_v10, %v2855_v49 }
 0x6e4   :  { %v4147_v51 = vpop.eup %4146 }
 0x6e5   :  { %v2856_v16 = vmul.f32 %v4147_v51, %v2767_v17  ;;  %v2873_v19 = vadd.f32 %v3338_v39, %v2864_v5 }
 0x6e7   :  { %v2865_v55 = vmul.f32 %v3337_v10, %v2856_v16 }
 0x6e8   :  { %v4149_v15 = vpop.eup %4148 }
 0x6e9   :  { %v2857_v24 = vmul.f32 %v4149_v15, %v2768_v26  ;;  %v2874_v48 = vadd.f32 %v3338_v39, %v2865_v55 }
 0x6eb   :  { %v2866_v20 = vmul.f32 %v3337_v10, %v2857_v24  ;;  %v2876_v7 = vpack.c.bf16 %v2874_v48, %v2873_v19 }
 0x6ed   :  { %v2875_v57 = vadd.f32 %v3338_v39, %v2866_v20  ;;  %3748 = vmatprep.mubr.bf16.mxu1 %v2876_v7 }
 0x6ef   :  { %v2877_v62 = vpack.c.bf16 %v2875_v57, %v2875_v57 }
 0x6f1   :  { %3749 = vmatmul.mubr.bf16.vlgmr.msra.gmra.mrb[28].mxu1 %v2877_v62 }
 0x7c4   :  { %v3750_v2 = vpop.f32.mrb[28].mxu1 }
 0x7c5   :  { %v6348_v44 = vadd.f32 %v3750_v2, %v3339_v36  ;;  %v2983_v25 = vpop.f32.mrb[29].mxu1 }
 0x7c6   :  { %v6350_v58 = vadd.f32 %v3339_v36, %v2983_v25  ;;  %v3751_v61 = vpop.f32.mrb[30].mxu1 }
 0x7c7   :  { %v6353_v56 = vmul.f32 0.70710677, %v6348_v44  ;;  %v2986_v63 = vpop.f32.mrb[31].mxu1 }
 0x7c8   :  { %v6356_v40 = vmul.f32 0.70710677, %v6350_v58  ;;  %v6358_v41 = vadd.f32 %v3339_v36, %v2986_v63 }
 0x7c9   :  { %v3005_v42 = vand.u32 2147483647, %v6353_v56  ;;  %vm3062_vm0 = vcmp.lt.f32.partialorder %v6353_v56, 0.0 }
 0x7ca   :  { %v3003_v31 = vand.u32 2147483647, %v6356_v40  ;;  %v6363_v33 = vmul.f32 0.70710677, %v6358_v41  ;;  %vm3060_vm11 = vcmp.lt.f32.partialorder %v6356_v40, 0.0  ;;  %v2998_v56 = vmul.f32 0.5, %v6358_v41 }
 0x7cb   :  { %v3008_v32 = vmul.f32 0.3275911, %v3005_v42  ;;  %v3047_v1 = vsub.f32 0.0, %v3005_v42 }
 0x7cc   :  { %v3006_v17 = vmul.f32 0.3275911, %v3003_v31  ;;  %v3004_v46 = vand.u32 2147483647, %v6363_v33  ;;  %v3045_v12 = vsub.f32 0.0, %v3003_v31  ;;  %vm3061_vm12 = vcmp.lt.f32.partialorder %v6363_v33, 0.0 }
 0x7cd   :  { %v3011_v4 = vadd.f32 1.0, %v3008_v32  ;;  %v3050_v50 = vmul.f32 %v3047_v1, %v3005_v42  ;;  %v2999_v1 = vmul.f32 0.5, %v6348_v44 }
 0x7ce   :  { %v3009_v11 = vadd.f32 1.0, %v3006_v17  ;;  %v3007_v26 = vmul.f32 0.3275911, %v3004_v46  ;;  %v3046_v59 = vsub.f32 0.0, %v3004_v46  ;;  %v3048_v0 = vmul.f32 %v3045_v12, %v3003_v31 }
 0x7cf   :  { %4150 = vrcp.f32 %v3011_v4  ;;  %v3055_v54 = vmul.f32 1.442695, %v3050_v50 }
 0x7d0   :  { %4152 = vrcp.f32 %v3009_v11  ;;  %v3010_v29 = vadd.f32 1.0, %v3007_v26  ;;  %v3049_v27 = vmul.f32 %v3046_v59, %v3004_v46  ;;  %v3051_v6 = vmul.f32 1.442695, %v3048_v0 }
 0x7d2   :  { %4154 = vrcp.f32 %v3010_v29  ;;  %v3053_v16 = vmul.f32 1.442695, %v3049_v27 }
 0x7d3   :  { %4156 = vpow2.f32 %v3055_v54 }
 0x7d4   :  { %4158 = vpow2.f32 %v3051_v6 }
 0x7d5   :  { %4160 = vpow2.f32 %v3053_v16 }
 0x7d9   :  { %v4151_v52 = vpop.eup %4150 }
 0x7da   :  { %v4153_v9 = vpop.eup %4152  ;;  %v3020_v38 = vmul.f32 1.0614054, %v4151_v52 }
 0x7db   :  { %v3018_v21 = vmul.f32 1.0614054, %v4153_v9 }
 0x7dc   :  { %v3023_v18 = vadd.f32 -1.4531521, %v3020_v38  ;;  %v4155_v35 = vpop.eup %4154 }
 0x7dd   :  { %v3021_v37 = vadd.f32 -1.4531521, %v3018_v21  ;;  %v3019_v3 = vmul.f32 1.0614054, %v4155_v35  ;;  %v4157_v34 = vpop.eup %4156  ;;  %v3351_v21 = vld [vmem:[%s6399_s9] ss:$0 sm:$0xff] }
 0x7de   :  { %v3026_v13 = vmul.f32 %v4151_v52, %v3023_v18  ;;  %v4159_v53 = vpop.eup %4158  ;;  %s4165_s9 = scalar_lea.vmem %s3211_s2, 384 }
 0x7df   :  { %v3024_v22 = vmul.f32 %v4153_v9, %v3021_v37  ;;  %v3022_v10 = vadd.f32 -1.4531521, %v3019_v3  ;;  %v4161_v63 = vpop.eup %4160  ;;  %p4166_p0 = scmp.ne.s32.totalorder %s3211_s2, %s4165_s9  ;;  %p4171_p2 = scmp.lt.s32.totalorder %s4165_s9, %s4165_s9 }
 0x7e0   :  { %v3029_v49 = vadd.f32 1.4214138, %v3026_v13 }
 0x7e1   :  { %v3027_v51 = vadd.f32 1.4214138, %v3024_v22  ;;  %v3025_v39 = vmul.f32 %v4155_v35, %v3022_v10  ;;  %p4172_p3 = por %p4171_p2, %p4170_p1 }
 0x7e2   :  { %v3032_v5 = vmul.f32 %v4151_v52, %v3029_v49 }
 0x7e3   :  { %v3030_v55 = vmul.f32 %v4153_v9, %v3027_v51  ;;  %v3028_v24 = vadd.f32 1.4214138, %v3025_v39  ;;  %p4173_p4 = pnand %p4172_p3, %p4166_p0 }
 0x7e4   :  { %v3035_v15 = vadd.f32 -0.28449672, %v3032_v5 }
 0x7e5   :  { %v3033_v19 = vadd.f32 -0.28449672, %v3030_v55  ;;  %v3031_v20 = vmul.f32 %v4155_v35, %v3028_v24 }
 0x7e6   :  { %v3038_v48 = vmul.f32 %v4151_v52, %v3035_v15 }
 0x7e7   :  { %v3036_v7 = vmul.f32 %v4153_v9, %v3033_v19  ;;  %v3034_v62 = vadd.f32 -0.28449672, %v3031_v20 }
 0x7e8   :  { %v3041_v57 = vadd.f32 0.2548296, %v3038_v48 }
 0x7e9   :  { %v3039_v28 = vadd.f32 0.2548296, %v3036_v7  ;;  %v3037_v23 = vmul.f32 %v4155_v35, %v3034_v62 }
 0x7ea   :  { %v3044_v30 = vmul.f32 %v4151_v52, %v3041_v57  ;;  %v2997_v52 = vmul.f32 0.5, %v6350_v58 }
 0x7eb   :  { %v3042_v45 = vmul.f32 %v4153_v9, %v3039_v28  ;;  %v3040_v60 = vadd.f32 0.2548296, %v3037_v23 }
 0x7ec   :  { %v3059_v47 = vmul.f32 %v4157_v34, %v3044_v30 }
 0x7ed   :  { %v3057_v36 = vmul.f32 %v4159_v53, %v3042_v45  ;;  %v3043_v61 = vmul.f32 %v4155_v35, %v3040_v60 }
 0x7ee   :  { %v3350_v2 = vadd.f32 -1.0, %v3059_v47  ;;  %v3068_v25 = vsub.f32 1.0, %v3059_v47 }
 0x7ef   :  { %v3348_v42 = vadd.f32 -1.0, %v3057_v36  ;;  %v3066_v31 = vsub.f32 1.0, %v3057_v36  ;;  %v3058_v17 = vmul.f32 %v4161_v63, %v3043_v61 }
 0x7f0   :  { %v3071_v32 = vsel %vm3062_vm0, %v3350_v2, %v3068_v25 }
 0x7f1   :  { %v3069_v46 = vsel %vm3060_vm11, %v3348_v42, %v3066_v31  ;;  %v3074_v4 = vadd.f32 1.0, %v3071_v32  ;;  %v3349_v11 = vadd.f32 -1.0, %v3058_v17  ;;  %v3067_v26 = vsub.f32 1.0, %v3058_v17 }
 0x7f2   :  { %v3072_v29 = vadd.f32 1.0, %v3069_v46 }
 0x7f3   :  { %v3070_v12 = vsel %vm3061_vm12, %v3349_v11, %v3067_v26  ;;  %v3077_v59 = vmul.f32 %v3074_v4, %v2999_v1 }
 0x7f4   :  { %v3073_v50 = vadd.f32 1.0, %v3070_v12  ;;  %v3075_v9 = vmul.f32 %v3072_v29, %v2997_v52 }
 0x7f5   :  { %v3079_v0 = vpack.c.bf16 %v3077_v59, %v3077_v59 }
 0x7f6   :  { %v3076_v38 = vmul.f32 %v3073_v50, %v2998_v56 }
 0x7f8   :  { %v3078_v40 = vpack.c.bf16 %v3076_v38, %v3075_v9 }
 0x7fa   :  { %3768 = vmatprep.mubr.bf16.mxu0 %v3078_v40 }
 0x7fb   :  { %3769 = vmatmul.mubr.bf16.vlgmr.msra.gmra.mrb[64].mxu0 %v3079_v0 }
 0x8ce   :  { %v3770_v33 = vpop.f32.mrb[64].mxu0 }
 0x8cf   :  { %v3194_v18 = vadd.f32 %v3770_v33, %v3351_v21  ;;  %v3185_v44 = vpop.f32.mrb[65].mxu0 }
 0x8d0   :  { %v3186_v35 = vadd.f32 %v3351_v21, %v3185_v44  ;;  %v3771_v54 = vpop.f32.mrb[66].mxu0 }
 0x8d1   :  { %v3201_v58 = vadd.f32 %v3194_v18, %v6281_v14  ;;  %v3188_v41 = vpop.f32.mrb[67].mxu0 }
 0x8d2   :  { %v3199_v37 = vadd.f32 %v3186_v35, %v6271_v43  ;;  %v3189_v27 = vadd.f32 %v3351_v21, %v3188_v41 }
 0x8d3   :  { %3204 = vst [vmem:[#allocation3 + $0x10] sm:$0xff] %v3201_v58 }
 0x8d4   :  { %3202 = vst [vmem:[#allocation3] sm:$0xff] %v3199_v37  ;;  %v3200_v13 = vadd.f32 %v3189_v27, %v6276_v8 }
 0x8d6   :  { %3203 = vst [vmem:[#allocation3 + $0x8] sm:$0xff] %v3200_v13 }
 0x8d7   :  { %4176 = shalt.err (!%p4173_p4)
}
 0x8d8   :  { %s4177_s18 = scalar_lea.hbm %s6405_s15, 384 }
 0x8d9   :  { %p4178_p5 = scmp.ne.s32.totalorder %s6405_s15, %s4177_s18  ;;  %p4181_p6 = scmp.lt.u32.totalorder %s4177_s18, %s6405_s15 }
 0x8db   :  { %p4183_p7 = pnand %p4181_p6, %p4178_p5 }
 0x8dd   :  { %4186 = shalt.err (!%p4183_p7)
}
 0x8de   :  { %s4194_s22 = smov 128   ;;  %s4195_s12 = smov 8  }
 0x8df   :  { %3216 = dma.vmem_to_hbm [thread:$0]  %s3211_s2, 384, %s6405_s15, [#allocation4], %s4194_s22, %s4194_s22, %s4195_s12  }
 0x8e0   :  { %4187 = dma.done.wait [#allocation4], 384  }
 0x8e1   :  { %4188 = vsyncadd [#allocation4], 4294966912 }
 0x8e2   :  { %3220 = vsyncpa [#allocation4], 1 }

</bundles_post_ra>
